<compile_context>
chip_gen: v7x
topology: tpu7x:2x2x1
jax: 0.10.0
libtpu: 0.0.40
codegen_flags: <defaults>
</compile_context>

<pallas_src>
import math
import functools

import jax
import jax.numpy as jnp
from jax import lax
from jax.experimental import pallas as pl
from jax.experimental.pallas import tpu as pltpu


def _largest_divisor_tile(dim, candidates):
    for c in candidates:
        if c <= dim and dim % c == 0:
            return c
    return dim  # fallback: full extent  # TODO(synk): pad ragged dims instead


# ---------------------------------------------------------------------------
# Kernel A: stacked LSTM recurrence (layer-0 input = pre-gathered embeddings)
# ---------------------------------------------------------------------------
def _lstm_recurrence_kernel(x_ref,        # VMEM (T, D)      bf16  embedded tokens
                            wih_ref,      # VMEM (nl, D, 4H) bf16  (gate cols i,f,o,g)
                            whh_ref,      # VMEM (nl, H, 4H) bf16  (gate cols i,f,o,g)
                            b_ref,        # VMEM (nl, 1, 4H) f32   (b_ih + b_hh, permuted)
                            seq_ref,      # out  (T, H) bf16 (layer outputs / working buffer)
                            hT_ref,       # out  (nl, H) f32
                            cT_ref,       # out  (nl, H) f32
                            gates_scr,    # VMEM scratch (chunk, 4H) f32
                            hrows_scr,    # VMEM scratch (8, H) f32
                            *, num_layers, hidden_dim, chunk):
    T = seq_ref.shape[0]
    H = hidden_dim
    n_chunks = T // chunk
    blks_per_chunk = chunk // 8

    for l in range(num_layers):                       # static layer loop
        wih_l = wih_ref[l]                            # (D, 4H) bf16, layer invariant
        whh_l = whh_ref[l]                            # (H, 4H) bf16, layer invariant
        b_l = b_ref[l]                                # (1, 4H)  f32

        def chunk_body(c, carry):
            h, cell = carry                           # (1, H) f32 loop-carried
            base = pl.multiple_of(c * chunk, 8)
            # Input-gate GEMM for this chunk only (bf16 operands, f32 acc).
            if l == 0:
                x_chunk = x_ref[pl.ds(base, chunk), :]
            else:
                x_chunk = seq_ref[pl.ds(base, chunk), :]
            gates_scr[...] = (jnp.dot(x_chunk, wih_l,
                                      preferred_element_type=jnp.float32) + b_l)

            def blk_body(blk, carry2):
                h, cell = carry2
                boff = pl.multiple_of(blk * 8, 8)
                g_blk = gates_scr[pl.ds(boff, 8), :]          # aligned (8, 4H) load
                for j in range(8):                            # unrolled serial steps
                    g = g_blk[j:j + 1, :] + jnp.dot(
                        h.astype(jnp.bfloat16), whh_l,
                        preferred_element_type=jnp.float32)   # (1, 4H) f32
                    sig = jax.nn.sigmoid(g[:, 0:3 * H])       # i, f, o together
                    g_g = jnp.tanh(g[:, 3 * H:4 * H])
                    i_g = sig[:, 0:H]
                    f_g = sig[:, H:2 * H]
                    o_g = sig[:, 2 * H:3 * H]
                    cell = f_g * cell + i_g * g_g
                    h = o_g * jnp.tanh(cell)
                    hrows_scr[j:j + 1, :] = h
                row0 = pl.multiple_of(base + boff, 8)
                # one full (8, H) store per 8 steps, cast to bf16 at the store
                seq_ref[pl.ds(row0, 8), :] = hrows_scr[...].astype(seq_ref.dtype)
                return (h, cell)

            return lax.fori_loop(0, blks_per_chunk, blk_body, (h, cell))

        h0 = jnp.zeros((1, H), jnp.float32)
        c0 = jnp.zeros((1, H), jnp.float32)
        h_fin, c_fin = lax.fori_loop(0, n_chunks, chunk_body, (h0, c0))

        hT_ref[pl.ds(l, 1), :] = h_fin
        cT_ref[pl.ds(l, 1), :] = c_fin


# ---------------------------------------------------------------------------
# Kernel B: tiled FC head  scores = seq @ W_fc^T + b_fc
# ---------------------------------------------------------------------------
def _fc_head_kernel_fullk(a_ref, w_ref, bias_ref, o_ref):
    # single-shot tile: no k grid axis, no f32 accumulator round-trip
    o_ref[...] = (jnp.dot(a_ref[...], w_ref[...],
                          preferred_element_type=jnp.float32) + bias_ref[...])


def _fc_head_kernel_acc(a_ref, w_ref, bias_ref, o_ref, acc_ref):
    @pl.when(pl.program_id(2) == 0)
    def _():
        acc_ref[...] = jnp.broadcast_to(bias_ref[...], acc_ref.shape)

    acc_ref[...] += jnp.dot(a_ref[...], w_ref[...],
                            preferred_element_type=jnp.float32)

    @pl.when(pl.program_id(2) == pl.num_programs(2) - 1)
    def _():
        o_ref[...] = acc_ref[...]


def _fc_head(seq_bf16, wfc_t_bf16, b_fc):
    T, H = seq_bf16.shape
    V = wfc_t_bf16.shape[1]
    tm = _largest_divisor_tile(T, (512, 256, 128, 64, 32, 16, 8))
    tn = _largest_divisor_tile(V, (512, 384, 256, 128))
    bias2d = b_fc[None, :].astype(jnp.float32)

    if H <= 1024:
        return pl.pallas_call(
            _fc_head_kernel_fullk,
            out_shape=jax.ShapeDtypeStruct((T, V), jnp.float32),
            grid=(T // tm, V // tn),
            in_specs=[pl.BlockSpec((tm, H), lambda i, j: (i, 0)),
                      pl.BlockSpec((H, tn), lambda i, j: (0, j)),
                      pl.BlockSpec((1, tn), lambda i, j: (0, j))],
            out_specs=pl.BlockSpec((tm, tn), lambda i, j: (i, j)),
            compiler_params=pltpu.CompilerParams(
                dimension_semantics=("parallel", "parallel"),
                vmem_limit_bytes=32 * 1024 * 1024),
        )(seq_bf16, wfc_t_bf16, bias2d)

    tk = _largest_divisor_tile(H, (512, 256, 128))
    return pl.pallas_call(
        _fc_head_kernel_acc,
        out_shape=jax.ShapeDtypeStruct((T, V), jnp.float32),
        grid=(T // tm, V // tn, H // tk),
        in_specs=[pl.BlockSpec((tm, tk), lambda i, j, k: (i, k)),
                  pl.BlockSpec((tk, tn), lambda i, j, k: (k, j)),
                  pl.BlockSpec((1, tn), lambda i, j, k: (0, j))],
        out_specs=pl.BlockSpec((tm, tn), lambda i, j, k: (i, j)),
        scratch_shapes=[pltpu.VMEM((tm, tn), jnp.float32)],
        compiler_params=pltpu.CompilerParams(
            dimension_semantics=("parallel", "parallel", "arbitrary"),
            vmem_limit_bytes=32 * 1024 * 1024),
    )(seq_bf16, wfc_t_bf16, bias2d)


# ---------------------------------------------------------------------------
# Wrapper
# ---------------------------------------------------------------------------
def lstm_forward(x_ids, params, *, num_layers, hidden_dim):
    N, L = x_ids.shape
    T = N * L
    H = hidden_dim
    V, D = params["emb"].shape
    assert D == H, "embedding_dim and hidden_dim don't match (tie_weights)"
    assert T % 8 == 0, "T = N*L must be a multiple of 8"  # TODO(synk): pad ragged T

    chunk = _largest_divisor_tile(T, (512, 256, 128, 64, 32, 16, 8))

    # time-major-then-batch flattening, exactly like the PyTorch per-timestep loop
    seq_ids = x_ids.T.reshape(T).astype(jnp.int32)

    # Embedding gather in XLA (keeps the V x D table out of VMEM); dropout = identity.
    x_emb = params["emb"][seq_ids].astype(jnp.bfloat16)                   # (T, D) bf16

    # Permute gate columns [i, f, g, o] -> [i, f, o, g] so the kernel applies a
    # single sigmoid over 3H lanes and a single tanh over H lanes per step.
    gate_perm = jnp.concatenate([jnp.arange(0, H), jnp.arange(H, 2 * H),
                                 jnp.arange(3 * H, 4 * H), jnp.arange(2 * H, 3 * H)])
    wih_t = jnp.transpose(params["w_ih"][:, gate_perm, :], (0, 2, 1)).astype(jnp.bfloat16)
    whh_t = jnp.transpose(params["w_hh"][:, gate_perm, :], (0, 2, 1)).astype(jnp.bfloat16)
    b = (params["b_ih"] + params["b_hh"])[:, gate_perm][:, None, :].astype(jnp.float32)
    wfc_t = params["w_fc"].T.astype(jnp.bfloat16)                          # (H, V)

    kernel = functools.partial(_lstm_recurrence_kernel,
                               num_layers=num_layers, hidden_dim=H, chunk=chunk)
    vmem = pl.BlockSpec(memory_space=pltpu.MemorySpace.VMEM)

    seq_out, hT, cT = pl.pallas_call(
        kernel,
        out_shape=(jax.ShapeDtypeStruct((T, H), jnp.bfloat16),
                   jax.ShapeDtypeStruct((num_layers, H), jnp.float32),
                   jax.ShapeDtypeStruct((num_layers, H), jnp.float32)),
        in_specs=[vmem, vmem, vmem, vmem],
        out_specs=(vmem, vmem, vmem),
        scratch_shapes=[pltpu.VMEM((chunk, 4 * H), jnp.float32),
                        pltpu.VMEM((8, H), jnp.float32)],
        compiler_params=pltpu.CompilerParams(vmem_limit_bytes=32 * 1024 * 1024),
    )(x_emb, wih_t, whh_t, b)

    scores = _fc_head(seq_out, wfc_t, params["b_fc"])
    return scores, (hT, cT)


# ---------------------------------------------------------------------------
# Pure-JAX reference (eval-mode PyTorch semantics, full f32)
# ---------------------------------------------------------------------------
def reference_forward(x_ids, params, *, num_layers, hidden_dim):
    H = hidden_dim
    hi = lax.Precision.HIGHEST
    seq = params["emb"][x_ids.T.reshape(-1)]               # (T, D)
    T = seq.shape[0]
    layer_in = seq
    hs, cs = [], []
    for l in range(num_layers):
        h = jnp.zeros((H,), jnp.float32)
        c = jnp.zeros((H,), jnp.float32)
        outs = []
        for t in range(T):
            g = (jnp.dot(layer_in[t], params["w_ih"][l].T, precision=hi)
                 + params["b_ih"][l]
                 + jnp.dot(h, params["w_hh"][l].T, precision=hi)
                 + params["b_hh"][l])
            i = jax.nn.sigmoid(g[0:H])
            f = jax.nn.sigmoid(g[H:2 * H])
            gg = jnp.tanh(g[2 * H:3 * H])
            o = jax.nn.sigmoid(g[3 * H:4 * H])
            c = f * c + i * gg
            h = o * jnp.tanh(c)
            outs.append(h)
        layer_in = jnp.stack(outs)
        hs.append(h)
        cs.append(c)
    scores = jnp.dot(layer_in, params["w_fc"].T, precision=hi) + params["b_fc"]
    return scores, (jnp.stack(hs), jnp.stack(cs))


def init_params(key, vocab_size, embedding_dim, hidden_dim, num_layers):
    ks = jax.random.split(key, 6)
    r_emb = 0.1
    r = 1.0 / math.sqrt(hidden_dim)
    emb = jax.random.uniform(ks[0], (vocab_size, embedding_dim),
                             minval=-r_emb, maxval=r_emb, dtype=jnp.float32)
    w_ih = jax.random.uniform(ks[1], (num_layers, 4 * hidden_dim, embedding_dim),
                              minval=-r, maxval=r, dtype=jnp.float32)
    w_hh = jax.random.uniform(ks[2], (num_layers, 4 * hidden_dim, hidden_dim),
                              minval=-r, maxval=r, dtype=jnp.float32)
    b_ih = jax.random.uniform(ks[3], (num_layers, 4 * hidden_dim),
                              minval=-r, maxval=r, dtype=jnp.float32)
    b_hh = jax.random.uniform(ks[4], (num_layers, 4 * hidden_dim),
                              minval=-r, maxval=r, dtype=jnp.float32)
    w_fc = jax.random.uniform(ks[5], (vocab_size, hidden_dim),
                              minval=-r, maxval=r, dtype=jnp.float32)
    b_fc = jnp.zeros((vocab_size,), jnp.float32)
    return dict(emb=emb, w_ih=w_ih, w_hh=w_hh, b_ih=b_ih, b_hh=b_hh,
                w_fc=w_fc, b_fc=b_fc)


if __name__ == "__main__":
    vocab_size = 256
    embedding_dim = 128
    hidden_dim = 128     # must equal embedding_dim (tie_weights assertion)
    num_layers = 2
    N, L = 2, 8          # batch, sequence length -> T = 16 recurrence steps

    key = jax.random.PRNGKey(0)
    kp, kx = jax.random.split(key)
    params = init_params(kp, vocab_size, embedding_dim, hidden_dim, num_layers)
    x = jax.random.randint(kx, (N, L), 0, vocab_size, dtype=jnp.int32)

    scores, (hT, cT) = lstm_forward(x, params,
                                    num_layers=num_layers, hidden_dim=hidden_dim)
    jax.block_until_ready((scores, hT, cT))

    ref_scores, (ref_h, ref_c) = reference_forward(
        x, params, num_layers=num_layers, hidden_dim=hidden_dim)

    assert scores.shape == (N * L, vocab_size)
    assert hT.shape == (num_layers, hidden_dim) and cT.shape == (num_layers, hidden_dim)
    # Tolerance covers bf16 operands in all GEMMs (incl. the recurrent W_hh matmul)
    # and the bf16 inter-layer activation buffer; accumulation stays f32.
    assert jnp.allclose(scores, ref_scores, atol=2e-2, rtol=2e-2), "scores mismatch"
    assert jnp.allclose(hT, ref_h, atol=2e-2), "h_T mismatch"
    assert jnp.allclose(cT, ref_c, atol=2e-2), "c_T mismatch"

    print("KERNEL_OK")
</pallas_src>

<mosaic_0001>
module attributes {stable_mosaic.version = 11 : i64} {
  func.func @_lstm_recurrence_kernel(%arg0: memref<16x128xbf16, #tpu.memory_space<vmem>>, %arg1: memref<2x128x512xbf16, #tpu.memory_space<vmem>>, %arg2: memref<2x128x512xbf16, #tpu.memory_space<vmem>>, %arg3: memref<2x1x512xf32, #tpu.memory_space<vmem>>, %arg4: memref<16x128xbf16, #tpu.memory_space<vmem>>, %arg5: memref<2x128xf32, #tpu.memory_space<vmem>>, %arg6: memref<2x128xf32, #tpu.memory_space<vmem>>, %arg7: memref<16x512xf32, #tpu.memory_space<vmem>>, %arg8: memref<8x128xf32, #tpu.memory_space<vmem>>) attributes {dimension_semantics = [], scalar_prefetch = 0 : i64, scratch_operands = 2 : i64, tpu.core_type = #tpu.core_type<tc>} {
    %c0 = arith.constant 0 : index
    %c0_0 = arith.constant 0 : index
    %c0_1 = arith.constant 0 : index
    %0 = vector.load %arg1[%c0, %c0_0, %c0_1] : memref<2x128x512xbf16, #tpu.memory_space<vmem>>, vector<1x128x512xbf16>
    %1 = vector.shape_cast %0 : vector<1x128x512xbf16> to vector<128x512xbf16>
    %c0_2 = arith.constant 0 : index
    %c0_3 = arith.constant 0 : index
    %c0_4 = arith.constant 0 : index
    %2 = vector.load %arg2[%c0_2, %c0_3, %c0_4] : memref<2x128x512xbf16, #tpu.memory_space<vmem>>, vector<1x128x512xbf16>
    %3 = vector.shape_cast %2 : vector<1x128x512xbf16> to vector<128x512xbf16>
    %c0_5 = arith.constant 0 : index
    %c0_6 = arith.constant 0 : index
    %c0_7 = arith.constant 0 : index
    %4 = vector.load %arg3[%c0_5, %c0_6, %c0_7] : memref<2x1x512xf32, #tpu.memory_space<vmem>>, vector<1x1x512xf32>
    %5 = vector.shape_cast %4 : vector<1x1x512xf32> to vector<1x512xf32>
    %cst = arith.constant 0.000000e+00 : f32
    %6 = vector.broadcast %cst : f32 to vector<1x128xf32>
    %cst_8 = arith.constant 0.000000e+00 : f32
    %7 = vector.broadcast %cst_8 : f32 to vector<1x128xf32>
    %c0_i32 = arith.constant 0 : i32
    %c16_i32 = arith.constant 16 : i32
    %8 = arith.muli %c0_i32, %c16_i32 : i32
    %9 = tpu.assume_multiple %8, 8 : i32
    %10 = arith.index_cast %9 : i32 to index
    %c0_9 = arith.constant 0 : index
    %11 = vector.load %arg0[%10, %c0_9] : memref<16x128xbf16, #tpu.memory_space<vmem>>, vector<16x128xbf16>
    %cst_10 = arith.constant dense<0.000000e+00> : vector<16x512xf32>
    %12 = tpu.matmul %11, %1, %cst_10 {dimension_numbers = #tpu.dot_dimension_numbers<[1], [0], [0], [1], [0, 0, 1, 1], [], []>} : vector<16x128xbf16>, vector<128x512xbf16>, vector<16x512xf32> -> vector<16x512xf32>
    %13 = vector.broadcast %5 : vector<1x512xf32> to vector<16x512xf32>
    %14 = arith.addf %12, %13 : vector<16x512xf32>
    %c0_11 = arith.constant 0 : index
    %c0_12 = arith.constant 0 : index
    %15 = vector.load %arg7[%c0_11, %c0_12] : memref<16x512xf32, #tpu.memory_space<vmem>>, vector<16x512xf32>
    tpu.vector_store %arg7[%c0_11, %c0_12], %14 {strides = array<i32>} : memref<16x512xf32, #tpu.memory_space<vmem>>, vector<16x512xf32>,
    %c0_i32_13 = arith.constant 0 : i32
    %c2_i32 = arith.constant 2 : i32
    %16 = arith.addi %c0_i32_13, %c2_i32 : i32
    %c1_i32 = arith.constant 1 : i32
    %17:2 = scf.for %arg9 = %c0_i32_13 to %16 step %c1_i32 iter_args(%arg10 = %6, %arg11 = %7) -> (vector<1x128xf32>, vector<1x128xf32>)  : i32 {
      %c8_i32 = arith.constant 8 : i32
      %40 = arith.muli %arg9, %c8_i32 : i32
      %41 = tpu.assume_multiple %40, 8 : i32
      %42 = arith.index_cast %41 : i32 to index
      %c0_45 = arith.constant 0 : index
      %43 = vector.load %arg7[%42, %c0_45] : memref<16x512xf32, #tpu.memory_space<vmem>>, vector<8x512xf32>
      %44 = vector.extract_strided_slice %43 {offsets = [0, 0], sizes = [1, 512], strides = [1, 1]} : vector<8x512xf32> to vector<1x512xf32>
      %45 = arith.truncf %arg10 : vector<1x128xf32> to vector<1x128xbf16>
      %cst_46 = arith.constant dense<0.000000e+00> : vector<1x512xf32>
      %46 = tpu.matmul %45, %3, %cst_46 {dimension_numbers = #tpu.dot_dimension_numbers<[1], [0], [0], [1], [0, 0, 1, 1], [], []>} : vector<1x128xbf16>, vector<128x512xbf16>, vector<1x512xf32> -> vector<1x512xf32>
      %47 = arith.addf %44, %46 : vector<1x512xf32>
      %48 = vector.extract_strided_slice %47 {offsets = [0, 0], sizes = [1, 384], strides = [1, 1]} : vector<1x512xf32> to vector<1x384xf32>
      %49 = arith.negf %48 : vector<1x384xf32>
      %50 = math.exp %49 : vector<1x384xf32>
      %cst_47 = arith.constant 1.000000e+00 : f32
      %51 = vector.broadcast %cst_47 : f32 to vector<1x384xf32>
      %52 = arith.addf %51, %50 : vector<1x384xf32>
      %53 = arith.divf %51, %52 : vector<1x384xf32>
      %54 = vector.extract_strided_slice %47 {offsets = [0, 384], sizes = [1, 128], strides = [1, 1]} : vector<1x512xf32> to vector<1x128xf32>
      %55 = math.tanh %54 : vector<1x128xf32>
      %56 = vector.extract_strided_slice %53 {offsets = [0, 0], sizes = [1, 128], strides = [1, 1]} : vector<1x384xf32> to vector<1x128xf32>
      %57 = vector.extract_strided_slice %53 {offsets = [0, 128], sizes = [1, 128], strides = [1, 1]} : vector<1x384xf32> to vector<1x128xf32>
      %58 = vector.extract_strided_slice %53 {offsets = [0, 256], sizes = [1, 128], strides = [1, 1]} : vector<1x384xf32> to vector<1x128xf32>
      %59 = arith.mulf %57, %arg11 : vector<1x128xf32>
      %60 = arith.mulf %56, %55 : vector<1x128xf32>
      %61 = arith.addf %59, %60 : vector<1x128xf32>
      %62 = math.tanh %61 : vector<1x128xf32>
      %63 = arith.mulf %58, %62 : vector<1x128xf32>
      %c0_48 = arith.constant 0 : index
      %c0_49 = arith.constant 0 : index
      %64 = vector.load %arg8[%c0_48, %c0_49] : memref<8x128xf32, #tpu.memory_space<vmem>>, vector<1x128xf32>
      tpu.vector_store %arg8[%c0_48, %c0_49], %63 {strides = array<i32>} : memref<8x128xf32, #tpu.memory_space<vmem>>, vector<1x128xf32>,
      %65 = vector.extract_strided_slice %43 {offsets = [1, 0], sizes = [1, 512], strides = [1, 1]} : vector<8x512xf32> to vector<1x512xf32>
      %66 = arith.truncf %63 : vector<1x128xf32> to vector<1x128xbf16>
      %cst_50 = arith.constant dense<0.000000e+00> : vector<1x512xf32>
      %67 = tpu.matmul %66, %3, %cst_50 {dimension_numbers = #tpu.dot_dimension_numbers<[1], [0], [0], [1], [0, 0, 1, 1], [], []>} : vector<1x128xbf16>, vector<128x512xbf16>, vector<1x512xf32> -> vector<1x512xf32>
      %68 = arith.addf %65, %67 : vector<1x512xf32>
      %69 = vector.extract_strided_slice %68 {offsets = [0, 0], sizes = [1, 384], strides = [1, 1]} : vector<1x512xf32> to vector<1x384xf32>
      %70 = arith.negf %69 : vector<1x384xf32>
      %71 = math.exp %70 : vector<1x384xf32>
      %cst_51 = arith.constant 1.000000e+00 : f32
      %72 = vector.broadcast %cst_51 : f32 to vector<1x384xf32>
      %73 = arith.addf %72, %71 : vector<1x384xf32>
      %74 = arith.divf %72, %73 : vector<1x384xf32>
      %75 = vector.extract_strided_slice %68 {offsets = [0, 384], sizes = [1, 128], strides = [1, 1]} : vector<1x512xf32> to vector<1x128xf32>
      %76 = math.tanh %75 : vector<1x128xf32>
      %77 = vector.extract_strided_slice %74 {offsets = [0, 0], sizes = [1, 128], strides = [1, 1]} : vector<1x384xf32> to vector<1x128xf32>
      %78 = vector.extract_strided_slice %74 {offsets = [0, 128], sizes = [1, 128], strides = [1, 1]} : vector<1x384xf32> to vector<1x128xf32>
      %79 = vector.extract_strided_slice %74 {offsets = [0, 256], sizes = [1, 128], strides = [1, 1]} : vector<1x384xf32> to vector<1x128xf32>
      %80 = arith.mulf %78, %61 : vector<1x128xf32>
      %81 = arith.mulf %77, %76 : vector<1x128xf32>
      %82 = arith.addf %80, %81 : vector<1x128xf32>
      %83 = math.tanh %82 : vector<1x128xf32>
      %84 = arith.mulf %79, %83 : vector<1x128xf32>
      %c1_52 = arith.constant 1 : index
      %c0_53 = arith.constant 0 : index
      %85 = vector.load %arg8[%c1_52, %c0_53] : memref<8x128xf32, #tpu.memory_space<vmem>>, vector<1x128xf32>
      tpu.vector_store %arg8[%c1_52, %c0_53], %84 {strides = array<i32>} : memref<8x128xf32, #tpu.memory_space<vmem>>, vector<1x128xf32>,
      %86 = vector.extract_strided_slice %43 {offsets = [2, 0], sizes = [1, 512], strides = [1, 1]} : vector<8x512xf32> to vector<1x512xf32>
      %87 = arith.truncf %84 : vector<1x128xf32> to vector<1x128xbf16>
      %cst_54 = arith.constant dense<0.000000e+00> : vector<1x512xf32>
      %88 = tpu.matmul %87, %3, %cst_54 {dimension_numbers = #tpu.dot_dimension_numbers<[1], [0], [0], [1], [0, 0, 1, 1], [], []>} : vector<1x128xbf16>, vector<128x512xbf16>, vector<1x512xf32> -> vector<1x512xf32>
      %89 = arith.addf %86, %88 : vector<1x512xf32>
      %90 = vector.extract_strided_slice %89 {offsets = [0, 0], sizes = [1, 384], strides = [1, 1]} : vector<1x512xf32> to vector<1x384xf32>
      %91 = arith.negf %90 : vector<1x384xf32>
      %92 = math.exp %91 : vector<1x384xf32>
      %cst_55 = arith.constant 1.000000e+00 : f32
      %93 = vector.broadcast %cst_55 : f32 to vector<1x384xf32>
      %94 = arith.addf %93, %92 : vector<1x384xf32>
      %95 = arith.divf %93, %94 : vector<1x384xf32>
      %96 = vector.extract_strided_slice %89 {offsets = [0, 384], sizes = [1, 128], strides = [1, 1]} : vector<1x512xf32> to vector<1x128xf32>
      %97 = math.tanh %96 : vector<1x128xf32>
      %98 = vector.extract_strided_slice %95 {offsets = [0, 0], sizes = [1, 128], strides = [1, 1]} : vector<1x384xf32> to vector<1x128xf32>
      %99 = vector.extract_strided_slice %95 {offsets = [0, 128], sizes = [1, 128], strides = [1, 1]} : vector<1x384xf32> to vector<1x128xf32>
      %100 = vector.extract_strided_slice %95 {offsets = [0, 256], sizes = [1, 128], strides = [1, 1]} : vector<1x384xf32> to vector<1x128xf32>
      %101 = arith.mulf %99, %82 : vector<1x128xf32>
      %102 = arith.mulf %98, %97 : vector<1x128xf32>
      %103 = arith.addf %101, %102 : vector<1x128xf32>
      %104 = math.tanh %103 : vector<1x128xf32>
      %105 = arith.mulf %100, %104 : vector<1x128xf32>
      %c2 = arith.constant 2 : index
      %c0_56 = arith.constant 0 : index
      %106 = vector.load %arg8[%c2, %c0_56] : memref<8x128xf32, #tpu.memory_space<vmem>>, vector<1x128xf32>
      tpu.vector_store %arg8[%c2, %c0_56], %105 {strides = array<i32>} : memref<8x128xf32, #tpu.memory_space<vmem>>, vector<1x128xf32>,
      %107 = vector.extract_strided_slice %43 {offsets = [3, 0], sizes = [1, 512], strides = [1, 1]} : vector<8x512xf32> to vector<1x512xf32>
      %108 = arith.truncf %105 : vector<1x128xf32> to vector<1x128xbf16>
      %cst_57 = arith.constant dense<0.000000e+00> : vector<1x512xf32>
      %109 = tpu.matmul %108, %3, %cst_57 {dimension_numbers = #tpu.dot_dimension_numbers<[1], [0], [0], [1], [0, 0, 1, 1], [], []>} : vector<1x128xbf16>, vector<128x512xbf16>, vector<1x512xf32> -> vector<1x512xf32>
      %110 = arith.addf %107, %109 : vector<1x512xf32>
      %111 = vector.extract_strided_slice %110 {offsets = [0, 0], sizes = [1, 384], strides = [1, 1]} : vector<1x512xf32> to vector<1x384xf32>
      %112 = arith.negf %111 : vector<1x384xf32>
      %113 = math.exp %112 : vector<1x384xf32>
      %cst_58 = arith.constant 1.000000e+00 : f32
      %114 = vector.broadcast %cst_58 : f32 to vector<1x384xf32>
      %115 = arith.addf %114, %113 : vector<1x384xf32>
      %116 = arith.divf %114, %115 : vector<1x384xf32>
      %117 = vector.extract_strided_slice %110 {offsets = [0, 384], sizes = [1, 128], strides = [1, 1]} : vector<1x512xf32> to vector<1x128xf32>
      %118 = math.tanh %117 : vector<1x128xf32>
      %119 = vector.extract_strided_slice %116 {offsets = [0, 0], sizes = [1, 128], strides = [1, 1]} : vector<1x384xf32> to vector<1x128xf32>
      %120 = vector.extract_strided_slice %116 {offsets = [0, 128], sizes = [1, 128], strides = [1, 1]} : vector<1x384xf32> to vector<1x128xf32>
      %121 = vector.extract_strided_slice %116 {offsets = [0, 256], sizes = [1, 128], strides = [1, 1]} : vector<1x384xf32> to vector<1x128xf32>
      %122 = arith.mulf %120, %103 : vector<1x128xf32>
      %123 = arith.mulf %119, %118 : vector<1x128xf32>
      %124 = arith.addf %122, %123 : vector<1x128xf32>
      %125 = math.tanh %124 : vector<1x128xf32>
      %126 = arith.mulf %121, %125 : vector<1x128xf32>
      %c3 = arith.constant 3 : index
      %c0_59 = arith.constant 0 : index
      %127 = vector.load %arg8[%c3, %c0_59] : memref<8x128xf32, #tpu.memory_space<vmem>>, vector<1x128xf32>
      tpu.vector_store %arg8[%c3, %c0_59], %126 {strides = array<i32>} : memref<8x128xf32, #tpu.memory_space<vmem>>, vector<1x128xf32>,
      %128 = vector.extract_strided_slice %43 {offsets = [4, 0], sizes = [1, 512], strides = [1, 1]} : vector<8x512xf32> to vector<1x512xf32>
      %129 = arith.truncf %126 : vector<1x128xf32> to vector<1x128xbf16>
      %cst_60 = arith.constant dense<0.000000e+00> : vector<1x512xf32>
      %130 = tpu.matmul %129, %3, %cst_60 {dimension_numbers = #tpu.dot_dimension_numbers<[1], [0], [0], [1], [0, 0, 1, 1], [], []>} : vector<1x128xbf16>, vector<128x512xbf16>, vector<1x512xf32> -> vector<1x512xf32>
      %131 = arith.addf %128, %130 : vector<1x512xf32>
      %132 = vector.extract_strided_slice %131 {offsets = [0, 0], sizes = [1, 384], strides = [1, 1]} : vector<1x512xf32> to vector<1x384xf32>
      %133 = arith.negf %132 : vector<1x384xf32>
      %134 = math.exp %133 : vector<1x384xf32>
      %cst_61 = arith.constant 1.000000e+00 : f32
      %135 = vector.broadcast %cst_61 : f32 to vector<1x384xf32>
      %136 = arith.addf %135, %134 : vector<1x384xf32>
      %137 = arith.divf %135, %136 : vector<1x384xf32>
      %138 = vector.extract_strided_slice %131 {offsets = [0, 384], sizes = [1, 128], strides = [1, 1]} : vector<1x512xf32> to vector<1x128xf32>
      %139 = math.tanh %138 : vector<1x128xf32>
      %140 = vector.extract_strided_slice %137 {offsets = [0, 0], sizes = [1, 128], strides = [1, 1]} : vector<1x384xf32> to vector<1x128xf32>
      %141 = vector.extract_strided_slice %137 {offsets = [0, 128], sizes = [1, 128], strides = [1, 1]} : vector<1x384xf32> to vector<1x128xf32>
      %142 = vector.extract_strided_slice %137 {offsets = [0, 256], sizes = [1, 128], strides = [1, 1]} : vector<1x384xf32> to vector<1x128xf32>
      %143 = arith.mulf %141, %124 : vector<1x128xf32>
      %144 = arith.mulf %140, %139 : vector<1x128xf32>
      %145 = arith.addf %143, %144 : vector<1x128xf32>
      %146 = math.tanh %145 : vector<1x128xf32>
      %147 = arith.mulf %142, %146 : vector<1x128xf32>
      %c4 = arith.constant 4 : index
      %c0_62 = arith.constant 0 : index
      %148 = vector.load %arg8[%c4, %c0_62] : memref<8x128xf32, #tpu.memory_space<vmem>>, vector<1x128xf32>
      tpu.vector_store %arg8[%c4, %c0_62], %147 {strides = array<i32>} : memref<8x128xf32, #tpu.memory_space<vmem>>, vector<1x128xf32>,
      %149 = vector.extract_strided_slice %43 {offsets = [5, 0], sizes = [1, 512], strides = [1, 1]} : vector<8x512xf32> to vector<1x512xf32>
      %150 = arith.truncf %147 : vector<1x128xf32> to vector<1x128xbf16>
      %cst_63 = arith.constant dense<0.000000e+00> : vector<1x512xf32>
      %151 = tpu.matmul %150, %3, %cst_63 {dimension_numbers = #tpu.dot_dimension_numbers<[1], [0], [0], [1], [0, 0, 1, 1], [], []>} : vector<1x128xbf16>, vector<128x512xbf16>, vector<1x512xf32> -> vector<1x512xf32>
      %152 = arith.addf %149, %151 : vector<1x512xf32>
      %153 = vector.extract_strided_slice %152 {offsets = [0, 0], sizes = [1, 384], strides = [1, 1]} : vector<1x512xf32> to vector<1x384xf32>
      %154 = arith.negf %153 : vector<1x384xf32>
      %155 = math.exp %154 : vector<1x384xf32>
      %cst_64 = arith.constant 1.000000e+00 : f32
      %156 = vector.broadcast %cst_64 : f32 to vector<1x384xf32>
      %157 = arith.addf %156, %155 : vector<1x384xf32>
      %158 = arith.divf %156, %157 : vector<1x384xf32>
      %159 = vector.extract_strided_slice %152 {offsets = [0, 384], sizes = [1, 128], strides = [1, 1]} : vector<1x512xf32> to vector<1x128xf32>
      %160 = math.tanh %159 : vector<1x128xf32>
      %161 = vector.extract_strided_slice %158 {offsets = [0, 0], sizes = [1, 128], strides = [1, 1]} : vector<1x384xf32> to vector<1x128xf32>
      %162 = vector.extract_strided_slice %158 {offsets = [0, 128], sizes = [1, 128], strides = [1, 1]} : vector<1x384xf32> to vector<1x128xf32>
      %163 = vector.extract_strided_slice %158 {offsets = [0, 256], sizes = [1, 128], strides = [1, 1]} : vector<1x384xf32> to vector<1x128xf32>
      %164 = arith.mulf %162, %145 : vector<1x128xf32>
      %165 = arith.mulf %161, %160 : vector<1x128xf32>
      %166 = arith.addf %164, %165 : vector<1x128xf32>
      %167 = math.tanh %166 : vector<1x128xf32>
      %168 = arith.mulf %163, %167 : vector<1x128xf32>
      %c5 = arith.constant 5 : index
      %c0_65 = arith.constant 0 : index
      %169 = vector.load %arg8[%c5, %c0_65] : memref<8x128xf32, #tpu.memory_space<vmem>>, vector<1x128xf32>
      tpu.vector_store %arg8[%c5, %c0_65], %168 {strides = array<i32>} : memref<8x128xf32, #tpu.memory_space<vmem>>, vector<1x128xf32>,
      %170 = vector.extract_strided_slice %43 {offsets = [6, 0], sizes = [1, 512], strides = [1, 1]} : vector<8x512xf32> to vector<1x512xf32>
      %171 = arith.truncf %168 : vector<1x128xf32> to vector<1x128xbf16>
      %cst_66 = arith.constant dense<0.000000e+00> : vector<1x512xf32>
      %172 = tpu.matmul %171, %3, %cst_66 {dimension_numbers = #tpu.dot_dimension_numbers<[1], [0], [0], [1], [0, 0, 1, 1], [], []>} : vector<1x128xbf16>, vector<128x512xbf16>, vector<1x512xf32> -> vector<1x512xf32>
      %173 = arith.addf %170, %172 : vector<1x512xf32>
      %174 = vector.extract_strided_slice %173 {offsets = [0, 0], sizes = [1, 384], strides = [1, 1]} : vector<1x512xf32> to vector<1x384xf32>
      %175 = arith.negf %174 : vector<1x384xf32>
      %176 = math.exp %175 : vector<1x384xf32>
      %cst_67 = arith.constant 1.000000e+00 : f32
      %177 = vector.broadcast %cst_67 : f32 to vector<1x384xf32>
      %178 = arith.addf %177, %176 : vector<1x384xf32>
      %179 = arith.divf %177, %178 : vector<1x384xf32>
      %180 = vector.extract_strided_slice %173 {offsets = [0, 384], sizes = [1, 128], strides = [1, 1]} : vector<1x512xf32> to vector<1x128xf32>
      %181 = math.tanh %180 : vector<1x128xf32>
      %182 = vector.extract_strided_slice %179 {offsets = [0, 0], sizes = [1, 128], strides = [1, 1]} : vector<1x384xf32> to vector<1x128xf32>
      %183 = vector.extract_strided_slice %179 {offsets = [0, 128], sizes = [1, 128], strides = [1, 1]} : vector<1x384xf32> to vector<1x128xf32>
      %184 = vector.extract_strided_slice %179 {offsets = [0, 256], sizes = [1, 128], strides = [1, 1]} : vector<1x384xf32> to vector<1x128xf32>
      %185 = arith.mulf %183, %166 : vector<1x128xf32>
      %186 = arith.mulf %182, %181 : vector<1x128xf32>
      %187 = arith.addf %185, %186 : vector<1x128xf32>
      %188 = math.tanh %187 : vector<1x128xf32>
      %189 = arith.mulf %184, %188 : vector<1x128xf32>
      %c6 = arith.constant 6 : index
      %c0_68 = arith.constant 0 : index
      %190 = vector.load %arg8[%c6, %c0_68] : memref<8x128xf32, #tpu.memory_space<vmem>>, vector<1x128xf32>
      tpu.vector_store %arg8[%c6, %c0_68], %189 {strides = array<i32>} : memref<8x128xf32, #tpu.memory_space<vmem>>, vector<1x128xf32>,
      %191 = vector.extract_strided_slice %43 {offsets = [7, 0], sizes = [1, 512], strides = [1, 1]} : vector<8x512xf32> to vector<1x512xf32>
      %192 = arith.truncf %189 : vector<1x128xf32> to vector<1x128xbf16>
      %cst_69 = arith.constant dense<0.000000e+00> : vector<1x512xf32>
      %193 = tpu.matmul %192, %3, %cst_69 {dimension_numbers = #tpu.dot_dimension_numbers<[1], [0], [0], [1], [0, 0, 1, 1], [], []>} : vector<1x128xbf16>, vector<128x512xbf16>, vector<1x512xf32> -> vector<1x512xf32>
      %194 = arith.addf %191, %193 : vector<1x512xf32>
      %195 = vector.extract_strided_slice %194 {offsets = [0, 0], sizes = [1, 384], strides = [1, 1]} : vector<1x512xf32> to vector<1x384xf32>
      %196 = arith.negf %195 : vector<1x384xf32>
      %197 = math.exp %196 : vector<1x384xf32>
      %cst_70 = arith.constant 1.000000e+00 : f32
      %198 = vector.broadcast %cst_70 : f32 to vector<1x384xf32>
      %199 = arith.addf %198, %197 : vector<1x384xf32>
      %200 = arith.divf %198, %199 : vector<1x384xf32>
      %201 = vector.extract_strided_slice %194 {offsets = [0, 384], sizes = [1, 128], strides = [1, 1]} : vector<1x512xf32> to vector<1x128xf32>
      %202 = math.tanh %201 : vector<1x128xf32>
      %203 = vector.extract_strided_slice %200 {offsets = [0, 0], sizes = [1, 128], strides = [1, 1]} : vector<1x384xf32> to vector<1x128xf32>
      %204 = vector.extract_strided_slice %200 {offsets = [0, 128], sizes = [1, 128], strides = [1, 1]} : vector<1x384xf32> to vector<1x128xf32>
      %205 = vector.extract_strided_slice %200 {offsets = [0, 256], sizes = [1, 128], strides = [1, 1]} : vector<1x384xf32> to vector<1x128xf32>
      %206 = arith.mulf %204, %187 : vector<1x128xf32>
      %207 = arith.mulf %203, %202 : vector<1x128xf32>
      %208 = arith.addf %206, %207 : vector<1x128xf32>
      %209 = math.tanh %208 : vector<1x128xf32>
      %210 = arith.mulf %205, %209 : vector<1x128xf32>
      %c7 = arith.constant 7 : index
      %c0_71 = arith.constant 0 : index
      %211 = vector.load %arg8[%c7, %c0_71] : memref<8x128xf32, #tpu.memory_space<vmem>>, vector<1x128xf32>
      tpu.vector_store %arg8[%c7, %c0_71], %210 {strides = array<i32>} : memref<8x128xf32, #tpu.memory_space<vmem>>, vector<1x128xf32>,
      %212 = arith.addi %9, %41 : i32
      %213 = tpu.assume_multiple %212, 8 : i32
      %c0_72 = arith.constant 0 : index
      %c0_73 = arith.constant 0 : index
      %214 = vector.load %arg8[%c0_72, %c0_73] : memref<8x128xf32, #tpu.memory_space<vmem>>, vector<8x128xf32>
      %215 = arith.truncf %214 : vector<8x128xf32> to vector<8x128xbf16>
      %216 = arith.index_cast %213 : i32 to index
      %c0_74 = arith.constant 0 : index
      %217 = vector.load %arg4[%216, %c0_74] : memref<16x128xbf16, #tpu.memory_space<vmem>>, vector<8x128xbf16>
      tpu.vector_store %arg4[%216, %c0_74], %215 {strides = array<i32>} : memref<16x128xbf16, #tpu.memory_space<vmem>>, vector<8x128xbf16>,
      scf.yield %210, %208 : vector<1x128xf32>, vector<1x128xf32>
    }
    %c2_i32_14 = arith.constant 2 : i32
    %c1_i32_15 = arith.constant 1 : i32
    %c0_16 = arith.constant 0 : index
    %c0_17 = arith.constant 0 : index
    %18 = vector.load %arg5[%c0_16, %c0_17] : memref<2x128xf32, #tpu.memory_space<vmem>>, vector<1x128xf32>
    tpu.vector_store %arg5[%c0_16, %c0_17], %17#0 {strides = array<i32>} : memref<2x128xf32, #tpu.memory_space<vmem>>, vector<1x128xf32>,
    %c0_18 = arith.constant 0 : index
    %c0_19 = arith.constant 0 : index
    %19 = vector.load %arg6[%c0_18, %c0_19] : memref<2x128xf32, #tpu.memory_space<vmem>>, vector<1x128xf32>
    tpu.vector_store %arg6[%c0_18, %c0_19], %17#1 {strides = array<i32>} : memref<2x128xf32, #tpu.memory_space<vmem>>, vector<1x128xf32>,
    %c1 = arith.constant 1 : index
    %c0_20 = arith.constant 0 : index
    %c0_21 = arith.constant 0 : index
    %20 = vector.load %arg1[%c1, %c0_20, %c0_21] : memref<2x128x512xbf16, #tpu.memory_space<vmem>>, vector<1x128x512xbf16>
    %21 = vector.shape_cast %20 : vector<1x128x512xbf16> to vector<128x512xbf16>
    %c1_22 = arith.constant 1 : index
    %c0_23 = arith.constant 0 : index
    %c0_24 = arith.constant 0 : index
    %22 = vector.load %arg2[%c1_22, %c0_23, %c0_24] : memref<2x128x512xbf16, #tpu.memory_space<vmem>>, vector<1x128x512xbf16>
    %23 = vector.shape_cast %22 : vector<1x128x512xbf16> to vector<128x512xbf16>
    %c1_25 = arith.constant 1 : index
    %c0_26 = arith.constant 0 : index
    %c0_27 = arith.constant 0 : index
    %24 = vector.load %arg3[%c1_25, %c0_26, %c0_27] : memref<2x1x512xf32, #tpu.memory_space<vmem>>, vector<1x1x512xf32>
    %25 = vector.shape_cast %24 : vector<1x1x512xf32> to vector<1x512xf32>
    %cst_28 = arith.constant 0.000000e+00 : f32
    %26 = vector.broadcast %cst_28 : f32 to vector<1x128xf32>
    %cst_29 = arith.constant 0.000000e+00 : f32
    %27 = vector.broadcast %cst_29 : f32 to vector<1x128xf32>
    %c0_i32_30 = arith.constant 0 : i32
    %c16_i32_31 = arith.constant 16 : i32
    %28 = arith.muli %c0_i32_30, %c16_i32_31 : i32
    %29 = tpu.assume_multiple %28, 8 : i32
    %30 = arith.index_cast %29 : i32 to index
    %c0_32 = arith.constant 0 : index
    %31 = vector.load %arg4[%30, %c0_32] : memref<16x128xbf16, #tpu.memory_space<vmem>>, vector<16x128xbf16>
    %cst_33 = arith.constant dense<0.000000e+00> : vector<16x512xf32>
    %32 = tpu.matmul %31, %21, %cst_33 {dimension_numbers = #tpu.dot_dimension_numbers<[1], [0], [0], [1], [0, 0, 1, 1], [], []>} : vector<16x128xbf16>, vector<128x512xbf16>, vector<16x512xf32> -> vector<16x512xf32>
    %33 = vector.broadcast %25 : vector<1x512xf32> to vector<16x512xf32>
    %34 = arith.addf %32, %33 : vector<16x512xf32>
    %c0_34 = arith.constant 0 : index
    %c0_35 = arith.constant 0 : index
    %35 = vector.load %arg7[%c0_34, %c0_35] : memref<16x512xf32, #tpu.memory_space<vmem>>, vector<16x512xf32>
    tpu.vector_store %arg7[%c0_34, %c0_35], %34 {strides = array<i32>} : memref<16x512xf32, #tpu.memory_space<vmem>>, vector<16x512xf32>,
    %c0_i32_36 = arith.constant 0 : i32
    %c2_i32_37 = arith.constant 2 : i32
    %36 = arith.addi %c0_i32_36, %c2_i32_37 : i32
    %c1_i32_38 = arith.constant 1 : i32
    %37:2 = scf.for %arg9 = %c0_i32_36 to %36 step %c1_i32_38 iter_args(%arg10 = %26, %arg11 = %27) -> (vector<1x128xf32>, vector<1x128xf32>)  : i32 {
      %c8_i32 = arith.constant 8 : i32
      %40 = arith.muli %arg9, %c8_i32 : i32
      %41 = tpu.assume_multiple %40, 8 : i32
      %42 = arith.index_cast %41 : i32 to index
      %c0_45 = arith.constant 0 : index
      %43 = vector.load %arg7[%42, %c0_45] : memref<16x512xf32, #tpu.memory_space<vmem>>, vector<8x512xf32>
      %44 = vector.extract_strided_slice %43 {offsets = [0, 0], sizes = [1, 512], strides = [1, 1]} : vector<8x512xf32> to vector<1x512xf32>
      %45 = arith.truncf %arg10 : vector<1x128xf32> to vector<1x128xbf16>
      %cst_46 = arith.constant dense<0.000000e+00> : vector<1x512xf32>
      %46 = tpu.matmul %45, %23, %cst_46 {dimension_numbers = #tpu.dot_dimension_numbers<[1], [0], [0], [1], [0, 0, 1, 1], [], []>} : vector<1x128xbf16>, vector<128x512xbf16>, vector<1x512xf32> -> vector<1x512xf32>
      %47 = arith.addf %44, %46 : vector<1x512xf32>
      %48 = vector.extract_strided_slice %47 {offsets = [0, 0], sizes = [1, 384], strides = [1, 1]} : vector<1x512xf32> to vector<1x384xf32>
      %49 = arith.negf %48 : vector<1x384xf32>
      %50 = math.exp %49 : vector<1x384xf32>
      %cst_47 = arith.constant 1.000000e+00 : f32
      %51 = vector.broadcast %cst_47 : f32 to vector<1x384xf32>
      %52 = arith.addf %51, %50 : vector<1x384xf32>
      %53 = arith.divf %51, %52 : vector<1x384xf32>
      %54 = vector.extract_strided_slice %47 {offsets = [0, 384], sizes = [1, 128], strides = [1, 1]} : vector<1x512xf32> to vector<1x128xf32>
      %55 = math.tanh %54 : vector<1x128xf32>
      %56 = vector.extract_strided_slice %53 {offsets = [0, 0], sizes = [1, 128], strides = [1, 1]} : vector<1x384xf32> to vector<1x128xf32>
      %57 = vector.extract_strided_slice %53 {offsets = [0, 128], sizes = [1, 128], strides = [1, 1]} : vector<1x384xf32> to vector<1x128xf32>
      %58 = vector.extract_strided_slice %53 {offsets = [0, 256], sizes = [1, 128], strides = [1, 1]} : vector<1x384xf32> to vector<1x128xf32>
      %59 = arith.mulf %57, %arg11 : vector<1x128xf32>
      %60 = arith.mulf %56, %55 : vector<1x128xf32>
      %61 = arith.addf %59, %60 : vector<1x128xf32>
      %62 = math.tanh %61 : vector<1x128xf32>
      %63 = arith.mulf %58, %62 : vector<1x128xf32>
      %c0_48 = arith.constant 0 : index
      %c0_49 = arith.constant 0 : index
      %64 = vector.load %arg8[%c0_48, %c0_49] : memref<8x128xf32, #tpu.memory_space<vmem>>, vector<1x128xf32>
      tpu.vector_store %arg8[%c0_48, %c0_49], %63 {strides = array<i32>} : memref<8x128xf32, #tpu.memory_space<vmem>>, vector<1x128xf32>,
      %65 = vector.extract_strided_slice %43 {offsets = [1, 0], sizes = [1, 512], strides = [1, 1]} : vector<8x512xf32> to vector<1x512xf32>
      %66 = arith.truncf %63 : vector<1x128xf32> to vector<1x128xbf16>
      %cst_50 = arith.constant dense<0.000000e+00> : vector<1x512xf32>
      %67 = tpu.matmul %66, %23, %cst_50 {dimension_numbers = #tpu.dot_dimension_numbers<[1], [0], [0], [1], [0, 0, 1, 1], [], []>} : vector<1x128xbf16>, vector<128x512xbf16>, vector<1x512xf32> -> vector<1x512xf32>
      %68 = arith.addf %65, %67 : vector<1x512xf32>
      %69 = vector.extract_strided_slice %68 {offsets = [0, 0], sizes = [1, 384], strides = [1, 1]} : vector<1x512xf32> to vector<1x384xf32>
      %70 = arith.negf %69 : vector<1x384xf32>
      %71 = math.exp %70 : vector<1x384xf32>
      %cst_51 = arith.constant 1.000000e+00 : f32
      %72 = vector.broadcast %cst_51 : f32 to vector<1x384xf32>
      %73 = arith.addf %72, %71 : vector<1x384xf32>
      %74 = arith.divf %72, %73 : vector<1x384xf32>
      %75 = vector.extract_strided_slice %68 {offsets = [0, 384], sizes = [1, 128], strides = [1, 1]} : vector<1x512xf32> to vector<1x128xf32>
      %76 = math.tanh %75 : vector<1x128xf32>
      %77 = vector.extract_strided_slice %74 {offsets = [0, 0], sizes = [1, 128], strides = [1, 1]} : vector<1x384xf32> to vector<1x128xf32>
      %78 = vector.extract_strided_slice %74 {offsets = [0, 128], sizes = [1, 128], strides = [1, 1]} : vector<1x384xf32> to vector<1x128xf32>
      %79 = vector.extract_strided_slice %74 {offsets = [0, 256], sizes = [1, 128], strides = [1, 1]} : vector<1x384xf32> to vector<1x128xf32>
      %80 = arith.mulf %78, %61 : vector<1x128xf32>
      %81 = arith.mulf %77, %76 : vector<1x128xf32>
      %82 = arith.addf %80, %81 : vector<1x128xf32>
      %83 = math.tanh %82 : vector<1x128xf32>
      %84 = arith.mulf %79, %83 : vector<1x128xf32>
      %c1_52 = arith.constant 1 : index
      %c0_53 = arith.constant 0 : index
      %85 = vector.load %arg8[%c1_52, %c0_53] : memref<8x128xf32, #tpu.memory_space<vmem>>, vector<1x128xf32>
      tpu.vector_store %arg8[%c1_52, %c0_53], %84 {strides = array<i32>} : memref<8x128xf32, #tpu.memory_space<vmem>>, vector<1x128xf32>,
      %86 = vector.extract_strided_slice %43 {offsets = [2, 0], sizes = [1, 512], strides = [1, 1]} : vector<8x512xf32> to vector<1x512xf32>
      %87 = arith.truncf %84 : vector<1x128xf32> to vector<1x128xbf16>
      %cst_54 = arith.constant dense<0.000000e+00> : vector<1x512xf32>
      %88 = tpu.matmul %87, %23, %cst_54 {dimension_numbers = #tpu.dot_dimension_numbers<[1], [0], [0], [1], [0, 0, 1, 1], [], []>} : vector<1x128xbf16>, vector<128x512xbf16>, vector<1x512xf32> -> vector<1x512xf32>
      %89 = arith.addf %86, %88 : vector<1x512xf32>
      %90 = vector.extract_strided_slice %89 {offsets = [0, 0], sizes = [1, 384], strides = [1, 1]} : vector<1x512xf32> to vector<1x384xf32>
      %91 = arith.negf %90 : vector<1x384xf32>
      %92 = math.exp %91 : vector<1x384xf32>
      %cst_55 = arith.constant 1.000000e+00 : f32
      %93 = vector.broadcast %cst_55 : f32 to vector<1x384xf32>
      %94 = arith.addf %93, %92 : vector<1x384xf32>
      %95 = arith.divf %93, %94 : vector<1x384xf32>
      %96 = vector.extract_strided_slice %89 {offsets = [0, 384], sizes = [1, 128], strides = [1, 1]} : vector<1x512xf32> to vector<1x128xf32>
      %97 = math.tanh %96 : vector<1x128xf32>
      %98 = vector.extract_strided_slice %95 {offsets = [0, 0], sizes = [1, 128], strides = [1, 1]} : vector<1x384xf32> to vector<1x128xf32>
      %99 = vector.extract_strided_slice %95 {offsets = [0, 128], sizes = [1, 128], strides = [1, 1]} : vector<1x384xf32> to vector<1x128xf32>
      %100 = vector.extract_strided_slice %95 {offsets = [0, 256], sizes = [1, 128], strides = [1, 1]} : vector<1x384xf32> to vector<1x128xf32>
      %101 = arith.mulf %99, %82 : vector<1x128xf32>
      %102 = arith.mulf %98, %97 : vector<1x128xf32>
      %103 = arith.addf %101, %102 : vector<1x128xf32>
      %104 = math.tanh %103 : vector<1x128xf32>
      %105 = arith.mulf %100, %104 : vector<1x128xf32>
      %c2 = arith.constant 2 : index
      %c0_56 = arith.constant 0 : index
      %106 = vector.load %arg8[%c2, %c0_56] : memref<8x128xf32, #tpu.memory_space<vmem>>, vector<1x128xf32>
      tpu.vector_store %arg8[%c2, %c0_56], %105 {strides = array<i32>} : memref<8x128xf32, #tpu.memory_space<vmem>>, vector<1x128xf32>,
      %107 = vector.extract_strided_slice %43 {offsets = [3, 0], sizes = [1, 512], strides = [1, 1]} : vector<8x512xf32> to vector<1x512xf32>
      %108 = arith.truncf %105 : vector<1x128xf32> to vector<1x128xbf16>
      %cst_57 = arith.constant dense<0.000000e+00> : vector<1x512xf32>
      %109 = tpu.matmul %108, %23, %cst_57 {dimension_numbers = #tpu.dot_dimension_numbers<[1], [0], [0], [1], [0, 0, 1, 1], [], []>} : vector<1x128xbf16>, vector<128x512xbf16>, vector<1x512xf32> -> vector<1x512xf32>
      %110 = arith.addf %107, %109 : vector<1x512xf32>
      %111 = vector.extract_strided_slice %110 {offsets = [0, 0], sizes = [1, 384], strides = [1, 1]} : vector<1x512xf32> to vector<1x384xf32>
      %112 = arith.negf %111 : vector<1x384xf32>
      %113 = math.exp %112 : vector<1x384xf32>
      %cst_58 = arith.constant 1.000000e+00 : f32
      %114 = vector.broadcast %cst_58 : f32 to vector<1x384xf32>
      %115 = arith.addf %114, %113 : vector<1x384xf32>
      %116 = arith.divf %114, %115 : vector<1x384xf32>
      %117 = vector.extract_strided_slice %110 {offsets = [0, 384], sizes = [1, 128], strides = [1, 1]} : vector<1x512xf32> to vector<1x128xf32>
      %118 = math.tanh %117 : vector<1x128xf32>
      %119 = vector.extract_strided_slice %116 {offsets = [0, 0], sizes = [1, 128], strides = [1, 1]} : vector<1x384xf32> to vector<1x128xf32>
      %120 = vector.extract_strided_slice %116 {offsets = [0, 128], sizes = [1, 128], strides = [1, 1]} : vector<1x384xf32> to vector<1x128xf32>
      %121 = vector.extract_strided_slice %116 {offsets = [0, 256], sizes = [1, 128], strides = [1, 1]} : vector<1x384xf32> to vector<1x128xf32>
      %122 = arith.mulf %120, %103 : vector<1x128xf32>
      %123 = arith.mulf %119, %118 : vector<1x128xf32>
      %124 = arith.addf %122, %123 : vector<1x128xf32>
      %125 = math.tanh %124 : vector<1x128xf32>
      %126 = arith.mulf %121, %125 : vector<1x128xf32>
      %c3 = arith.constant 3 : index
      %c0_59 = arith.constant 0 : index
      %127 = vector.load %arg8[%c3, %c0_59] : memref<8x128xf32, #tpu.memory_space<vmem>>, vector<1x128xf32>
      tpu.vector_store %arg8[%c3, %c0_59], %126 {strides = array<i32>} : memref<8x128xf32, #tpu.memory_space<vmem>>, vector<1x128xf32>,
      %128 = vector.extract_strided_slice %43 {offsets = [4, 0], sizes = [1, 512], strides = [1, 1]} : vector<8x512xf32> to vector<1x512xf32>
      %129 = arith.truncf %126 : vector<1x128xf32> to vector<1x128xbf16>
      %cst_60 = arith.constant dense<0.000000e+00> : vector<1x512xf32>
      %130 = tpu.matmul %129, %23, %cst_60 {dimension_numbers = #tpu.dot_dimension_numbers<[1], [0], [0], [1], [0, 0, 1, 1], [], []>} : vector<1x128xbf16>, vector<128x512xbf16>, vector<1x512xf32> -> vector<1x512xf32>
      %131 = arith.addf %128, %130 : vector<1x512xf32>
      %132 = vector.extract_strided_slice %131 {offsets = [0, 0], sizes = [1, 384], strides = [1, 1]} : vector<1x512xf32> to vector<1x384xf32>
      %133 = arith.negf %132 : vector<1x384xf32>
      %134 = math.exp %133 : vector<1x384xf32>
      %cst_61 = arith.constant 1.000000e+00 : f32
      %135 = vector.broadcast %cst_61 : f32 to vector<1x384xf32>
      %136 = arith.addf %135, %134 : vector<1x384xf32>
      %137 = arith.divf %135, %136 : vector<1x384xf32>
      %138 = vector.extract_strided_slice %131 {offsets = [0, 384], sizes = [1, 128], strides = [1, 1]} : vector<1x512xf32> to vector<1x128xf32>
      %139 = math.tanh %138 : vector<1x128xf32>
      %140 = vector.extract_strided_slice %137 {offsets = [0, 0], sizes = [1, 128], strides = [1, 1]} : vector<1x384xf32> to vector<1x128xf32>
      %141 = vector.extract_strided_slice %137 {offsets = [0, 128], sizes = [1, 128], strides = [1, 1]} : vector<1x384xf32> to vector<1x128xf32>
      %142 = vector.extract_strided_slice %137 {offsets = [0, 256], sizes = [1, 128], strides = [1, 1]} : vector<1x384xf32> to vector<1x128xf32>
      %143 = arith.mulf %141, %124 : vector<1x128xf32>
      %144 = arith.mulf %140, %139 : vector<1x128xf32>
      %145 = arith.addf %143, %144 : vector<1x128xf32>
      %146 = math.tanh %145 : vector<1x128xf32>
      %147 = arith.mulf %142, %146 : vector<1x128xf32>
      %c4 = arith.constant 4 : index
      %c0_62 = arith.constant 0 : index
      %148 = vector.load %arg8[%c4, %c0_62] : memref<8x128xf32, #tpu.memory_space<vmem>>, vector<1x128xf32>
      tpu.vector_store %arg8[%c4, %c0_62], %147 {strides = array<i32>} : memref<8x128xf32, #tpu.memory_space<vmem>>, vector<1x128xf32>,
      %149 = vector.extract_strided_slice %43 {offsets = [5, 0], sizes = [1, 512], strides = [1, 1]} : vector<8x512xf32> to vector<1x512xf32>
      %150 = arith.truncf %147 : vector<1x128xf32> to vector<1x128xbf16>
      %cst_63 = arith.constant dense<0.000000e+00> : vector<1x512xf32>
      %151 = tpu.matmul %150, %23, %cst_63 {dimension_numbers = #tpu.dot_dimension_numbers<[1], [0], [0], [1], [0, 0, 1, 1], [], []>} : vector<1x128xbf16>, vector<128x512xbf16>, vector<1x512xf32> -> vector<1x512xf32>
      %152 = arith.addf %149, %151 : vector<1x512xf32>
      %153 = vector.extract_strided_slice %152 {offsets = [0, 0], sizes = [1, 384], strides = [1, 1]} : vector<1x512xf32> to vector<1x384xf32>
      %154 = arith.negf %153 : vector<1x384xf32>
      %155 = math.exp %154 : vector<1x384xf32>
      %cst_64 = arith.constant 1.000000e+00 : f32
      %156 = vector.broadcast %cst_64 : f32 to vector<1x384xf32>
      %157 = arith.addf %156, %155 : vector<1x384xf32>
      %158 = arith.divf %156, %157 : vector<1x384xf32>
      %159 = vector.extract_strided_slice %152 {offsets = [0, 384], sizes = [1, 128], strides = [1, 1]} : vector<1x512xf32> to vector<1x128xf32>
      %160 = math.tanh %159 : vector<1x128xf32>
      %161 = vector.extract_strided_slice %158 {offsets = [0, 0], sizes = [1, 128], strides = [1, 1]} : vector<1x384xf32> to vector<1x128xf32>
      %162 = vector.extract_strided_slice %158 {offsets = [0, 128], sizes = [1, 128], strides = [1, 1]} : vector<1x384xf32> to vector<1x128xf32>
      %163 = vector.extract_strided_slice %158 {offsets = [0, 256], sizes = [1, 128], strides = [1, 1]} : vector<1x384xf32> to vector<1x128xf32>
      %164 = arith.mulf %162, %145 : vector<1x128xf32>
      %165 = arith.mulf %161, %160 : vector<1x128xf32>
      %166 = arith.addf %164, %165 : vector<1x128xf32>
      %167 = math.tanh %166 : vector<1x128xf32>
      %168 = arith.mulf %163, %167 : vector<1x128xf32>
      %c5 = arith.constant 5 : index
      %c0_65 = arith.constant 0 : index
      %169 = vector.load %arg8[%c5, %c0_65] : memref<8x128xf32, #tpu.memory_space<vmem>>, vector<1x128xf32>
      tpu.vector_store %arg8[%c5, %c0_65], %168 {strides = array<i32>} : memref<8x128xf32, #tpu.memory_space<vmem>>, vector<1x128xf32>,
      %170 = vector.extract_strided_slice %43 {offsets = [6, 0], sizes = [1, 512], strides = [1, 1]} : vector<8x512xf32> to vector<1x512xf32>
      %171 = arith.truncf %168 : vector<1x128xf32> to vector<1x128xbf16>
      %cst_66 = arith.constant dense<0.000000e+00> : vector<1x512xf32>
      %172 = tpu.matmul %171, %23, %cst_66 {dimension_numbers = #tpu.dot_dimension_numbers<[1], [0], [0], [1], [0, 0, 1, 1], [], []>} : vector<1x128xbf16>, vector<128x512xbf16>, vector<1x512xf32> -> vector<1x512xf32>
      %173 = arith.addf %170, %172 : vector<1x512xf32>
      %174 = vector.extract_strided_slice %173 {offsets = [0, 0], sizes = [1, 384], strides = [1, 1]} : vector<1x512xf32> to vector<1x384xf32>
      %175 = arith.negf %174 : vector<1x384xf32>
      %176 = math.exp %175 : vector<1x384xf32>
      %cst_67 = arith.constant 1.000000e+00 : f32
      %177 = vector.broadcast %cst_67 : f32 to vector<1x384xf32>
      %178 = arith.addf %177, %176 : vector<1x384xf32>
      %179 = arith.divf %177, %178 : vector<1x384xf32>
      %180 = vector.extract_strided_slice %173 {offsets = [0, 384], sizes = [1, 128], strides = [1, 1]} : vector<1x512xf32> to vector<1x128xf32>
      %181 = math.tanh %180 : vector<1x128xf32>
      %182 = vector.extract_strided_slice %179 {offsets = [0, 0], sizes = [1, 128], strides = [1, 1]} : vector<1x384xf32> to vector<1x128xf32>
      %183 = vector.extract_strided_slice %179 {offsets = [0, 128], sizes = [1, 128], strides = [1, 1]} : vector<1x384xf32> to vector<1x128xf32>
      %184 = vector.extract_strided_slice %179 {offsets = [0, 256], sizes = [1, 128], strides = [1, 1]} : vector<1x384xf32> to vector<1x128xf32>
      %185 = arith.mulf %183, %166 : vector<1x128xf32>
      %186 = arith.mulf %182, %181 : vector<1x128xf32>
      %187 = arith.addf %185, %186 : vector<1x128xf32>
      %188 = math.tanh %187 : vector<1x128xf32>
      %189 = arith.mulf %184, %188 : vector<1x128xf32>
      %c6 = arith.constant 6 : index
      %c0_68 = arith.constant 0 : index
      %190 = vector.load %arg8[%c6, %c0_68] : memref<8x128xf32, #tpu.memory_space<vmem>>, vector<1x128xf32>
      tpu.vector_store %arg8[%c6, %c0_68], %189 {strides = array<i32>} : memref<8x128xf32, #tpu.memory_space<vmem>>, vector<1x128xf32>,
      %191 = vector.extract_strided_slice %43 {offsets = [7, 0], sizes = [1, 512], strides = [1, 1]} : vector<8x512xf32> to vector<1x512xf32>
      %192 = arith.truncf %189 : vector<1x128xf32> to vector<1x128xbf16>
      %cst_69 = arith.constant dense<0.000000e+00> : vector<1x512xf32>
      %193 = tpu.matmul %192, %23, %cst_69 {dimension_numbers = #tpu.dot_dimension_numbers<[1], [0], [0], [1], [0, 0, 1, 1], [], []>} : vector<1x128xbf16>, vector<128x512xbf16>, vector<1x512xf32> -> vector<1x512xf32>
      %194 = arith.addf %191, %193 : vector<1x512xf32>
      %195 = vector.extract_strided_slice %194 {offsets = [0, 0], sizes = [1, 384], strides = [1, 1]} : vector<1x512xf32> to vector<1x384xf32>
      %196 = arith.negf %195 : vector<1x384xf32>
      %197 = math.exp %196 : vector<1x384xf32>
      %cst_70 = arith.constant 1.000000e+00 : f32
      %198 = vector.broadcast %cst_70 : f32 to vector<1x384xf32>
      %199 = arith.addf %198, %197 : vector<1x384xf32>
      %200 = arith.divf %198, %199 : vector<1x384xf32>
      %201 = vector.extract_strided_slice %194 {offsets = [0, 384], sizes = [1, 128], strides = [1, 1]} : vector<1x512xf32> to vector<1x128xf32>
      %202 = math.tanh %201 : vector<1x128xf32>
      %203 = vector.extract_strided_slice %200 {offsets = [0, 0], sizes = [1, 128], strides = [1, 1]} : vector<1x384xf32> to vector<1x128xf32>
      %204 = vector.extract_strided_slice %200 {offsets = [0, 128], sizes = [1, 128], strides = [1, 1]} : vector<1x384xf32> to vector<1x128xf32>
      %205 = vector.extract_strided_slice %200 {offsets = [0, 256], sizes = [1, 128], strides = [1, 1]} : vector<1x384xf32> to vector<1x128xf32>
      %206 = arith.mulf %204, %187 : vector<1x128xf32>
      %207 = arith.mulf %203, %202 : vector<1x128xf32>
      %208 = arith.addf %206, %207 : vector<1x128xf32>
      %209 = math.tanh %208 : vector<1x128xf32>
      %210 = arith.mulf %205, %209 : vector<1x128xf32>
      %c7 = arith.constant 7 : index
      %c0_71 = arith.constant 0 : index
      %211 = vector.load %arg8[%c7, %c0_71] : memref<8x128xf32, #tpu.memory_space<vmem>>, vector<1x128xf32>
      tpu.vector_store %arg8[%c7, %c0_71], %210 {strides = array<i32>} : memref<8x128xf32, #tpu.memory_space<vmem>>, vector<1x128xf32>,
      %212 = arith.addi %29, %41 : i32
      %213 = tpu.assume_multiple %212, 8 : i32
      %c0_72 = arith.constant 0 : index
      %c0_73 = arith.constant 0 : index
      %214 = vector.load %arg8[%c0_72, %c0_73] : memref<8x128xf32, #tpu.memory_space<vmem>>, vector<8x128xf32>
      %215 = arith.truncf %214 : vector<8x128xf32> to vector<8x128xbf16>
      %216 = arith.index_cast %213 : i32 to index
      %c0_74 = arith.constant 0 : index
      %217 = vector.load %arg4[%216, %c0_74] : memref<16x128xbf16, #tpu.memory_space<vmem>>, vector<8x128xbf16>
      tpu.vector_store %arg4[%216, %c0_74], %215 {strides = array<i32>} : memref<16x128xbf16, #tpu.memory_space<vmem>>, vector<8x128xbf16>,
      scf.yield %210, %208 : vector<1x128xf32>, vector<1x128xf32>
    }
    %c2_i32_39 = arith.constant 2 : i32
    %c1_i32_40 = arith.constant 1 : i32
    %c1_41 = arith.constant 1 : index
    %c0_42 = arith.constant 0 : index
    %38 = vector.load %arg5[%c1_41, %c0_42] : memref<2x128xf32, #tpu.memory_space<vmem>>, vector<1x128xf32>
    tpu.vector_store %arg5[%c1_41, %c0_42], %37#0 {strides = array<i32>} : memref<2x128xf32, #tpu.memory_space<vmem>>, vector<1x128xf32>,
    %c1_43 = arith.constant 1 : index
    %c0_44 = arith.constant 0 : index
    %39 = vector.load %arg6[%c1_43, %c0_44] : memref<2x128xf32, #tpu.memory_space<vmem>>, vector<1x128xf32>
    tpu.vector_store %arg6[%c1_43, %c0_44], %37#1 {strides = array<i32>} : memref<2x128xf32, #tpu.memory_space<vmem>>, vector<1x128xf32>,
    return
  }
}

</mosaic_0001>

<bundles_post_ra>
// kernel: tpu_custom_call.1
= control target key start
LH: loop header
LB: loop body
LE: loop exit
PB: predicated region body
PF: predicated region fallthrough
CT: control target
= control target key end

     0   :  { %12 = vsyncpa [#allocation5], 0  ;;  %s5369_s0 = inlined_call_operand.hbm [shape: bf16[16,128], index: 0, kind: input, shape index: {}]   ;;  %s5370_s1 = inlined_call_operand.hbm [shape: bf16[2,128,512], index: 1, kind: input, shape index: {}]   ;;  %s5371_s2 = inlined_call_operand.hbm [shape: bf16[2,128,512], index: 2, kind: input, shape index: {}]   ;;  %s5372_s3 = inlined_call_operand.vmem [shape: f32[2,1,512], index: 3, kind: input, shape index: {}]   ;;  %s5373_s4 = inlined_call_operand.hbm [shape: bf16[16,128], index: 4, kind: output, shape index: {0}]   ;;  %s5374_s5 = inlined_call_operand.hbm [shape: f32[2,128], index: 5, kind: output, shape index: {1}]   ;;  %s5375_s6 = inlined_call_operand.hbm [shape: f32[2,128], index: 6, kind: output, shape index: {2}]  }
   0x1   :  { %13 = vsyncpa [#allocation8], 0 }
   0x2   :  { %14 = vsyncpa [#allocation6], 0 }
   0x3   :  { %15 = vsyncpa [#allocation12], 0  ;;  %s4078_s21 = smov [#allocation7]   ;;  %s3890_s25 = scalar_lea.hbm %s5370_s1, 8192 }
   0x4   :  { %s33_s22 = sshll.u32 %s4078_s21, 4  ;;  %p3891_p0 = scmp.ne.s32.totalorder %s5370_s1, %s3890_s25  ;;  %s34_s22 = int_to_ptr.vmem [resolvable:$true] %s33_s22 }
   0x5   :  { %p3894_p1 = scmp.lt.u32.totalorder %s3890_s25, %s5370_s1 }
   0x7   :  { %p3896_p2 = pnand %p3894_p1, %p3891_p0 }
   0x9   :  { %3899 = shalt.err (!%p3896_p2)
}
   0xa   :  { %s3900_s30 = scalar_lea.vmem %s34_s22, 8192  ;;  %p3905_p4 = scmp.lt.s32.totalorder %s34_s22, %s34_s22 }
   0xb   :  { %p3901_p3 = scmp.ne.s32.totalorder %s34_s22, %s3900_s30  ;;  %p3906_p5 = scmp.lt.s32.totalorder %s3900_s30, %s3900_s30 }
   0xd   :  { %p3907_p6 = por %p3906_p5, %p3905_p4 }
   0xf   :  { %p3908_p7 = pnand %p3907_p6, %p3901_p3 }
  0x11   :  { %3911 = shalt.err (!%p3908_p7)
}
  0x12   :  { %s4079_s7 = smov 256   ;;  %s4080_s8 = smov 16  }
  0x13   :  { %39 = dma.hbm_to_vmem [thread:$0]  %s5370_s1, 8192, %s34_s22, [#allocation8], %s4079_s7, %s4079_s7, %s4080_s8  }
  0x14   :  { %s4081_s11 = smov [#allocation4]   ;;  %s3912_s15 = scalar_lea.hbm %s5369_s0, 128 }
  0x15   :  { %s21_s12 = sshll.u32 %s4081_s11, 4  ;;  %p3913_p8 = scmp.ne.s32.totalorder %s5369_s0, %s3912_s15  ;;  %s22_s12 = int_to_ptr.vmem [resolvable:$true] %s21_s12 }
  0x16   :  { %p3916_p9 = scmp.lt.u32.totalorder %s3912_s15, %s5369_s0 }
  0x18   :  { %p3918_p10 = pnand %p3916_p9, %p3913_p8 }
  0x1a   :  { %3921 = shalt.err (!%p3918_p10)
}
  0x1b   :  { %s3922_s20 = scalar_lea.vmem %s22_s12, 128  ;;  %p3927_p12 = scmp.lt.s32.totalorder %s22_s12, %s22_s12 }
  0x1c   :  { %p3923_p11 = scmp.ne.s32.totalorder %s22_s12, %s3922_s20  ;;  %p3928_p13 = scmp.lt.s32.totalorder %s3922_s20, %s3922_s20 }
  0x1e   :  { %p3929_p0 = por %p3928_p13, %p3927_p12 }
  0x20   :  { %p3930_p1 = pnand %p3929_p0, %p3923_p11 }
  0x22   :  { %3933 = shalt.err (!%p3930_p1)
}
  0x23   :  { %s4082_s1 = smov 64   ;;  %s4083_s21 = smov 4  }
  0x24   :  { %27 = dma.hbm_to_vmem [thread:$0]  %s5369_s0, 128, %s22_s12, [#allocation5], %s4082_s1, %s4082_s1, %s4083_s21  }
  0x25   :  { %s4084_s24 = smov [#allocation9]   ;;  %s3934_s28 = scalar_lea.hbm %s5371_s2, 8192 }
  0x26   :  { %s45_s25 = sshll.u32 %s4084_s24, 4  ;;  %p3935_p2 = scmp.ne.s32.totalorder %s5371_s2, %s3934_s28  ;;  %s46_s25 = int_to_ptr.vmem [resolvable:$true] %s45_s25 }
  0x27   :  { %p3938_p3 = scmp.lt.u32.totalorder %s3934_s28, %s5371_s2 }
  0x29   :  { %p3940_p4 = pnand %p3938_p3, %p3935_p2 }
  0x2b   :  { %3943 = shalt.err (!%p3940_p4)
}
  0x2c   :  { %s3944_s11 = scalar_lea.vmem %s46_s25, 8192  ;;  %p3949_p6 = scmp.lt.s32.totalorder %s46_s25, %s46_s25 }
  0x2d   :  { %p3945_p5 = scmp.ne.s32.totalorder %s46_s25, %s3944_s11  ;;  %p3950_p7 = scmp.lt.s32.totalorder %s3944_s11, %s3944_s11 }
  0x2f   :  { %p3951_p8 = por %p3950_p7, %p3949_p6 }
  0x31   :  { %p3952_p9 = pnand %p3951_p8, %p3945_p5 }
  0x33   :  { %3955 = shalt.err (!%p3952_p9)
}
  0x34   :  { %51 = dma.hbm_to_vmem [thread:$0]  %s5371_s2, 8192, %s46_s25, [#allocation8], %s4079_s7, %s4079_s7, %s4080_s8  }
  0x35   :  { %4046 = dma.done.wait [#allocation5], 128  }
  0x36   :  { %4047 = vsyncadd [#allocation5], 4294967168 }
  0x37   :  { %4048 = dma.done.wait [#allocation8], 16384  }
  0x38   :  { %4049 = vsyncadd [#allocation8], 4294950912  ;;  %v5380_v0 = vmov 0   ;;  %v4173_v1 = vld [vmem:[#allocation9] sm:$0xff]  ;;  %v4175_v2 = vld [vmem:[#allocation9 + $0x8] sm:$0xff]  ;;  %s4258_s8 = smov 0  }
  0x39   :  { %350 = vmatprep.mubr.bf16.mxu0 %v5380_v0  ;;  %393 = vmatprep.mubr.bf16.mxu1 %v5380_v0  ;;  %5435 = vst [vmem:[#allocation18_spill] sm:$0xff] %v4173_v1  ;;  %5436 = vst [vmem:[#allocation19_spill] sm:$0xff] %v4175_v2  ;;  %v4177_v3 = vld [vmem:[#allocation9 + $0x10] sm:$0xff]  ;;  %v4179_v4 = vld [vmem:[#allocation9 + $0x18] sm:$0xff] }
  0x3a   :  { %5437 = vst [vmem:[#allocation20_spill] sm:$0xff] %v4177_v3  ;;  %5438 = vst [vmem:[#allocation21_spill] sm:$0xff] %v4179_v4  ;;  %v4181_v5 = vld [vmem:[#allocation9 + $0x20] sm:$0xff]  ;;  %v4183_v6 = vld [vmem:[#allocation9 + $0x28] sm:$0xff] }
  0x3b   :  { %5439 = vst [vmem:[#allocation22_spill] sm:$0xff] %v4181_v5  ;;  %5440 = vst [vmem:[#allocation23_spill] sm:$0xff] %v4183_v6  ;;  %v4185_v7 = vld [vmem:[#allocation9 + $0x30] sm:$0xff]  ;;  %v4187_v8 = vld [vmem:[#allocation9 + $0x38] sm:$0xff] }
  0x3c   :  { %5441 = vst [vmem:[#allocation24_spill] sm:$0xff] %v4185_v7  ;;  %5442 = vst [vmem:[#allocation25_spill] sm:$0xff] %v4187_v8  ;;  %v4189_v9 = vld [vmem:[#allocation9 + $0x40] sm:$0xff]  ;;  %v4191_v10 = vld [vmem:[#allocation9 + $0x48] sm:$0xff] }
  0x3d   :  { %5443 = vst [vmem:[#allocation26_spill] sm:$0xff] %v4189_v9  ;;  %5444 = vst [vmem:[#allocation27_spill] sm:$0xff] %v4191_v10  ;;  %v4193_v11 = vld [vmem:[#allocation9 + $0x50] sm:$0xff]  ;;  %v4195_v12 = vld [vmem:[#allocation9 + $0x58] sm:$0xff] }
  0x3e   :  { %5445 = vst [vmem:[#allocation28_spill] sm:$0xff] %v4193_v11  ;;  %5446 = vst [vmem:[#allocation29_spill] sm:$0xff] %v4195_v12  ;;  %v4197_v13 = vld [vmem:[#allocation9 + $0x60] sm:$0xff]  ;;  %v4199_v14 = vld [vmem:[#allocation9 + $0x68] sm:$0xff] }
  0x3f   :  { %5447 = vst [vmem:[#allocation30_spill] sm:$0xff] %v4197_v13  ;;  %5448 = vst [vmem:[#allocation31_spill] sm:$0xff] %v4199_v14  ;;  %v4201_v15 = vld [vmem:[#allocation9 + $0x70] sm:$0xff]  ;;  %v4203_v16 = vld [vmem:[#allocation9 + $0x78] sm:$0xff] }
  0x40   :  { %5449 = vst [vmem:[#allocation32_spill] sm:$0xff] %v4201_v15  ;;  %5450 = vst [vmem:[#allocation33_spill] sm:$0xff] %v4203_v16  ;;  %v4205_v17 = vld [vmem:[#allocation9 + $0x80] sm:$0xff]  ;;  %v4207_v18 = vld [vmem:[#allocation9 + $0x88] sm:$0xff] }
  0x41   :  { %5451 = vst [vmem:[#allocation34_spill] sm:$0xff] %v4205_v17  ;;  %5452 = vst [vmem:[#allocation35_spill] sm:$0xff] %v4207_v18  ;;  %v4209_v19 = vld [vmem:[#allocation9 + $0x90] sm:$0xff]  ;;  %v4211_v20 = vld [vmem:[#allocation9 + $0x98] sm:$0xff] }
  0x42   :  { %5453 = vst [vmem:[#allocation36_spill] sm:$0xff] %v4209_v19  ;;  %5454 = vst [vmem:[#allocation37_spill] sm:$0xff] %v4211_v20  ;;  %v4213_v21 = vld [vmem:[#allocation9 + $0xa0] sm:$0xff]  ;;  %v4215_v22 = vld [vmem:[#allocation9 + $0xa8] sm:$0xff] }
  0x43   :  { %5455 = vst [vmem:[#allocation38_spill] sm:$0xff] %v4213_v21  ;;  %5456 = vst [vmem:[#allocation39_spill] sm:$0xff] %v4215_v22  ;;  %v4217_v23 = vld [vmem:[#allocation9 + $0xb0] sm:$0xff]  ;;  %v4219_v24 = vld [vmem:[#allocation9 + $0xb8] sm:$0xff] }
  0x44   :  { %5457 = vst [vmem:[#allocation40_spill] sm:$0xff] %v4217_v23  ;;  %5458 = vst [vmem:[#allocation41_spill] sm:$0xff] %v4219_v24  ;;  %v4221_v25 = vld [vmem:[#allocation9 + $0xc0] sm:$0xff]  ;;  %v4223_v26 = vld [vmem:[#allocation9 + $0xc8] sm:$0xff] }
  0x45   :  { %5459 = vst [vmem:[#allocation42_spill] sm:$0xff] %v4221_v25  ;;  %v4225_v27 = vld [vmem:[#allocation9 + $0xd0] sm:$0xff]  ;;  %v4227_v28 = vld [vmem:[#allocation9 + $0xd8] sm:$0xff]  ;;  %v4229_v29 = vld [vmem:[#allocation9 + $0xe0] sm:$0xff] }
  0x46   :  { %v4231_v30 = vld [vmem:[#allocation9 + $0xe8] sm:$0xff]  ;;  %v4233_v31 = vld [vmem:[#allocation9 + $0xf0] sm:$0xff]  ;;  %v4235_v32 = vld [vmem:[#allocation9 + $0xf8] sm:$0xff] }
  0x47   :  { %v3528_v33 = vld [vmem:[#allocation7 + $0x4] ss:$16 sps:$4 sm:$0xff]   ;;  %v3530_v34 = vld [vmem:[#allocation7 + $0xc] ss:$16 sps:$4 sm:$0xff]   ;;  %v3532_v35 = vld [vmem:[#allocation7] ss:$16 sps:$4 sm:$0xff]  }
  0x48   :  { %318 = vmatprep.subr.bf16.mxu0 %v3528_v33  ;;  %v3533_v36 = vld [vmem:[#allocation7 + $0x8] ss:$16 sps:$4 sm:$0xff]   ;;  %361 = vmatprep.subr.bf16.mxu1 %v3530_v34  ;;  %v3534_v37 = vld [vmem:[#allocation7 + $0x24] ss:$16 sps:$4 sm:$0xff]   ;;  %v3536_v38 = vld [vmem:[#allocation7 + $0x2c] ss:$16 sps:$4 sm:$0xff]  }
  0x49   :  { %319 = vmatpush1.bf16.msra.mxu0 %v3532_v35  ;;  %362 = vmatpush1.bf16.msra.mxu1 %v3533_v36  ;;  %v3538_v39 = vld [vmem:[#allocation7 + $0x20] ss:$16 sps:$4 sm:$0xff]   ;;  %v3539_v40 = vld [vmem:[#allocation7 + $0x28] ss:$16 sps:$4 sm:$0xff]   ;;  %v3540_v41 = vld [vmem:[#allocation7 + $0x44] ss:$16 sps:$4 sm:$0xff]   ;;  %v132_v35 = vlaneseq }
  0x4a   :  { %320 = vmatprep.subr.bf16.mxu0 %v3534_v37  ;;  %363 = vmatprep.subr.bf16.mxu1 %v3536_v38  ;;  %v3542_v42 = vld [vmem:[#allocation7 + $0x4c] ss:$16 sps:$4 sm:$0xff]   ;;  %v3544_v43 = vld [vmem:[#allocation7 + $0x40] ss:$16 sps:$4 sm:$0xff]   ;;  %v3545_v44 = vld [vmem:[#allocation7 + $0x48] ss:$16 sps:$4 sm:$0xff]  }
  0x4b   :  { %v3546_v45 = vld [vmem:[#allocation7 + $0x64] ss:$16 sps:$4 sm:$0xff]   ;;  %v3548_v46 = vld [vmem:[#allocation7 + $0x6c] ss:$16 sps:$4 sm:$0xff]   ;;  %v3550_v47 = vld [vmem:[#allocation7 + $0x60] ss:$16 sps:$4 sm:$0xff]  }
  0x4c   :  { %v3551_v48 = vld [vmem:[#allocation7 + $0x68] ss:$16 sps:$4 sm:$0xff]   ;;  %v3552_v49 = vld [vmem:[#allocation7 + $0x84] ss:$16 sps:$4 sm:$0xff]   ;;  %v3554_v50 = vld [vmem:[#allocation7 + $0x8c] ss:$16 sps:$4 sm:$0xff]  }
  0x4d   :  { %321 = vmatpush1.bf16.msra.mxu0 %v3538_v39  ;;  %364 = vmatpush1.bf16.msra.mxu1 %v3539_v40  ;;  %v3556_v51 = vld [vmem:[#allocation7 + $0x80] ss:$16 sps:$4 sm:$0xff]   ;;  %v3557_v52 = vld [vmem:[#allocation7 + $0x88] ss:$16 sps:$4 sm:$0xff]   ;;  %v3558_v53 = vld [vmem:[#allocation7 + $0xa4] ss:$16 sps:$4 sm:$0xff]  }
  0x4e   :  { %322 = vmatprep.subr.bf16.mxu0 %v3540_v41  ;;  %365 = vmatprep.subr.bf16.mxu1 %v3542_v42  ;;  %v3560_v54 = vld [vmem:[#allocation7 + $0xac] ss:$16 sps:$4 sm:$0xff]   ;;  %v3562_v55 = vld [vmem:[#allocation7 + $0xa0] ss:$16 sps:$4 sm:$0xff]   ;;  %v3563_v56 = vld [vmem:[#allocation7 + $0xa8] ss:$16 sps:$4 sm:$0xff]  }
  0x4f   :  { %v3564_v57 = vld [vmem:[#allocation7 + $0xc4] ss:$16 sps:$4 sm:$0xff]   ;;  %v3566_v58 = vld [vmem:[#allocation7 + $0xcc] ss:$16 sps:$4 sm:$0xff]   ;;  %v3568_v59 = vld [vmem:[#allocation7 + $0xc0] ss:$16 sps:$4 sm:$0xff]  }
  0x50   :  { %v3569_v60 = vld [vmem:[#allocation7 + $0xc8] ss:$16 sps:$4 sm:$0xff]   ;;  %v3570_v61 = vld [vmem:[#allocation7 + $0xe4] ss:$16 sps:$4 sm:$0xff]   ;;  %v3572_v62 = vld [vmem:[#allocation7 + $0xec] ss:$16 sps:$4 sm:$0xff]  }
  0x51   :  { %323 = vmatpush1.bf16.msra.mxu0 %v3544_v43  ;;  %366 = vmatpush1.bf16.msra.mxu1 %v3545_v44  ;;  %v3574_v63 = vld [vmem:[#allocation7 + $0xe0] ss:$16 sps:$4 sm:$0xff]   ;;  %v3575_v33 = vld [vmem:[#allocation7 + $0xe8] ss:$16 sps:$4 sm:$0xff]   ;;  %v4237_v36 = vshrl.u32 %v132_v35, 7 }
  0x52   :  { %324 = vmatprep.subr.bf16.mxu0 %v3546_v45  ;;  %367 = vmatprep.subr.bf16.mxu1 %v3548_v46  ;;  %v3576_v34 = vld [vmem:[#allocation4] sm:$0xff]   ;;  %v128_v38 = vld [vmem:[%s5372_s3] sm:$0xf] }
  0x53   :  { %v5379_v37 = vsub.s32 0, %v4237_v36  ;;  %v5378_v39 = vsub.s32 2, %v4237_v36  ;;  %v5377_v40 = vsub.s32 1, %v4237_v36  ;;  %v5376_v41 = vsub.s32 3, %v4237_v36 }
  0x55   :  { %325 = vmatpush1.bf16.msra.mxu0 %v3550_v47  ;;  %368 = vmatpush1.bf16.msra.mxu1 %v3551_v48  ;;  %v135_v42 = vrot.slane %v128_v38, %v5379_v37  ;;  %v143_v43 = vrot.slane %v128_v38, %v5378_v39  ;;  %v139_v44 = vrot.slane %v128_v38, %v5377_v40 }
  0x56   :  { %326 = vmatprep.subr.bf16.mxu0 %v3552_v49  ;;  %369 = vmatprep.subr.bf16.mxu1 %v3554_v50  ;;  %v147_v45 = vrot.slane %v128_v38, %v5376_v41 }
  0x59   :  { %327 = vmatpush1.bf16.msra.mxu0 %v3556_v51  ;;  %370 = vmatpush1.bf16.msra.mxu1 %v3557_v52 }
  0x5a   :  { %328 = vmatprep.subr.bf16.mxu0 %v3558_v53  ;;  %371 = vmatprep.subr.bf16.mxu1 %v3560_v54 }
  0x5d   :  { %329 = vmatpush1.bf16.msra.mxu0 %v3562_v55  ;;  %372 = vmatpush1.bf16.msra.mxu1 %v3563_v56 }
  0x5e   :  { %330 = vmatprep.subr.bf16.mxu0 %v3564_v57  ;;  %373 = vmatprep.subr.bf16.mxu1 %v3566_v58 }
  0x61   :  { %331 = vmatpush1.bf16.msra.mxu0 %v3568_v59  ;;  %374 = vmatpush1.bf16.msra.mxu1 %v3569_v60 }
  0x62   :  { %332 = vmatprep.subr.bf16.mxu0 %v3570_v61  ;;  %375 = vmatprep.subr.bf16.mxu1 %v3572_v62  ;;  %v4254_v62 = vmov 0.0  }
  0x65   :  { %333 = vmatpush1.bf16.msra.mxu0 %v3574_v63  ;;  %376 = vmatpush1.bf16.msra.mxu1 %v3575_v33  ;;  %v4256_v63 = vmov 0.0  }
  0x68   :  { %351 = vmatmul.mubr.bf16.vlgmr.msra.gmra.mrb[0].mxu0 %v3576_v34  ;;  %394 = vmatmul.mubr.bf16.vlgmr.msra.gmra.mrb[0].mxu1 %v3576_v34 }
 0x13b   :  { %v352_v46 = vpop.f32.mrb[0].mxu0  ;;  %v395_v48 = vpop.f32.mrb[0].mxu1 }
 0x13c   :  { %v353_v47 = vadd.f32 %v352_v46, %v135_v42  ;;  %v354_v49 = vpop.f32.mrb[1].mxu0  ;;  %v396_v50 = vadd.f32 %v395_v48, %v143_v43  ;;  %v397_v52 = vpop.f32.mrb[1].mxu1 }
 0x13d   :  { %v355_v51 = vadd.f32 %v354_v49, %v139_v44  ;;  %v356_v53 = vpop.f32.mrb[2].mxu0  ;;  %v398_v54 = vadd.f32 %v397_v52, %v147_v45  ;;  %v399_v56 = vpop.f32.mrb[2].mxu1 }
 0x13e   :  { %404 = vst [vmem:[#allocation2] sm:$0xff] %v353_v47  ;;  %v357_v55 = vadd.f32 %v356_v53, %v135_v42  ;;  %v358_v57 = vpop.f32.mrb[3].mxu0  ;;  %406 = vst [vmem:[#allocation2 + $0x10] sm:$0xff] %v396_v50  ;;  %v400_v58 = vadd.f32 %v399_v56, %v143_v43  ;;  %v401_v60 = vpop.f32.mrb[3].mxu1 }
 0x13f   :  { %405 = vst [vmem:[#allocation2 + $0x8] sm:$0xff] %v355_v51  ;;  %v359_v59 = vadd.f32 %v358_v57, %v139_v44  ;;  %407 = vst [vmem:[#allocation2 + $0x18] sm:$0xff] %v398_v54  ;;  %v402_v61 = vadd.f32 %v401_v60, %v147_v45 }
 0x140   :  { %408 = vst [vmem:[#allocation2 + $0x20] sm:$0xff] %v357_v55  ;;  %410 = vst [vmem:[#allocation2 + $0x30] sm:$0xff] %v400_v58 }
 0x141   :  { %409 = vst [vmem:[#allocation2 + $0x28] sm:$0xff] %v359_v59  ;;  %411 = vst [vmem:[#allocation2 + $0x38] sm:$0xff] %v402_v61 }
 0x142 LB: > { %v5460_v25 = vld [vmem:[#allocation42_spill] sm:$0xff]  ;;  %v5461_v24 = vld [vmem:[#allocation41_spill] sm:$0xff]  ;;  %v5462_v23 = vld [vmem:[#allocation40_spill] sm:$0xff]  ;;  %v5382_v48 = vmov 0   ;;  %v4393_v39 = vcombine.high %v4223_v26, %v4227_v28  ;;  %v430_v37 = vpack.c.bf16 %v4060_v63, %v4060_v63  ;;  %v4413_v63 = vcombine.high %v4231_v30, %v4235_v32  ;;  %s3311_s13 = sshll.u32 %s4064_s8, 3  ;;  %s417_s8 = sadd.s32 1, %s4064_s8   ;;  %v4056_v62 = vphi %v4254_v62, %v5486_v62   ;;  %s4064_s8 = sphi %s4258_s8, %s417_s8   ;;  %v4060_v63 = vphi %v4256_v63, %v5487_v63  }
 0x143   : > { %v5463_v22 = vld [vmem:[#allocation39_spill] sm:$0xff]  ;;  %v5464_v21 = vld [vmem:[#allocation38_spill] sm:$0xff]  ;;  %v5465_v20 = vld [vmem:[#allocation37_spill] sm:$0xff]  ;;  %628 = vmatprep.mubr.bf16.mxu0 %v5382_v48  ;;  %669 = vmatprep.mubr.bf16.mxu1 %v5382_v48  ;;  %v4383_v41 = vcombine.high %v5460_v25, %v4225_v27  ;;  %v4398_v0 = vcombine.low %v5460_v25, %v4225_v27  ;;  %v4403_v48 = vcombine.high %v4229_v29, %v4233_v31  ;;  %s4466_s14 = sshra.s32 %s3311_s13, 3  ;;  %p414_p10 = scmp.ge.s32.totalorder %s417_s8, 2  }
 0x144   : > { %v5466_v19 = vld [vmem:[#allocation36_spill] sm:$0xff]  ;;  %v5467_v18 = vld [vmem:[#allocation35_spill] sm:$0xff]  ;;  %v5468_v17 = vld [vmem:[#allocation34_spill] sm:$0xff]  ;;  %v4363_v58 = vcombine.high %v5464_v21, %v5462_v23  ;;  %v4373_v60 = vcombine.high %v5463_v22, %v5461_v24  ;;  %v4378_v61 = vcombine.low %v5464_v21, %v5462_v23  ;;  %v4388_v40 = vcombine.low %v5463_v22, %v5461_v24  ;;  %s3465_s15 = sshll.u32 %s4466_s14, 5  ;;  %s3370_s17 = sshll.u32 %s4466_s14, 2 }
 0x145   : > { %v5469_v16 = vld [vmem:[#allocation33_spill] sm:$0xff]  ;;  %v5470_v15 = vld [vmem:[#allocation32_spill] sm:$0xff]  ;;  %v5471_v14 = vld [vmem:[#allocation31_spill] sm:$0xff]  ;;  %v4343_v54 = vcombine.high %v5468_v17, %v5466_v19  ;;  %v4353_v56 = vcombine.high %v5467_v18, %v5465_v20  ;;  %v4358_v57 = vcombine.low %v5468_v17, %v5466_v19  ;;  %v4368_v59 = vcombine.low %v5467_v18, %v5465_v20  ;;  %s4469_s16 = scalar_lea.vmem [#allocation2], %s3465_s15  ;;  %s1628_s18 = scalar_lea.vmem [#allocation10], %s3370_s17 }
 0x146   : > { %v5472_v13 = vld [vmem:[#allocation30_spill] sm:$0xff]  ;;  %v5473_v12 = vld [vmem:[#allocation29_spill] sm:$0xff]  ;;  %v5474_v11 = vld [vmem:[#allocation28_spill] sm:$0xff]  ;;  %v4333_v52 = vcombine.high %v5471_v14, %v5469_v16  ;;  %v4348_v55 = vcombine.low %v5471_v14, %v5469_v16 }
 0x147   : > { %v5475_v10 = vld [vmem:[#allocation27_spill] sm:$0xff]  ;;  %v5476_v9 = vld [vmem:[#allocation26_spill] sm:$0xff]  ;;  %v5477_v8 = vld [vmem:[#allocation25_spill] sm:$0xff]  ;;  %v4323_v50 = vcombine.high %v5472_v13, %v5470_v15  ;;  %v4338_v53 = vcombine.low %v5472_v13, %v5470_v15 }
 0x148   : > { %v5478_v7 = vld [vmem:[#allocation24_spill] sm:$0xff]  ;;  %v5479_v6 = vld [vmem:[#allocation23_spill] sm:$0xff]  ;;  %v5480_v5 = vld [vmem:[#allocation22_spill] sm:$0xff]  ;;  %v4301_v45 = vcombine.high %v5476_v9, %v5474_v11  ;;  %v4311_v47 = vcombine.high %v5475_v10, %v5473_v12  ;;  %v4317_v49 = vcombine.low %v5476_v9, %v5474_v11  ;;  %v4328_v51 = vcombine.low %v5475_v10, %v5473_v12 }
 0x149   : > { %v5481_v4 = vld [vmem:[#allocation21_spill] sm:$0xff]  ;;  %v5482_v3 = vld [vmem:[#allocation20_spill] sm:$0xff]  ;;  %v5483_v2 = vld [vmem:[#allocation19_spill] sm:$0xff]  ;;  %v4277_v35 = vcombine.high %v5480_v5, %v5478_v7  ;;  %v4290_v43 = vcombine.high %v5479_v6, %v5477_v8  ;;  %v4295_v44 = vcombine.low %v5480_v5, %v5478_v7  ;;  %v4306_v46 = vcombine.low %v5479_v6, %v5477_v8 }
 0x14a   : > { %v5484_v1 = vld [vmem:[#allocation18_spill] sm:$0xff]  ;;  %v4281_v38 = vcombine.high %v5483_v2, %v5481_v4  ;;  %v4286_v42 = vcombine.low %v5483_v2, %v5481_v4  ;;  %v432_v2 = vshrl.u32 %v430_v37, 16  ;;  %v4424_v4 = vcombine.low %v4231_v30, %v4235_v32  ;;  %v4480_v17 = vld [vmem:[%s4469_s16 + $0x10] sm:$0xff]  ;;  %v4774_v30 = vld [vmem:[#allocation9 + $0x158] sm:$0xff] (%p414_p10) }
 0x14b   : > { %v4269_v33 = vcombine.high %v5484_v1, %v5482_v3  ;;  %v4273_v34 = vcombine.low %v5484_v1, %v5482_v3  ;;  %v4408_v1 = vcombine.low %v4223_v26, %v4227_v28  ;;  %v4418_v3 = vcombine.low %v4229_v29, %v4233_v31  ;;  %v4484_v20 = vld [vmem:[%s4469_s16 + $0x18] sm:$0xff]  ;;  %v4766_v26 = vld [vmem:[#allocation9 + $0x138] sm:$0xff] (%p414_p10)  ;;  %v4768_v27 = vld [vmem:[#allocation9 + $0x140] sm:$0xff] (%p414_p10)  ;;  %5493 = vst [vmem:[#allocation22_spill] sm:$0xff] (%p414_p10), %v4774_v30 }
 0x14c   : > { %637 = vmatprep.subr.bf16.mxu1 %v4281_v38  ;;  %v434_v5 = vrot.slane %v432_v2, 3  ;;  %v5485_v37 = vmov 0   ;;  %v4472_v2 = vld [vmem:[%s4469_s16] sm:$0xff]  ;;  %5489 = vst [vmem:[#allocation18_spill] sm:$0xff] (%p414_p10), %v4766_v26  ;;  %5490 = vst [vmem:[#allocation19_spill] sm:$0xff] (%p414_p10), %v4768_v27  ;;  %v4770_v28 = vld [vmem:[#allocation9 + $0x148] sm:$0xff] (%p414_p10) }
 0x14d   : > { %596 = vmatprep.subr.bf16.mxu0 %v4269_v33  ;;  %638 = vmatpush1.bf16.msra.mxu1 %v4286_v42  ;;  %5491 = vst [vmem:[#allocation20_spill] sm:$0xff] (%p414_p10), %v4770_v28  ;;  %v4772_v29 = vld [vmem:[#allocation9 + $0x150] sm:$0xff] (%p414_p10)  ;;  %v4776_v31 = vld [vmem:[#allocation9 + $0x160] sm:$0xff] (%p414_p10)  ;;  %v4778_v32 = vld [vmem:[#allocation9 + $0x168] sm:$0xff] (%p414_p10) }
 0x14e   : > { %597 = vmatpush1.bf16.msra.mxu0 %v4273_v34  ;;  %639 = vmatprep.subr.bf16.mxu1 %v4290_v43  ;;  %5492 = vst [vmem:[#allocation21_spill] sm:$0xff] (%p414_p10), %v4772_v29  ;;  %5494 = vst [vmem:[#allocation23_spill] sm:$0xff] (%p414_p10), %v4776_v31 }
 0x14f   : > { %598 = vmatprep.subr.bf16.mxu0 %v4277_v35  ;;  %5495 = vst [vmem:[#allocation24_spill] sm:$0xff] (%p414_p10), %v4778_v32 }
 0x151   : > { %640 = vmatpush1.bf16.msra.mxu1 %v4306_v46 }
 0x152   : > { %599 = vmatpush1.bf16.msra.mxu0 %v4295_v44  ;;  %641 = vmatprep.subr.bf16.mxu1 %v4311_v47 }
 0x153   : > { %600 = vmatprep.subr.bf16.mxu0 %v4301_v45 }
 0x155   : > { %642 = vmatpush1.bf16.msra.mxu1 %v4328_v51 }
 0x156   : > { %601 = vmatpush1.bf16.msra.mxu0 %v4317_v49  ;;  %643 = vmatprep.subr.bf16.mxu1 %v4333_v52 }
 0x157   : > { %602 = vmatprep.subr.bf16.mxu0 %v4323_v50 }
 0x159   : > { %644 = vmatpush1.bf16.msra.mxu1 %v4348_v55 }
 0x15a   : > { %603 = vmatpush1.bf16.msra.mxu0 %v4338_v53  ;;  %645 = vmatprep.subr.bf16.mxu1 %v4353_v56 }
 0x15b   : > { %604 = vmatprep.subr.bf16.mxu0 %v4343_v54 }
 0x15d   : > { %646 = vmatpush1.bf16.msra.mxu1 %v4368_v59 }
 0x15e   : > { %605 = vmatpush1.bf16.msra.mxu0 %v4358_v57  ;;  %647 = vmatprep.subr.bf16.mxu1 %v4373_v60 }
 0x15f   : > { %606 = vmatprep.subr.bf16.mxu0 %v4363_v58 }
 0x161   : > { %648 = vmatpush1.bf16.msra.mxu1 %v4388_v40 }
 0x162   : > { %607 = vmatpush1.bf16.msra.mxu0 %v4378_v61  ;;  %649 = vmatprep.subr.bf16.mxu1 %v4393_v39 }
 0x163   : > { %608 = vmatprep.subr.bf16.mxu0 %v4383_v41 }
 0x165   : > { %650 = vmatpush1.bf16.msra.mxu1 %v4408_v1 }
 0x166   : > { %609 = vmatpush1.bf16.msra.mxu0 %v4398_v0  ;;  %651 = vmatprep.subr.bf16.mxu1 %v4413_v63 }
 0x167   : > { %610 = vmatprep.subr.bf16.mxu0 %v4403_v48 }
 0x169   : > { %652 = vmatpush1.bf16.msra.mxu1 %v4424_v4 }
 0x16a   : > { %611 = vmatpush1.bf16.msra.mxu0 %v4418_v3  ;;  %752 = vmatprep.subr.bf16.mxu1 %v4281_v38 }
 0x16b   : > { %711 = vmatprep.subr.bf16.mxu0 %v4269_v33 }
 0x16c   : > { %670 = vmatmul.mubr.bf16.vlgmr.msra.gmra.mrb[0].mxu1 %v434_v5 }
 0x16d   : > { %629 = vmatmul.mubr.bf16.vlgmr.msra.gmra.mrb[0].mxu0 %v434_v5  ;;  %753 = vmatpush1.bf16.msra.mxu1 %v4286_v42  ;;  %v4475_v5 = vld [vmem:[%s4469_s16 + $0x8] sm:$0xff] }
 0x16e   : > { %712 = vmatpush1.bf16.msra.mxu0 %v4273_v34  ;;  %754 = vmatprep.subr.bf16.mxu1 %v4290_v43 }
 0x16f   : > { %713 = vmatprep.subr.bf16.mxu0 %v4277_v35  ;;  %743 = vmatprep.mubr.bf16.mxu0 %v5485_v37 }
 0x170   : > { %784 = vmatprep.mubr.bf16.mxu1 %v5485_v37 }
 0x171   : > { %755 = vmatpush1.bf16.msra.mxu1 %v4306_v46 }
 0x172   : > { %714 = vmatpush1.bf16.msra.mxu0 %v4295_v44  ;;  %756 = vmatprep.subr.bf16.mxu1 %v4311_v47 }
 0x173   : > { %715 = vmatprep.subr.bf16.mxu0 %v4301_v45 }
 0x175   : > { %757 = vmatpush1.bf16.msra.mxu1 %v4328_v51 }
 0x176   : > { %716 = vmatpush1.bf16.msra.mxu0 %v4317_v49  ;;  %758 = vmatprep.subr.bf16.mxu1 %v4333_v52 }
 0x177   : > { %717 = vmatprep.subr.bf16.mxu0 %v4323_v50 }
 0x179   : > { %759 = vmatpush1.bf16.msra.mxu1 %v4348_v55 }
 0x17a   : > { %718 = vmatpush1.bf16.msra.mxu0 %v4338_v53  ;;  %760 = vmatprep.subr.bf16.mxu1 %v4353_v56 }
 0x17b   : > { %719 = vmatprep.subr.bf16.mxu0 %v4343_v54 }
 0x17d   : > { %761 = vmatpush1.bf16.msra.mxu1 %v4368_v59 }
 0x17e   : > { %720 = vmatpush1.bf16.msra.mxu0 %v4358_v57  ;;  %762 = vmatprep.subr.bf16.mxu1 %v4373_v60 }
 0x17f   : > { %721 = vmatprep.subr.bf16.mxu0 %v4363_v58 }
 0x181   : > { %763 = vmatpush1.bf16.msra.mxu1 %v4388_v40 }
 0x182   : > { %722 = vmatpush1.bf16.msra.mxu0 %v4378_v61  ;;  %764 = vmatprep.subr.bf16.mxu1 %v4393_v39 }
 0x183   : > { %723 = vmatprep.subr.bf16.mxu0 %v4383_v41 }
 0x185   : > { %765 = vmatpush1.bf16.msra.mxu1 %v4408_v1 }
 0x186   : > { %724 = vmatpush1.bf16.msra.mxu0 %v4398_v0  ;;  %766 = vmatprep.subr.bf16.mxu1 %v4413_v63 }
 0x187   : > { %725 = vmatprep.subr.bf16.mxu0 %v4403_v48 }
 0x189   : > { %767 = vmatpush1.bf16.msra.mxu1 %v4424_v4 }
 0x18a   : > { %726 = vmatpush1.bf16.msra.mxu0 %v4418_v3  ;;  %883 = vmatprep.subr.bf16.mxu1 %v4281_v38 }
 0x18b   : > { %842 = vmatprep.subr.bf16.mxu0 %v4269_v33 }
 0x23f   : > { %v671_v9 = vpop.f32.mrb[0].mxu1 }
 0x240   : > { %v630_v6 = vpop.f32.mrb[0].mxu0  ;;  %v673_v12 = vpop.f32.mrb[1].mxu1  ;;  %v680_v19 = vadd.f32 %v671_v9, %v4480_v17 }
 0x241   : > { %v678_v7 = vadd.f32 %v630_v6, %v4472_v2  ;;  %v632_v8 = vpop.f32.mrb[1].mxu0  ;;  %v675_v15 = vpop.f32.mrb[2].mxu1  ;;  %v681_v21 = vadd.f32 %v673_v12, %v4484_v20 }
 0x242   : > { %v679_v10 = vadd.f32 %v632_v8, %v4475_v5  ;;  %v634_v11 = vpop.f32.mrb[2].mxu0  ;;  %v676_v18 = vpop.f32.mrb[3].mxu1  ;;  %v3348_v6 = vmul.f32 -1.442695, %v680_v19 }
 0x243   : > { %v3346_v13 = vmul.f32 -1.442695, %v678_v7  ;;  %v635_v14 = vpop.f32.mrb[3].mxu0 }
 0x244   : > { %v3347_v16 = vmul.f32 -1.442695, %v679_v10 }
 0x245   : > { %3577 = vpow2.f32 %v3346_v13  ;;  %v702_v13 = vrot.slane %v4056_v62, 7 }
 0x246   : > { %3579 = vpow2.f32 %v3347_v16 }
 0x247   : > { %3581 = vpow2.f32 %v3348_v6 }
 0x248   : > { %3583 = vtanh.f32 %v681_v21 }
 0x24f   : > { %v3578_v22 = vpop.eup %3577 }
 0x250   : > { %v3580_v8 = vpop.eup %3579  ;;  %v691_v11 = vadd.f32 1.0, %v3578_v22 }
 0x251   : > { %v692_v7 = vadd.f32 1.0, %v3580_v8  ;;  %v3582_v10 = vpop.eup %3581 }
 0x252   : > { %3585 = vrcp.f32 %v691_v11  ;;  %v3584_v14 = vpop.eup %3583  ;;  %v693_v16 = vadd.f32 1.0, %v3582_v10 }
 0x253   : > { %3587 = vrcp.f32 %v692_v7 }
 0x254   : > { %3589 = vrcp.f32 %v693_v16 }
 0x25c   : > { %v3586_v15 = vpop.eup %3585 }
 0x25d   : > { %v3588_v9 = vpop.eup %3587  ;;  %v705_v18 = vmul.f32 %v3586_v15, %v3584_v14 }
 0x25e   : > { %v704_v23 = vmul.f32 %v3588_v9, %v702_v13  ;;  %v3590_v12 = vpop.eup %3589 }
 0x260   : > { %v4488_v19 = vadd.f32 %v705_v18, %v704_v23 }
 0x262   : > { %3591 = vtanh.f32 %v4488_v19 }
 0x26c   : > { %v3592_v22 = vpop.eup %3591 }
 0x26d   : > { %v708_v21 = vmul.f32 %v3592_v22, %v3590_v12 }
 0x26f   : > { %709 = vst [vmem:[#allocation3] sm:$0x1] %v708_v21  ;;  %v710_v6 = vpack.c.bf16 %v708_v21, %v708_v21 }
 0x271   : > { %744 = vmatmul.mubr.bf16.vlgmr.msra.gmra.mrb[4].mxu0 %v710_v6  ;;  %785 = vmatmul.mubr.bf16.vlgmr.msra.gmra.mrb[4].mxu1 %v710_v6 }
 0x272   : > { %843 = vmatpush1.bf16.msra.mxu0 %v4273_v34  ;;  %884 = vmatpush1.bf16.msra.mxu1 %v4286_v42 }
 0x273   : > { %844 = vmatprep.subr.bf16.mxu0 %v4277_v35  ;;  %885 = vmatprep.subr.bf16.mxu1 %v4290_v43 }
 0x274   : > { %874 = vmatprep.mubr.bf16.mxu0 %v5485_v37  ;;  %915 = vmatprep.mubr.bf16.mxu1 %v5485_v37 }
 0x276   : > { %845 = vmatpush1.bf16.msra.mxu0 %v4295_v44  ;;  %886 = vmatpush1.bf16.msra.mxu1 %v4306_v46 }
 0x277   : > { %846 = vmatprep.subr.bf16.mxu0 %v4301_v45  ;;  %887 = vmatprep.subr.bf16.mxu1 %v4311_v47 }
 0x27a   : > { %847 = vmatpush1.bf16.msra.mxu0 %v4317_v49  ;;  %888 = vmatpush1.bf16.msra.mxu1 %v4328_v51 }
 0x27b   : > { %848 = vmatprep.subr.bf16.mxu0 %v4323_v50  ;;  %889 = vmatprep.subr.bf16.mxu1 %v4333_v52 }
 0x27e   : > { %849 = vmatpush1.bf16.msra.mxu0 %v4338_v53  ;;  %890 = vmatpush1.bf16.msra.mxu1 %v4348_v55 }
 0x27f   : > { %850 = vmatprep.subr.bf16.mxu0 %v4343_v54  ;;  %891 = vmatprep.subr.bf16.mxu1 %v4353_v56 }
 0x282   : > { %851 = vmatpush1.bf16.msra.mxu0 %v4358_v57  ;;  %892 = vmatpush1.bf16.msra.mxu1 %v4368_v59 }
 0x283   : > { %852 = vmatprep.subr.bf16.mxu0 %v4363_v58  ;;  %893 = vmatprep.subr.bf16.mxu1 %v4373_v60 }
 0x286   : > { %853 = vmatpush1.bf16.msra.mxu0 %v4378_v61  ;;  %894 = vmatpush1.bf16.msra.mxu1 %v4388_v40 }
 0x287   : > { %854 = vmatprep.subr.bf16.mxu0 %v4383_v41  ;;  %895 = vmatprep.subr.bf16.mxu1 %v4393_v39 }
 0x28a   : > { %855 = vmatpush1.bf16.msra.mxu0 %v4398_v0  ;;  %896 = vmatpush1.bf16.msra.mxu1 %v4408_v1 }
 0x28b   : > { %856 = vmatprep.subr.bf16.mxu0 %v4403_v48  ;;  %897 = vmatprep.subr.bf16.mxu1 %v4413_v63 }
 0x28e   : > { %857 = vmatpush1.bf16.msra.mxu0 %v4418_v3  ;;  %898 = vmatpush1.bf16.msra.mxu1 %v4424_v4 }
 0x28f   : > { %972 = vmatprep.subr.bf16.mxu0 %v4269_v33  ;;  %1013 = vmatprep.subr.bf16.mxu1 %v4281_v38 }
 0x344   : > { %v745_v23 = vpop.f32.mrb[4].mxu0  ;;  %v786_v62 = vpop.f32.mrb[4].mxu1 }
 0x345   : > { %v797_v8 = vrot.slane %v745_v23, 7  ;;  %v747_v11 = vpop.f32.mrb[5].mxu0  ;;  %v788_v7 = vpop.f32.mrb[5].mxu1  ;;  %v799_v21 = vrot.slane %v786_v62, 7  ;;  %v829_v62 = vrot.slane %v4488_v19, 7 }
 0x346   : > { %v798_v10 = vrot.slane %v747_v11, 7  ;;  %v749_v14 = vpop.f32.mrb[6].mxu0  ;;  %v790_v13 = vpop.f32.mrb[6].mxu1  ;;  %v800_v6 = vrot.slane %v788_v7, 7 }
 0x347   : > { %v805_v15 = vadd.f32 %v797_v8, %v4472_v2  ;;  %v750_v16 = vpop.f32.mrb[7].mxu0  ;;  %v791_v9 = vpop.f32.mrb[7].mxu1  ;;  %v807_v24 = vadd.f32 %v799_v21, %v4480_v17 }
 0x348   : > { %v806_v18 = vadd.f32 %v798_v10, %v4475_v5  ;;  %v808_v23 = vadd.f32 %v800_v6, %v4484_v20 }
 0x349   : > { %v3349_v12 = vmul.f32 -1.442695, %v805_v15  ;;  %v3351_v25 = vmul.f32 -1.442695, %v807_v24 }
 0x34a   : > { %v3350_v22 = vmul.f32 -1.442695, %v806_v18 }
 0x34b   : > { %3593 = vpow2.f32 %v3349_v12 }
 0x34c   : > { %3595 = vpow2.f32 %v3350_v22 }
 0x34d   : > { %3597 = vtanh.f32 %v808_v23 }
 0x34e   : > { %3599 = vpow2.f32 %v3351_v25 }
 0x355   : > { %v3594_v11 = vpop.eup %3593 }
 0x356   : > { %v818_v14 = vadd.f32 1.0, %v3594_v11  ;;  %v3596_v13 = vpop.eup %3595 }
 0x357   : > { %v819_v8 = vadd.f32 1.0, %v3596_v13  ;;  %v3598_v10 = vpop.eup %3597 }
 0x358   : > { %3601 = vrcp.f32 %v818_v14  ;;  %v3600_v15 = vpop.eup %3599 }
 0x359   : > { %3603 = vrcp.f32 %v819_v8  ;;  %v820_v18 = vadd.f32 1.0, %v3600_v15 }
 0x35b   : > { %3605 = vrcp.f32 %v820_v18 }
 0x362   : > { %v3602_v16 = vpop.eup %3601 }
 0x363   : > { %v832_v9 = vmul.f32 %v3602_v16, %v3598_v10  ;;  %v3604_v7 = vpop.eup %3603 }
 0x364   : > { %v831_v12 = vmul.f32 %v3604_v7, %v829_v62 }
 0x365   : > { %v3606_v24 = vpop.eup %3605 }
 0x366   : > { %v4530_v22 = vadd.f32 %v832_v9, %v831_v12 }
 0x368   : > { %3607 = vtanh.f32 %v4530_v22 }
 0x372   : > { %v3608_v21 = vpop.eup %3607 }
 0x373   : > { %v835_v25 = vmul.f32 %v3608_v21, %v3606_v24 }
 0x375   : > { %836 = vst [vmem:[#allocation3] sm:$0x2] %v835_v25  ;;  %v837_v6 = vpack.c.bf16 %v835_v25, %v835_v25 }
 0x377   : > { %v839_v23 = vshrl.u32 %v837_v6, 16 }
 0x379   : > { %875 = vmatmul.mubr.bf16.vlgmr.msra.gmra.mrb[8].mxu0 %v839_v23  ;;  %916 = vmatmul.mubr.bf16.vlgmr.msra.gmra.mrb[8].mxu1 %v839_v23 }
 0x37a   : > { %973 = vmatpush1.bf16.msra.mxu0 %v4273_v34  ;;  %1014 = vmatpush1.bf16.msra.mxu1 %v4286_v42 }
 0x37b   : > { %974 = vmatprep.subr.bf16.mxu0 %v4277_v35  ;;  %1015 = vmatprep.subr.bf16.mxu1 %v4290_v43 }
 0x37c   : > { %1004 = vmatprep.mubr.bf16.mxu0 %v5485_v37  ;;  %1045 = vmatprep.mubr.bf16.mxu1 %v5485_v37 }
 0x37e   : > { %975 = vmatpush1.bf16.msra.mxu0 %v4295_v44  ;;  %1016 = vmatpush1.bf16.msra.mxu1 %v4306_v46 }
 0x37f   : > { %976 = vmatprep.subr.bf16.mxu0 %v4301_v45  ;;  %1017 = vmatprep.subr.bf16.mxu1 %v4311_v47 }
 0x382   : > { %977 = vmatpush1.bf16.msra.mxu0 %v4317_v49  ;;  %1018 = vmatpush1.bf16.msra.mxu1 %v4328_v51 }
 0x383   : > { %978 = vmatprep.subr.bf16.mxu0 %v4323_v50  ;;  %1019 = vmatprep.subr.bf16.mxu1 %v4333_v52 }
 0x386   : > { %979 = vmatpush1.bf16.msra.mxu0 %v4338_v53  ;;  %1020 = vmatpush1.bf16.msra.mxu1 %v4348_v55 }
 0x387   : > { %980 = vmatprep.subr.bf16.mxu0 %v4343_v54  ;;  %1021 = vmatprep.subr.bf16.mxu1 %v4353_v56 }
 0x38a   : > { %981 = vmatpush1.bf16.msra.mxu0 %v4358_v57  ;;  %1022 = vmatpush1.bf16.msra.mxu1 %v4368_v59 }
 0x38b   : > { %982 = vmatprep.subr.bf16.mxu0 %v4363_v58  ;;  %1023 = vmatprep.subr.bf16.mxu1 %v4373_v60 }
 0x38e   : > { %983 = vmatpush1.bf16.msra.mxu0 %v4378_v61  ;;  %1024 = vmatpush1.bf16.msra.mxu1 %v4388_v40 }
 0x38f   : > { %984 = vmatprep.subr.bf16.mxu0 %v4383_v41  ;;  %1025 = vmatprep.subr.bf16.mxu1 %v4393_v39 }
 0x392   : > { %985 = vmatpush1.bf16.msra.mxu0 %v4398_v0  ;;  %1026 = vmatpush1.bf16.msra.mxu1 %v4408_v1 }
 0x393   : > { %986 = vmatprep.subr.bf16.mxu0 %v4403_v48  ;;  %1027 = vmatprep.subr.bf16.mxu1 %v4413_v63 }
 0x396   : > { %987 = vmatpush1.bf16.msra.mxu0 %v4418_v3  ;;  %1028 = vmatpush1.bf16.msra.mxu1 %v4424_v4 }
 0x397   : > { %1104 = vmatprep.subr.bf16.mxu0 %v4269_v33  ;;  %1145 = vmatprep.subr.bf16.mxu1 %v4281_v38 }
 0x44c   : > { %v876_v19 = vpop.f32.mrb[8].mxu0  ;;  %v917_v11 = vpop.f32.mrb[8].mxu1 }
 0x44d   : > { %v928_v14 = vrot.slane %v876_v19, 6  ;;  %v878_v13 = vpop.f32.mrb[9].mxu0  ;;  %v919_v8 = vpop.f32.mrb[9].mxu1  ;;  %v930_v21 = vrot.slane %v917_v11, 6  ;;  %v960_v11 = vrot.slane %v4530_v22, 7 }
 0x44e   : > { %v929_v10 = vrot.slane %v878_v13, 6  ;;  %v880_v15 = vpop.f32.mrb[10].mxu0  ;;  %v921_v16 = vpop.f32.mrb[10].mxu1  ;;  %v931_v25 = vrot.slane %v919_v8, 6 }
 0x44f   : > { %v936_v62 = vadd.f32 %v928_v14, %v4472_v2  ;;  %v881_v9 = vpop.f32.mrb[11].mxu0  ;;  %v922_v7 = vpop.f32.mrb[11].mxu1  ;;  %v938_v6 = vadd.f32 %v930_v21, %v4480_v17 }
 0x450   : > { %v937_v18 = vadd.f32 %v929_v10, %v4475_v5  ;;  %v939_v23 = vadd.f32 %v931_v25, %v4484_v20 }
 0x451   : > { %v3352_v12 = vmul.f32 -1.442695, %v936_v62  ;;  %v3354_v19 = vmul.f32 -1.442695, %v938_v6 }
 0x452   : > { %v3353_v24 = vmul.f32 -1.442695, %v937_v18 }
 0x453   : > { %3609 = vpow2.f32 %v3352_v12 }
 0x454   : > { %3611 = vpow2.f32 %v3353_v24 }
 0x455   : > { %3613 = vtanh.f32 %v939_v23 }
 0x456   : > { %3615 = vpow2.f32 %v3354_v19 }
 0x45d   : > { %v3610_v13 = vpop.eup %3609 }
 0x45e   : > { %v949_v15 = vadd.f32 1.0, %v3610_v13  ;;  %v3612_v16 = vpop.eup %3611 }
 0x45f   : > { %v950_v14 = vadd.f32 1.0, %v3612_v16  ;;  %v3614_v10 = vpop.eup %3613 }
 0x460   : > { %3617 = vrcp.f32 %v949_v15  ;;  %v3616_v62 = vpop.eup %3615 }
 0x461   : > { %3619 = vrcp.f32 %v950_v14  ;;  %v951_v18 = vadd.f32 1.0, %v3616_v62 }
 0x463   : > { %3621 = vrcp.f32 %v951_v18 }
 0x46a   : > { %v3618_v9 = vpop.eup %3617 }
 0x46b   : > { %v963_v7 = vmul.f32 %v3618_v9, %v3614_v10  ;;  %v3620_v8 = vpop.eup %3619 }
 0x46c   : > { %v962_v12 = vmul.f32 %v3620_v8, %v960_v11 }
 0x46d   : > { %v3622_v21 = vpop.eup %3621 }
 0x46e   : > { %v4572_v24 = vadd.f32 %v963_v7, %v962_v12 }
 0x470   : > { %3623 = vtanh.f32 %v4572_v24 }
 0x47a   : > { %v3624_v25 = vpop.eup %3623 }
 0x47b   : > { %v966_v6 = vmul.f32 %v3624_v25, %v3622_v21 }
 0x47d   : > { %967 = vst [vmem:[#allocation3] sm:$0x4] %v966_v6  ;;  %v968_v23 = vpack.c.bf16 %v966_v6, %v966_v6 }
 0x47f   : > { %v970_v19 = vrot.slane %v968_v23, 1 }
 0x481   : > { %1005 = vmatmul.mubr.bf16.vlgmr.msra.gmra.mrb[12].mxu0 %v970_v19  ;;  %1046 = vmatmul.mubr.bf16.vlgmr.msra.gmra.mrb[12].mxu1 %v970_v19 }
 0x482   : > { %1105 = vmatpush1.bf16.msra.mxu0 %v4273_v34  ;;  %1146 = vmatpush1.bf16.msra.mxu1 %v4286_v42 }
 0x483   : > { %1106 = vmatprep.subr.bf16.mxu0 %v4277_v35  ;;  %1147 = vmatprep.subr.bf16.mxu1 %v4290_v43 }
 0x484   : > { %1136 = vmatprep.mubr.bf16.mxu0 %v5485_v37  ;;  %1177 = vmatprep.mubr.bf16.mxu1 %v5485_v37 }
 0x486   : > { %1107 = vmatpush1.bf16.msra.mxu0 %v4295_v44  ;;  %1148 = vmatpush1.bf16.msra.mxu1 %v4306_v46 }
 0x487   : > { %1108 = vmatprep.subr.bf16.mxu0 %v4301_v45  ;;  %1149 = vmatprep.subr.bf16.mxu1 %v4311_v47 }
 0x48a   : > { %1109 = vmatpush1.bf16.msra.mxu0 %v4317_v49  ;;  %1150 = vmatpush1.bf16.msra.mxu1 %v4328_v51 }
 0x48b   : > { %1110 = vmatprep.subr.bf16.mxu0 %v4323_v50  ;;  %1151 = vmatprep.subr.bf16.mxu1 %v4333_v52 }
 0x48e   : > { %1111 = vmatpush1.bf16.msra.mxu0 %v4338_v53  ;;  %1152 = vmatpush1.bf16.msra.mxu1 %v4348_v55 }
 0x48f   : > { %1112 = vmatprep.subr.bf16.mxu0 %v4343_v54  ;;  %1153 = vmatprep.subr.bf16.mxu1 %v4353_v56 }
 0x492   : > { %1113 = vmatpush1.bf16.msra.mxu0 %v4358_v57  ;;  %1154 = vmatpush1.bf16.msra.mxu1 %v4368_v59 }
 0x493   : > { %1114 = vmatprep.subr.bf16.mxu0 %v4363_v58  ;;  %1155 = vmatprep.subr.bf16.mxu1 %v4373_v60 }
 0x496   : > { %1115 = vmatpush1.bf16.msra.mxu0 %v4378_v61  ;;  %1156 = vmatpush1.bf16.msra.mxu1 %v4388_v40 }
 0x497   : > { %1116 = vmatprep.subr.bf16.mxu0 %v4383_v41  ;;  %1157 = vmatprep.subr.bf16.mxu1 %v4393_v39 }
 0x49a   : > { %1117 = vmatpush1.bf16.msra.mxu0 %v4398_v0  ;;  %1158 = vmatpush1.bf16.msra.mxu1 %v4408_v1 }
 0x49b   : > { %1118 = vmatprep.subr.bf16.mxu0 %v4403_v48  ;;  %1159 = vmatprep.subr.bf16.mxu1 %v4413_v63 }
 0x49e   : > { %1119 = vmatpush1.bf16.msra.mxu0 %v4418_v3  ;;  %1160 = vmatpush1.bf16.msra.mxu1 %v4424_v4 }
 0x49f   : > { %1234 = vmatprep.subr.bf16.mxu0 %v4269_v33  ;;  %1275 = vmatprep.subr.bf16.mxu1 %v4281_v38 }
 0x554   : > { %v1006_v22 = vpop.f32.mrb[12].mxu0  ;;  %v1047_v13 = vpop.f32.mrb[12].mxu1 }
 0x555   : > { %v1058_v15 = vrot.slane %v1006_v22, 5  ;;  %v1008_v16 = vpop.f32.mrb[13].mxu0  ;;  %v1049_v14 = vpop.f32.mrb[13].mxu1  ;;  %v1060_v25 = vrot.slane %v1047_v13, 5  ;;  %v1090_v13 = vrot.slane %v4572_v24, 7 }
 0x556   : > { %v1059_v10 = vrot.slane %v1008_v16, 5  ;;  %v1010_v62 = vpop.f32.mrb[14].mxu0  ;;  %v1051_v9 = vpop.f32.mrb[14].mxu1  ;;  %v1061_v6 = vrot.slane %v1049_v14, 5 }
 0x557   : > { %v1066_v11 = vadd.f32 %v1058_v15, %v4472_v2  ;;  %v1011_v7 = vpop.f32.mrb[15].mxu0  ;;  %v1052_v8 = vpop.f32.mrb[15].mxu1  ;;  %v1068_v23 = vadd.f32 %v1060_v25, %v4480_v17 }
 0x558   : > { %v1067_v18 = vadd.f32 %v1059_v10, %v4475_v5  ;;  %v1069_v19 = vadd.f32 %v1061_v6, %v4484_v20 }
 0x559   : > { %v3355_v12 = vmul.f32 -1.442695, %v1066_v11  ;;  %v3357_v22 = vmul.f32 -1.442695, %v1068_v23 }
 0x55a   : > { %v3356_v21 = vmul.f32 -1.442695, %v1067_v18 }
 0x55b   : > { %3625 = vpow2.f32 %v3355_v12 }
 0x55c   : > { %3627 = vpow2.f32 %v3356_v21 }
 0x55d   : > { %3629 = vtanh.f32 %v1069_v19 }
 0x55e   : > { %3631 = vpow2.f32 %v3357_v22 }
 0x565   : > { %v3626_v16 = vpop.eup %3625 }
 0x566   : > { %v1079_v62 = vadd.f32 1.0, %v3626_v16  ;;  %v3628_v9 = vpop.eup %3627 }
 0x567   : > { %v1080_v15 = vadd.f32 1.0, %v3628_v9  ;;  %v3630_v10 = vpop.eup %3629 }
 0x568   : > { %3633 = vrcp.f32 %v1079_v62  ;;  %v3632_v11 = vpop.eup %3631 }
 0x569   : > { %3635 = vrcp.f32 %v1080_v15  ;;  %v1081_v18 = vadd.f32 1.0, %v3632_v11 }
 0x56b   : > { %3637 = vrcp.f32 %v1081_v18 }
 0x572   : > { %v3634_v7 = vpop.eup %3633 }
 0x573   : > { %v1093_v8 = vmul.f32 %v3634_v7, %v3630_v10  ;;  %v3636_v14 = vpop.eup %3635 }
 0x574   : > { %v1092_v12 = vmul.f32 %v3636_v14, %v1090_v13 }
 0x575   : > { %v3638_v25 = vpop.eup %3637 }
 0x576   : > { %v4614_v21 = vadd.f32 %v1093_v8, %v1092_v12 }
 0x578   : > { %3639 = vtanh.f32 %v4614_v21 }
 0x582   : > { %v3640_v6 = vpop.eup %3639 }
 0x583   : > { %v1096_v23 = vmul.f32 %v3640_v6, %v3638_v25 }
 0x585   : > { %1097 = vst [vmem:[#allocation3] sm:$0x8] %v1096_v23  ;;  %v1098_v19 = vpack.c.bf16 %v1096_v23, %v1096_v23 }
 0x587   : > { %v1100_v22 = vshrl.u32 %v1098_v19, 16 }
 0x589   : > { %v1102_v16 = vrot.slane %v1100_v22, 1 }
 0x58b   : > { %1137 = vmatmul.mubr.bf16.vlgmr.msra.gmra.mrb[16].mxu0 %v1102_v16  ;;  %1178 = vmatmul.mubr.bf16.vlgmr.msra.gmra.mrb[16].mxu1 %v1102_v16 }
 0x58c   : > { %1235 = vmatpush1.bf16.msra.mxu0 %v4273_v34  ;;  %1276 = vmatpush1.bf16.msra.mxu1 %v4286_v42 }
 0x58d   : > { %1236 = vmatprep.subr.bf16.mxu0 %v4277_v35  ;;  %1277 = vmatprep.subr.bf16.mxu1 %v4290_v43 }
 0x58e   : > { %1266 = vmatprep.mubr.bf16.mxu0 %v5485_v37  ;;  %1307 = vmatprep.mubr.bf16.mxu1 %v5485_v37 }
 0x590   : > { %1237 = vmatpush1.bf16.msra.mxu0 %v4295_v44  ;;  %1278 = vmatpush1.bf16.msra.mxu1 %v4306_v46 }
 0x591   : > { %1238 = vmatprep.subr.bf16.mxu0 %v4301_v45  ;;  %1279 = vmatprep.subr.bf16.mxu1 %v4311_v47 }
 0x594   : > { %1239 = vmatpush1.bf16.msra.mxu0 %v4317_v49  ;;  %1280 = vmatpush1.bf16.msra.mxu1 %v4328_v51 }
 0x595   : > { %1240 = vmatprep.subr.bf16.mxu0 %v4323_v50  ;;  %1281 = vmatprep.subr.bf16.mxu1 %v4333_v52 }
 0x598   : > { %1241 = vmatpush1.bf16.msra.mxu0 %v4338_v53  ;;  %1282 = vmatpush1.bf16.msra.mxu1 %v4348_v55 }
 0x599   : > { %1242 = vmatprep.subr.bf16.mxu0 %v4343_v54  ;;  %1283 = vmatprep.subr.bf16.mxu1 %v4353_v56 }
 0x59c   : > { %1243 = vmatpush1.bf16.msra.mxu0 %v4358_v57  ;;  %1284 = vmatpush1.bf16.msra.mxu1 %v4368_v59 }
 0x59d   : > { %1244 = vmatprep.subr.bf16.mxu0 %v4363_v58  ;;  %1285 = vmatprep.subr.bf16.mxu1 %v4373_v60 }
 0x5a0   : > { %1245 = vmatpush1.bf16.msra.mxu0 %v4378_v61  ;;  %1286 = vmatpush1.bf16.msra.mxu1 %v4388_v40 }
 0x5a1   : > { %1246 = vmatprep.subr.bf16.mxu0 %v4383_v41  ;;  %1287 = vmatprep.subr.bf16.mxu1 %v4393_v39 }
 0x5a4   : > { %1247 = vmatpush1.bf16.msra.mxu0 %v4398_v0  ;;  %1288 = vmatpush1.bf16.msra.mxu1 %v4408_v1 }
 0x5a5   : > { %1248 = vmatprep.subr.bf16.mxu0 %v4403_v48  ;;  %1289 = vmatprep.subr.bf16.mxu1 %v4413_v63 }
 0x5a8   : > { %1249 = vmatpush1.bf16.msra.mxu0 %v4418_v3  ;;  %1290 = vmatpush1.bf16.msra.mxu1 %v4424_v4 }
 0x5a9   : > { %1366 = vmatprep.subr.bf16.mxu0 %v4269_v33  ;;  %1407 = vmatprep.subr.bf16.mxu1 %v4281_v38 }
 0x65e   : > { %v1138_v24 = vpop.f32.mrb[16].mxu0  ;;  %v1179_v62 = vpop.f32.mrb[16].mxu1 }
 0x65f   : > { %v1190_v9 = vrot.slane %v1138_v24, 4  ;;  %v1140_v15 = vpop.f32.mrb[17].mxu0  ;;  %v1181_v10 = vpop.f32.mrb[17].mxu1  ;;  %v1192_v23 = vrot.slane %v1179_v62, 4  ;;  %v1222_v62 = vrot.slane %v4614_v21, 7 }
 0x660   : > { %v1191_v11 = vrot.slane %v1140_v15, 4  ;;  %v1142_v7 = vpop.f32.mrb[18].mxu0  ;;  %v1183_v13 = vpop.f32.mrb[18].mxu1  ;;  %v1193_v19 = vrot.slane %v1181_v10, 4 }
 0x661   : > { %v1198_v8 = vadd.f32 %v1190_v9, %v4472_v2  ;;  %v1143_v14 = vpop.f32.mrb[19].mxu0  ;;  %v1184_v18 = vpop.f32.mrb[19].mxu1  ;;  %v1200_v22 = vadd.f32 %v1192_v23, %v4480_v17 }
 0x662   : > { %v1199_v12 = vadd.f32 %v1191_v11, %v4475_v5  ;;  %v1201_v16 = vadd.f32 %v1193_v19, %v4484_v20 }
 0x663   : > { %v3358_v25 = vmul.f32 -1.442695, %v1198_v8  ;;  %v3360_v24 = vmul.f32 -1.442695, %v1200_v22 }
 0x664   : > { %v3359_v6 = vmul.f32 -1.442695, %v1199_v12 }
 0x665   : > { %3641 = vpow2.f32 %v3358_v25 }
 0x666   : > { %3643 = vpow2.f32 %v3359_v6 }
 0x667   : > { %3645 = vtanh.f32 %v1201_v16 }
 0x668   : > { %3647 = vpow2.f32 %v3360_v24 }
 0x66f   : > { %v3642_v15 = vpop.eup %3641 }
 0x670   : > { %v1211_v7 = vadd.f32 1.0, %v3642_v15  ;;  %v3644_v13 = vpop.eup %3643 }
 0x671   : > { %v1212_v9 = vadd.f32 1.0, %v3644_v13  ;;  %v3646_v11 = vpop.eup %3645 }
 0x672   : > { %3649 = vrcp.f32 %v1211_v7  ;;  %v3648_v8 = vpop.eup %3647 }
 0x673   : > { %3651 = vrcp.f32 %v1212_v9  ;;  %v1213_v12 = vadd.f32 1.0, %v3648_v8 }
 0x675   : > { %3653 = vrcp.f32 %v1213_v12 }
 0x67c   : > { %v3650_v14 = vpop.eup %3649 }
 0x67d   : > { %v1225_v18 = vmul.f32 %v3650_v14, %v3646_v11  ;;  %v3652_v10 = vpop.eup %3651 }
 0x67e   : > { %v1224_v25 = vmul.f32 %v3652_v10, %v1222_v62 }
 0x67f   : > { %v3654_v23 = vpop.eup %3653 }
 0x680   : > { %v4656_v6 = vadd.f32 %v1225_v18, %v1224_v25 }
 0x682   : > { %3655 = vtanh.f32 %v4656_v6 }
 0x68c   : > { %v3656_v19 = vpop.eup %3655 }
 0x68d   : > { %v1228_v22 = vmul.f32 %v3656_v19, %v3654_v23 }
 0x68f   : > { %1229 = vst [vmem:[#allocation3] sm:$0x10] %v1228_v22  ;;  %v1230_v16 = vpack.c.bf16 %v1228_v22, %v1228_v22 }
 0x691   : > { %v1232_v24 = vrot.slane %v1230_v16, 2 }
 0x693   : > { %1267 = vmatmul.mubr.bf16.vlgmr.msra.gmra.mrb[20].mxu0 %v1232_v24  ;;  %1308 = vmatmul.mubr.bf16.vlgmr.msra.gmra.mrb[20].mxu1 %v1232_v24 }
 0x694   : > { %1367 = vmatpush1.bf16.msra.mxu0 %v4273_v34  ;;  %1408 = vmatpush1.bf16.msra.mxu1 %v4286_v42 }
 0x695   : > { %1368 = vmatprep.subr.bf16.mxu0 %v4277_v35  ;;  %1409 = vmatprep.subr.bf16.mxu1 %v4290_v43 }
 0x696   : > { %1398 = vmatprep.mubr.bf16.mxu0 %v5485_v37  ;;  %1439 = vmatprep.mubr.bf16.mxu1 %v5485_v37 }
 0x698   : > { %1369 = vmatpush1.bf16.msra.mxu0 %v4295_v44  ;;  %1410 = vmatpush1.bf16.msra.mxu1 %v4306_v46 }
 0x699   : > { %1370 = vmatprep.subr.bf16.mxu0 %v4301_v45  ;;  %1411 = vmatprep.subr.bf16.mxu1 %v4311_v47 }
 0x69c   : > { %1371 = vmatpush1.bf16.msra.mxu0 %v4317_v49  ;;  %1412 = vmatpush1.bf16.msra.mxu1 %v4328_v51 }
 0x69d   : > { %1372 = vmatprep.subr.bf16.mxu0 %v4323_v50  ;;  %1413 = vmatprep.subr.bf16.mxu1 %v4333_v52 }
 0x6a0   : > { %1373 = vmatpush1.bf16.msra.mxu0 %v4338_v53  ;;  %1414 = vmatpush1.bf16.msra.mxu1 %v4348_v55 }
 0x6a1   : > { %1374 = vmatprep.subr.bf16.mxu0 %v4343_v54  ;;  %1415 = vmatprep.subr.bf16.mxu1 %v4353_v56 }
 0x6a4   : > { %1375 = vmatpush1.bf16.msra.mxu0 %v4358_v57  ;;  %1416 = vmatpush1.bf16.msra.mxu1 %v4368_v59 }
 0x6a5   : > { %1376 = vmatprep.subr.bf16.mxu0 %v4363_v58  ;;  %1417 = vmatprep.subr.bf16.mxu1 %v4373_v60 }
 0x6a8   : > { %1377 = vmatpush1.bf16.msra.mxu0 %v4378_v61  ;;  %1418 = vmatpush1.bf16.msra.mxu1 %v4388_v40 }
 0x6a9   : > { %1378 = vmatprep.subr.bf16.mxu0 %v4383_v41  ;;  %1419 = vmatprep.subr.bf16.mxu1 %v4393_v39 }
 0x6ac   : > { %1379 = vmatpush1.bf16.msra.mxu0 %v4398_v0  ;;  %1420 = vmatpush1.bf16.msra.mxu1 %v4408_v1 }
 0x6ad   : > { %1380 = vmatprep.subr.bf16.mxu0 %v4403_v48  ;;  %1421 = vmatprep.subr.bf16.mxu1 %v4413_v63 }
 0x6b0   : > { %1381 = vmatpush1.bf16.msra.mxu0 %v4418_v3  ;;  %1422 = vmatpush1.bf16.msra.mxu1 %v4424_v4 }
 0x6b1   : > { %1496 = vmatprep.subr.bf16.mxu0 %v4269_v33  ;;  %1537 = vmatprep.subr.bf16.mxu1 %v4281_v38 }
 0x766   : > { %v1268_v21 = vpop.f32.mrb[20].mxu0  ;;  %v1309_v15 = vpop.f32.mrb[20].mxu1 }
 0x767   : > { %v1320_v7 = vrot.slane %v1268_v21, 3  ;;  %v1270_v13 = vpop.f32.mrb[21].mxu0  ;;  %v1311_v9 = vpop.f32.mrb[21].mxu1  ;;  %v1322_v33 = vrot.slane %v1309_v15, 3  ;;  %v1352_v15 = vrot.slane %v4656_v6, 7 }
 0x768   : > { %v1321_v11 = vrot.slane %v1270_v13, 3  ;;  %v1272_v8 = vpop.f32.mrb[22].mxu0  ;;  %v1313_v14 = vpop.f32.mrb[22].mxu1  ;;  %v1323_v38 = vrot.slane %v1311_v9, 3 }
 0x769   : > { %v1328_v62 = vadd.f32 %v1320_v7, %v4472_v2  ;;  %v1273_v18 = vpop.f32.mrb[23].mxu0  ;;  %v1314_v10 = vpop.f32.mrb[23].mxu1  ;;  %v1330_v19 = vadd.f32 %v1322_v33, %v4480_v17 }
 0x76a   : > { %v1329_v12 = vadd.f32 %v1321_v11, %v4475_v5  ;;  %v1331_v22 = vadd.f32 %v1323_v38, %v4484_v20 }
 0x76b   : > { %v3361_v25 = vmul.f32 -1.442695, %v1328_v62  ;;  %v3363_v16 = vmul.f32 -1.442695, %v1330_v19 }
 0x76c   : > { %v3362_v23 = vmul.f32 -1.442695, %v1329_v12 }
 0x76d   : > { %3657 = vpow2.f32 %v3361_v25 }
 0x76e   : > { %3659 = vpow2.f32 %v3362_v23 }
 0x76f   : > { %3661 = vtanh.f32 %v1331_v22 }
 0x770   : > { %3663 = vpow2.f32 %v3363_v16 }
 0x777   : > { %v3658_v24 = vpop.eup %3657 }
 0x778   : > { %v1341_v21 = vadd.f32 1.0, %v3658_v24  ;;  %v3660_v13 = vpop.eup %3659 }
 0x779   : > { %v1342_v7 = vadd.f32 1.0, %v3660_v13  ;;  %v3662_v11 = vpop.eup %3661 }
 0x77a   : > { %3665 = vrcp.f32 %v1341_v21  ;;  %v3664_v8 = vpop.eup %3663 }
 0x77b   : > { %3667 = vrcp.f32 %v1342_v7  ;;  %v1343_v18 = vadd.f32 1.0, %v3664_v8 }
 0x77d   : > { %3669 = vrcp.f32 %v1343_v18 }
 0x784   : > { %v3666_v14 = vpop.eup %3665 }
 0x785   : > { %v1355_v62 = vmul.f32 %v3666_v14, %v3662_v11  ;;  %v3668_v9 = vpop.eup %3667 }
 0x786   : > { %v1354_v10 = vmul.f32 %v3668_v9, %v1352_v15 }
 0x787   : > { %v3670_v25 = vpop.eup %3669 }
 0x788   : > { %v4698_v12 = vadd.f32 %v1355_v62, %v1354_v10  ;;  %v3705_v62 = vld [vmem:[%s4469_s16] sm:$0xff] }
 0x78a   : > { %3671 = vtanh.f32 %v4698_v12 }
 0x794   : > { %v3672_v23 = vpop.eup %3671 }
 0x795   : > { %v1358_v33 = vmul.f32 %v3672_v23, %v3670_v25 }
 0x797   : > { %1359 = vst [vmem:[#allocation3] sm:$0x20] %v1358_v33  ;;  %v1360_v38 = vpack.c.bf16 %v1358_v33, %v1358_v33 }
 0x799   : > { %v1362_v19 = vshrl.u32 %v1360_v38, 16 }
 0x79b   : > { %v1364_v22 = vrot.slane %v1362_v19, 2 }
 0x79d   : > { %1399 = vmatmul.mubr.bf16.vlgmr.msra.gmra.mrb[24].mxu0 %v1364_v22  ;;  %1440 = vmatmul.mubr.bf16.vlgmr.msra.gmra.mrb[24].mxu1 %v1364_v22  ;;  %v3707_v22 = vld [vmem:[%s4469_s16 + $0x10] sm:$0xff] }
 0x79e   : > { %1497 = vmatpush1.bf16.msra.mxu0 %v4273_v34  ;;  %1538 = vmatpush1.bf16.msra.mxu1 %v4286_v42 }
 0x79f   : > { %1498 = vmatprep.subr.bf16.mxu0 %v4277_v35  ;;  %1539 = vmatprep.subr.bf16.mxu1 %v4290_v43 }
 0x7a0   : > { %1528 = vmatprep.mubr.bf16.mxu0 %v5485_v37  ;;  %1569 = vmatprep.mubr.bf16.mxu1 %v5485_v37 }
 0x7a2   : > { %1499 = vmatpush1.bf16.msra.mxu0 %v4295_v44  ;;  %1540 = vmatpush1.bf16.msra.mxu1 %v4306_v46 }
 0x7a3   : > { %1500 = vmatprep.subr.bf16.mxu0 %v4301_v45  ;;  %1541 = vmatprep.subr.bf16.mxu1 %v4311_v47 }
 0x7a6   : > { %1501 = vmatpush1.bf16.msra.mxu0 %v4317_v49  ;;  %1542 = vmatpush1.bf16.msra.mxu1 %v4328_v51 }
 0x7a7   : > { %1502 = vmatprep.subr.bf16.mxu0 %v4323_v50  ;;  %1543 = vmatprep.subr.bf16.mxu1 %v4333_v52 }
 0x7aa   : > { %1503 = vmatpush1.bf16.msra.mxu0 %v4338_v53  ;;  %1544 = vmatpush1.bf16.msra.mxu1 %v4348_v55 }
 0x7ab   : > { %1504 = vmatprep.subr.bf16.mxu0 %v4343_v54  ;;  %1545 = vmatprep.subr.bf16.mxu1 %v4353_v56 }
 0x7ae   : > { %1505 = vmatpush1.bf16.msra.mxu0 %v4358_v57  ;;  %1546 = vmatpush1.bf16.msra.mxu1 %v4368_v59  ;;  %v1484_v59 = vrot.slane %v4698_v12, 7  ;;  %v3706_v12 = vld [vmem:[%s4469_s16 + $0x8] sm:$0xff] }
 0x7af   : > { %1506 = vmatprep.subr.bf16.mxu0 %v4363_v58  ;;  %1547 = vmatprep.subr.bf16.mxu1 %v4373_v60 }
 0x7b2   : > { %1507 = vmatpush1.bf16.msra.mxu0 %v4378_v61  ;;  %1548 = vmatpush1.bf16.msra.mxu1 %v4388_v40 }
 0x7b3   : > { %1508 = vmatprep.subr.bf16.mxu0 %v4383_v41  ;;  %1549 = vmatprep.subr.bf16.mxu1 %v4393_v39 }
 0x7b6   : > { %1509 = vmatpush1.bf16.msra.mxu0 %v4398_v0  ;;  %1550 = vmatpush1.bf16.msra.mxu1 %v4408_v1 }
 0x7b7   : > { %1510 = vmatprep.subr.bf16.mxu0 %v4403_v48  ;;  %1551 = vmatprep.subr.bf16.mxu1 %v4413_v63 }
 0x7ba   : > { %1511 = vmatpush1.bf16.msra.mxu0 %v4418_v3  ;;  %1552 = vmatpush1.bf16.msra.mxu1 %v4424_v4 }
 0x870   : > { %v1400_v34 = vpop.f32.mrb[24].mxu0  ;;  %v1441_v35 = vpop.f32.mrb[24].mxu1 }
 0x871   : > { %v1452_v42 = vrot.slane %v1400_v34, 2  ;;  %v1402_v40 = vpop.f32.mrb[25].mxu0  ;;  %v1443_v43 = vpop.f32.mrb[25].mxu1  ;;  %v1454_v3 = vrot.slane %v1441_v35, 2  ;;  %v3708_v35 = vld [vmem:[%s4469_s16 + $0x18] sm:$0xff] }
 0x872   : > { %v1453_v41 = vrot.slane %v1402_v40, 2  ;;  %v1404_v44 = vpop.f32.mrb[26].mxu0  ;;  %v1445_v39 = vpop.f32.mrb[26].mxu1  ;;  %v1455_v4 = vrot.slane %v1443_v43, 2 }
 0x873   : > { %v1460_v0 = vadd.f32 %v1452_v42, %v4472_v2  ;;  %v1405_v45 = vpop.f32.mrb[27].mxu0  ;;  %v1446_v1 = vpop.f32.mrb[27].mxu1  ;;  %v1462_v49 = vadd.f32 %v1454_v3, %v4480_v17 }
 0x874   : > { %v1461_v46 = vadd.f32 %v1453_v41, %v4475_v5  ;;  %v1463_v50 = vadd.f32 %v1455_v4, %v4484_v20 }
 0x875   : > { %v3364_v47 = vmul.f32 -1.442695, %v1460_v0  ;;  %v3366_v51 = vmul.f32 -1.442695, %v1462_v49 }
 0x876   : > { %v3365_v48 = vmul.f32 -1.442695, %v1461_v46 }
 0x877   : > { %3673 = vpow2.f32 %v3364_v47 }
 0x878   : > { %3675 = vpow2.f32 %v3365_v48 }
 0x879   : > { %3677 = vtanh.f32 %v1463_v50 }
 0x87a   : > { %3679 = vpow2.f32 %v3366_v51 }
 0x881   : > { %v3674_v52 = vpop.eup %3673 }
 0x882   : > { %v1473_v53 = vadd.f32 1.0, %v3674_v52  ;;  %v3676_v54 = vpop.eup %3675 }
 0x883   : > { %v1474_v55 = vadd.f32 1.0, %v3676_v54  ;;  %v3678_v56 = vpop.eup %3677 }
 0x884   : > { %3681 = vrcp.f32 %v1473_v53  ;;  %v3680_v57 = vpop.eup %3679 }
 0x885   : > { %3683 = vrcp.f32 %v1474_v55  ;;  %v1475_v63 = vadd.f32 1.0, %v3680_v57  ;;  %v4750_v55 = vld [vmem:[#allocation9 + $0x100] sm:$0xff] (%p414_p10)  ;;  %v4754_v57 = vld [vmem:[#allocation9 + $0x108] sm:$0xff] (%p414_p10) }
 0x887   : > { %3685 = vrcp.f32 %v1475_v63 }
 0x88e   : > { %v3682_v58 = vpop.eup %3681 }
 0x88f   : > { %v1487_v60 = vmul.f32 %v3682_v58, %v3678_v56  ;;  %v3684_v61 = vpop.eup %3683  ;;  %v5488_v56 = vmov (%p414_p10), 0   ;;  %v4756_v58 = vld [vmem:[#allocation9 + $0x110] sm:$0xff] (%p414_p10) }
 0x890   : > { %v1486_v17 = vmul.f32 %v3684_v61, %v1484_v59  ;;  %v4758_v59 = vld [vmem:[#allocation9 + $0x118] sm:$0xff] (%p414_p10)  ;;  %v4762_v61 = vld [vmem:[#allocation9 + $0x128] sm:$0xff] (%p414_p10) }
 0x891   : > { %v3686_v20 = vpop.eup %3685 }
 0x892   : > { %v1488_v37 = vadd.f32 %v1487_v60, %v1486_v17  ;;  %v4760_v60 = vld [vmem:[#allocation9 + $0x120] sm:$0xff] (%p414_p10)  ;;  %v4780_v17 = vld [vmem:[#allocation9 + $0x170] sm:$0xff] (%p414_p10) }
 0x893   :  { %5496 = vst [vmem:[#allocation25_spill] sm:$0xff] (%p414_p10), %v4780_v17 }
 0x894   : > { %3687 = vtanh.f32 %v1488_v37  ;;  %v1614_v46 = vrot.slane %v1488_v37, 7  ;;  %v4782_v37 = vld [vmem:[#allocation9 + $0x178] sm:$0xff] (%p414_p10) }
 0x895   :  { %5497 = vst [vmem:[#allocation26_spill] sm:$0xff] (%p414_p10), %v4782_v37 }
 0x89e   : > { %v3688_v2 = vpop.eup %3687 }
 0x89f   : > { %v1490_v5 = vmul.f32 %v3688_v2, %v3686_v20  ;;  %v4784_v20 = vld [vmem:[#allocation9 + $0x180] sm:$0xff] (%p414_p10)  ;;  %v4786_v2 = vld [vmem:[#allocation9 + $0x188] sm:$0xff] (%p414_p10) }
 0x8a0   :  { %5498 = vst [vmem:[#allocation27_spill] sm:$0xff] (%p414_p10), %v4784_v20  ;;  %5499 = vst [vmem:[#allocation28_spill] sm:$0xff] (%p414_p10), %v4786_v2 }
 0x8a1   : > { %1491 = vst [vmem:[#allocation3] sm:$0x40] %v1490_v5  ;;  %v1492_v6 = vpack.c.bf16 %v1490_v5, %v1490_v5  ;;  %v4788_v5 = vld [vmem:[#allocation9 + $0x190] sm:$0xff] (%p414_p10) }
 0x8a2   :  { %5500 = vst [vmem:[#allocation29_spill] sm:$0xff] (%p414_p10), %v4788_v5 }
 0x8a3   : > { %v1494_v16 = vrot.slane %v1492_v6, 3  ;;  %v4790_v6 = vld [vmem:[#allocation9 + $0x198] sm:$0xff] (%p414_p10) }
 0x8a4   :  { %5501 = vst [vmem:[#allocation30_spill] sm:$0xff] (%p414_p10), %v4790_v6 }
 0x8a5   : > { %1529 = vmatmul.mubr.bf16.vlgmr.msra.gmra.mrb[28].mxu0 %v1494_v16  ;;  %1570 = vmatmul.mubr.bf16.vlgmr.msra.gmra.mrb[28].mxu1 %v1494_v16  ;;  %v4792_v16 = vld [vmem:[#allocation9 + $0x1a0] sm:$0xff] (%p414_p10) }
 0x8a6   :  { %1921 = vmatprep.mubr.bf16.mxu0 (%p414_p10), %v5488_v56  ;;  %1964 = vmatprep.mubr.bf16.mxu1 (%p414_p10), %v5488_v56  ;;  %5502 = vst [vmem:[#allocation31_spill] sm:$0xff] (%p414_p10), %v4792_v16  ;;  %v3755_v56 = vld [vmem:[#allocation7 + $0x1e0] ss:$16 sps:$4 sm:$0xff] (%p414_p10)  }
 0x978   : > { %v1530_v24 = vpop.f32.mrb[28].mxu0  ;;  %v1571_v21 = vpop.f32.mrb[28].mxu1 }
 0x979   : > { %v1582_v13 = vrot.slane %v1530_v24, 1  ;;  %v1532_v7 = vpop.f32.mrb[29].mxu0  ;;  %v1573_v11 = vpop.f32.mrb[29].mxu1  ;;  %v1584_v38 = vrot.slane %v1571_v21, 1  ;;  %v4794_v24 = vld [vmem:[#allocation9 + $0x1a8] sm:$0xff] (%p414_p10)  ;;  %v4796_v21 = vld [vmem:[#allocation9 + $0x1b0] sm:$0xff] (%p414_p10) }
 0x97a   : > { %v1583_v8 = vrot.slane %v1532_v7, 1  ;;  %v1534_v14 = vpop.f32.mrb[30].mxu0  ;;  %v1575_v15 = vpop.f32.mrb[30].mxu1  ;;  %v1585_v19 = vrot.slane %v1573_v11, 1  ;;  %5503 = vst [vmem:[#allocation32_spill] sm:$0xff] (%p414_p10), %v4794_v24  ;;  %5504 = vst [vmem:[#allocation33_spill] sm:$0xff] (%p414_p10), %v4796_v21 }
 0x97b   : > { %v1590_v9 = vadd.f32 %v3705_v62, %v1582_v13  ;;  %v1535_v18 = vpop.f32.mrb[31].mxu0  ;;  %v1576_v10 = vpop.f32.mrb[31].mxu1  ;;  %v1592_v34 = vadd.f32 %v3707_v22, %v1584_v38  ;;  %v4798_v13 = vld [vmem:[#allocation9 + $0x1b8] sm:$0xff] (%p414_p10)  ;;  %v4800_v7 = vld [vmem:[#allocation9 + $0x1c0] sm:$0xff] (%p414_p10)  ;;  %v4802_v11 = vld [vmem:[#allocation9 + $0x1c8] sm:$0xff] (%p414_p10) }
 0x97c   : > { %v1591_v25 = vadd.f32 %v3706_v12, %v1583_v8  ;;  %v1593_v42 = vadd.f32 %v3708_v35, %v1585_v19  ;;  %5505 = vst [vmem:[#allocation34_spill] sm:$0xff] (%p414_p10), %v4798_v13  ;;  %5506 = vst [vmem:[#allocation35_spill] sm:$0xff] (%p414_p10), %v4800_v7  ;;  %v4804_v8 = vld [vmem:[#allocation9 + $0x1d0] sm:$0xff] (%p414_p10)  ;;  %v4806_v14 = vld [vmem:[#allocation9 + $0x1d8] sm:$0xff] (%p414_p10) }
 0x97d   : > { %v3367_v23 = vmul.f32 -1.442695, %v1590_v9  ;;  %v3369_v40 = vmul.f32 -1.442695, %v1592_v34  ;;  %5507 = vst [vmem:[#allocation36_spill] sm:$0xff] (%p414_p10), %v4802_v11  ;;  %5508 = vst [vmem:[#allocation37_spill] sm:$0xff] (%p414_p10), %v4804_v8 }
 0x97e   : > { %v3368_v33 = vmul.f32 -1.442695, %v1591_v25  ;;  %5509 = vst [vmem:[#allocation38_spill] sm:$0xff] (%p414_p10), %v4806_v14  ;;  %v4808_v15 = vld [vmem:[#allocation9 + $0x1e0] sm:$0xff] (%p414_p10)  ;;  %v4812_v9 = vld [vmem:[#allocation9 + $0x1f0] sm:$0xff] (%p414_p10)  ;;  %v4814_v18 = vld [vmem:[#allocation9 + $0x1f8] sm:$0xff] (%p414_p10) }
 0x97f   : > { %3689 = vpow2.f32 %v3367_v23  ;;  %5510 = vst [vmem:[#allocation39_spill] sm:$0xff] (%p414_p10), %v4808_v15  ;;  %5511 = vst [vmem:[#allocation40_spill] sm:$0xff] (%p414_p10), %v4812_v9  ;;  %v3709_v10 = vld [vmem:[#allocation7 + $0x104] ss:$16 sps:$4 sm:$0xff] (%p414_p10)   ;;  %v3711_v12 = vld [vmem:[#allocation7 + $0x10c] ss:$16 sps:$4 sm:$0xff] (%p414_p10)  }
 0x980   : > { %3691 = vpow2.f32 %v3368_v33  ;;  %5512 = vst [vmem:[#allocation41_spill] sm:$0xff] (%p414_p10), %v4814_v18  ;;  %v3713_v25 = vld [vmem:[#allocation7 + $0x100] ss:$16 sps:$4 sm:$0xff] (%p414_p10)   ;;  %1889 = vmatprep.subr.bf16.mxu0 (%p414_p10), %v3709_v10  ;;  %v3714_v23 = vld [vmem:[#allocation7 + $0x108] ss:$16 sps:$4 sm:$0xff] (%p414_p10)   ;;  %1932 = vmatprep.subr.bf16.mxu1 (%p414_p10), %v3711_v12 }
 0x981   : > { %3693 = vtanh.f32 %v1593_v42  ;;  %1890 = vmatpush1.bf16.msra.mxu0 (%p414_p10), %v3713_v25  ;;  %v3715_v33 = vld [vmem:[#allocation7 + $0x124] ss:$16 sps:$4 sm:$0xff] (%p414_p10)   ;;  %1933 = vmatpush1.bf16.msra.mxu1 (%p414_p10), %v3714_v23  ;;  %v3717_v38 = vld [vmem:[#allocation7 + $0x12c] ss:$16 sps:$4 sm:$0xff] (%p414_p10)   ;;  %v3719_v19 = vld [vmem:[#allocation7 + $0x120] ss:$16 sps:$4 sm:$0xff] (%p414_p10)  }
 0x982   : > { %3695 = vpow2.f32 %v3369_v40  ;;  %v3720_v22 = vld [vmem:[#allocation7 + $0x128] ss:$16 sps:$4 sm:$0xff] (%p414_p10)   ;;  %1891 = vmatprep.subr.bf16.mxu0 (%p414_p10), %v3715_v33  ;;  %v3721_v34 = vld [vmem:[#allocation7 + $0x144] ss:$16 sps:$4 sm:$0xff] (%p414_p10)   ;;  %1934 = vmatprep.subr.bf16.mxu1 (%p414_p10), %v3717_v38  ;;  %v3723_v35 = vld [vmem:[#allocation7 + $0x14c] ss:$16 sps:$4 sm:$0xff] (%p414_p10)  }
 0x983   :  { %v3725_v42 = vld [vmem:[#allocation7 + $0x140] ss:$16 sps:$4 sm:$0xff] (%p414_p10)   ;;  %v3726_v40 = vld [vmem:[#allocation7 + $0x148] ss:$16 sps:$4 sm:$0xff] (%p414_p10)   ;;  %v3371_v25 = vld [vmem:[%s5372_s3 + $0x4] sm:$0xf] (%p414_p10) }
 0x984   :  { %v3756_v10 = vld [vmem:[#allocation7 + $0x1e8] ss:$16 sps:$4 sm:$0xff] (%p414_p10)   ;;  %v5513_v23 = vsub.s32 (%p414_p10), 0, %v4237_v36  ;;  %v5514_v38 = vsub.s32 (%p414_p10), 2, %v4237_v36  ;;  %s4831_s3 = smov (%p414_p10), 0  }
 0x985   :  { %1892 = vmatpush1.bf16.msra.mxu0 (%p414_p10), %v3719_v19  ;;  %1935 = vmatpush1.bf16.msra.mxu1 (%p414_p10), %v3720_v22  ;;  %v5515_v22 = vsub.s32 (%p414_p10), 1, %v4237_v36 }
 0x986   :  { %1893 = vmatprep.subr.bf16.mxu0 (%p414_p10), %v3721_v34  ;;  %1936 = vmatprep.subr.bf16.mxu1 (%p414_p10), %v3723_v35  ;;  %v1706_v33 = vrot.slane (%p414_p10), %v3371_v25, %v5513_v23  ;;  %v1714_v19 = vrot.slane (%p414_p10), %v3371_v25, %v5514_v38  ;;  %v5516_v35 = vsub.s32 (%p414_p10), 3, %v4237_v36 }
 0x987   :  { %v1710_v34 = vrot.slane (%p414_p10), %v3371_v25, %v5515_v22 }
 0x989   : > { %v3690_v43 = vpop.eup %3689  ;;  %1894 = vmatpush1.bf16.msra.mxu0 (%p414_p10), %v3725_v42  ;;  %1937 = vmatpush1.bf16.msra.mxu1 (%p414_p10), %v3726_v40  ;;  %v1718_v42 = vrot.slane (%p414_p10), %v3371_v25, %v5516_v35 }
 0x98a   : > { %v1603_v41 = vadd.f32 1.0, %v3690_v43  ;;  %v3692_v44 = vpop.eup %3691  ;;  %v3727_v43 = vld [vmem:[#allocation7 + $0x164] ss:$16 sps:$4 sm:$0xff] (%p414_p10)  }
 0x98b   : > { %v1604_v39 = vadd.f32 1.0, %v3692_v44  ;;  %v3694_v0 = vpop.eup %3693  ;;  %v3731_v44 = vld [vmem:[#allocation7 + $0x160] ss:$16 sps:$4 sm:$0xff] (%p414_p10)   ;;  %1895 = vmatprep.subr.bf16.mxu0 (%p414_p10), %v3727_v43 }
 0x98c   : > { %3697 = vrcp.f32 %v1603_v41  ;;  %v3696_v45 = vpop.eup %3695  ;;  %v3729_v41 = vld [vmem:[#allocation7 + $0x16c] ss:$16 sps:$4 sm:$0xff] (%p414_p10)  }
 0x98d   : > { %3699 = vrcp.f32 %v1604_v39  ;;  %v1605_v3 = vadd.f32 1.0, %v3696_v45  ;;  %v3732_v39 = vld [vmem:[#allocation7 + $0x168] ss:$16 sps:$4 sm:$0xff] (%p414_p10)   ;;  %1938 = vmatprep.subr.bf16.mxu1 (%p414_p10), %v3729_v41  ;;  %v3735_v45 = vld [vmem:[#allocation7 + $0x18c] ss:$16 sps:$4 sm:$0xff] (%p414_p10)   ;;  %1896 = vmatpush1.bf16.msra.mxu0 (%p414_p10), %v3731_v44 }
 0x98e   :  { %1939 = vmatpush1.bf16.msra.mxu1 (%p414_p10), %v3732_v39 }
 0x98f   : > { %3701 = vrcp.f32 %v1605_v3  ;;  %1940 = vmatprep.subr.bf16.mxu1 (%p414_p10), %v3735_v45  ;;  %v3743_v3 = vld [vmem:[#allocation7 + $0x1a0] ss:$16 sps:$4 sm:$0xff] (%p414_p10)  }
 0x996   : > { %v3698_v1 = vpop.eup %3697 }
 0x997   : > { %v1617_v47 = vmul.f32 %v3698_v1, %v3694_v0  ;;  %v3700_v48 = vpop.eup %3699  ;;  %v3733_v0 = vld [vmem:[#allocation7 + $0x184] ss:$16 sps:$4 sm:$0xff] (%p414_p10)   ;;  %v3737_v1 = vld [vmem:[#allocation7 + $0x180] ss:$16 sps:$4 sm:$0xff] (%p414_p10)  }
 0x998   : > { %v1616_v4 = vmul.f32 %v3700_v48, %v1614_v46  ;;  %v3738_v46 = vld [vmem:[#allocation7 + $0x188] ss:$16 sps:$4 sm:$0xff] (%p414_p10)   ;;  %1897 = vmatprep.subr.bf16.mxu0 (%p414_p10), %v3733_v0  ;;  %v3741_v48 = vld [vmem:[#allocation7 + $0x1ac] ss:$16 sps:$4 sm:$0xff] (%p414_p10)  }
 0x999   : > { %v3702_v50 = vpop.eup %3701  ;;  %1898 = vmatpush1.bf16.msra.mxu0 (%p414_p10), %v3737_v1  ;;  %1941 = vmatpush1.bf16.msra.mxu1 (%p414_p10), %v3738_v46 }
 0x99a   : > { %v1618_v49 = vadd.f32 %v1617_v47, %v1616_v4   ;;  %v3739_v47 = vld [vmem:[#allocation7 + $0x1a4] ss:$16 sps:$4 sm:$0xff] (%p414_p10)   ;;  %v3744_v4 = vld [vmem:[#allocation7 + $0x1a8] ss:$16 sps:$4 sm:$0xff] (%p414_p10)   ;;  %1942 = vmatprep.subr.bf16.mxu1 (%p414_p10), %v3741_v48 }
 0x99b   :  { %1899 = vmatprep.subr.bf16.mxu0 (%p414_p10), %v3739_v47 }
 0x99c   : > { %3703 = vtanh.f32 %v1618_v49  ;;  %v5486_v62 = vmov %v1618_v49  ;;  %1631 = vst [vmem:[#allocation13 - $0x7] sm:$0x80] (%p414_p10), %v1618_v49  ;;  %v3745_v49 = vld [vmem:[#allocation7 + $0x1c4] ss:$16 sps:$4 sm:$0xff] (%p414_p10)  }
 0x99d   :  { %v4810_v62 = vld [vmem:[#allocation9 + $0x1e8] sm:$0xff] (%p414_p10)  ;;  %1900 = vmatpush1.bf16.msra.mxu0 (%p414_p10), %v3743_v3  ;;  %1943 = vmatpush1.bf16.msra.mxu1 (%p414_p10), %v3744_v4 }
 0x99e   :  { %1901 = vmatprep.subr.bf16.mxu0 (%p414_p10), %v3745_v49 }
 0x9a6   : > { %v3704_v51 = vpop.eup %3703 }
 0x9a7   : > { %v1620_v52 = vmul.f32 %v3704_v51, %v3702_v50   ;;  %v3747_v50 = vld [vmem:[#allocation7 + $0x1cc] ss:$16 sps:$4 sm:$0xff] (%p414_p10)   ;;  %v3749_v51 = vld [vmem:[#allocation7 + $0x1c0] ss:$16 sps:$4 sm:$0xff] (%p414_p10)  }
 0x9a8   :  { %1944 = vmatprep.subr.bf16.mxu1 (%p414_p10), %v3747_v50  ;;  %1902 = vmatpush1.bf16.msra.mxu0 (%p414_p10), %v3749_v51  ;;  %v4827_v51 = vmov (%p414_p10), 0.0  }
 0x9a9   : > { %1621 = vst [vmem:[#allocation3] sm:$0x80] %v1620_v52  ;;  %v5487_v63 = vmov %v1620_v52  ;;  %1630 = vst [vmem:[#allocation11 - $0x7] sm:$0x80] (%p414_p10), %v1620_v52  ;;  %v3750_v52 = vld [vmem:[#allocation7 + $0x1c8] ss:$16 sps:$4 sm:$0xff] (%p414_p10)  }
 0x9aa   :  { %v4764_v63 = vld [vmem:[#allocation9 + $0x130] sm:$0xff] (%p414_p10)  ;;  %1945 = vmatpush1.bf16.msra.mxu1 (%p414_p10), %v3750_v52  ;;  %v4829_v52 = vmov (%p414_p10), 0.0  }
 0x9ad   :  { %416 = sbr.rel (!%p414_p10) target bundleno = 322 (0x142), region = 85 }
 0x9b0   : > { %v1623_v53 = vld [vmem:[#allocation3] sm:$0xff] }
 0x9b1   : > { %v1624_v54 = vpack.c.bf16 %v1623_v53, %v1623_v53  ;;  %v3751_v53 = vld [vmem:[#allocation7 + $0x1e4] ss:$16 sps:$4 sm:$0xff] (%p414_p10)  }
 0x9b2   :  { %1903 = vmatprep.subr.bf16.mxu0 (%p414_p10), %v3751_v53 }
 0x9b3   : > { %1629 = vst [vmem:[%s1628_s18] sm:$0xf] %v1624_v54  ;;  %v3753_v54 = vld [vmem:[#allocation7 + $0x1ec] ss:$16 sps:$4 sm:$0xff] (%p414_p10)   ;;  %1904 = vmatpush1.bf16.msra.mxu0 (%p414_p10), %v3755_v56 }
 0x9b4   :  { %1946 = vmatprep.subr.bf16.mxu1 %v3753_v54 }
 0x9b5   :  { %1947 = vmatpush1.bf16.msra.mxu1 %v3756_v10 }
 0x9ba   :  { %v3757_v12 = vld [vmem:[#allocation10] sm:$0xff]  }
 0x9bb   :  { %1922 = vmatmul.mubr.bf16.vlgmr.msra.gmra.mrb[0].mxu0 %v3757_v12  ;;  %1965 = vmatmul.mubr.bf16.vlgmr.msra.gmra.mrb[0].mxu1 %v3757_v12 }
 0xa8e   :  { %v1923_v40 = vpop.f32.mrb[0].mxu0  ;;  %v1966_v41 = vpop.f32.mrb[0].mxu1 }
 0xa8f   :  { %v1924_v43 = vadd.f32 %v1923_v40, %v1706_v33  ;;  %v1925_v44 = vpop.f32.mrb[1].mxu0  ;;  %v1967_v39 = vadd.f32 %v1966_v41, %v1714_v19  ;;  %v1968_v45 = vpop.f32.mrb[1].mxu1 }
 0xa90   :  { %v1926_v0 = vadd.f32 %v1925_v44, %v1710_v34  ;;  %v1927_v1 = vpop.f32.mrb[2].mxu0  ;;  %v1969_v46 = vadd.f32 %v1968_v45, %v1718_v42  ;;  %v1970_v48 = vpop.f32.mrb[2].mxu1 }
 0xa91   :  { %1975 = vst [vmem:[#allocation2] sm:$0xff] %v1924_v43  ;;  %v1928_v47 = vadd.f32 %v1927_v1, %v1706_v33  ;;  %v1929_v3 = vpop.f32.mrb[3].mxu0  ;;  %1977 = vst [vmem:[#allocation2 + $0x10] sm:$0xff] %v1967_v39  ;;  %v1971_v4 = vadd.f32 %v1970_v48, %v1714_v19  ;;  %v1972_v50 = vpop.f32.mrb[3].mxu1 }
 0xa92   :  { %1976 = vst [vmem:[#allocation2 + $0x8] sm:$0xff] %v1926_v0  ;;  %v1930_v49 = vadd.f32 %v1929_v3, %v1710_v34  ;;  %1978 = vst [vmem:[#allocation2 + $0x18] sm:$0xff] %v1969_v46  ;;  %v1973_v36 = vadd.f32 %v1972_v50, %v1718_v42 }
 0xa93   :  { %1979 = vst [vmem:[#allocation2 + $0x20] sm:$0xff] %v1928_v47  ;;  %1981 = vst [vmem:[#allocation2 + $0x30] sm:$0xff] %v1971_v4 }
 0xa94   :  { %1980 = vst [vmem:[#allocation2 + $0x28] sm:$0xff] %v1930_v49  ;;  %1982 = vst [vmem:[#allocation2 + $0x38] sm:$0xff] %v1973_v36 }
 0xa95 LB: > { %v5517_v37 = vld [vmem:[#allocation26_spill] sm:$0xff]  ;;  %v5518_v32 = vld [vmem:[#allocation24_spill] sm:$0xff]  ;;  %v5519_v31 = vld [vmem:[#allocation23_spill] sm:$0xff]  ;;  %v4842_v53 = vcombine.high %v4750_v55, %v4756_v58  ;;  %v4846_v54 = vcombine.low %v4750_v55, %v4756_v58  ;;  %v4850_v56 = vcombine.high %v4760_v60, %v4764_v63  ;;  %v4854_v10 = vcombine.high %v4754_v57, %v4758_v59  ;;  %s3405_s22 = sshll.u32 %s4076_s3, 3  ;;  %s1988_s3 = sadd.s32 1, %s4076_s3   ;;  %s4076_s3 = sphi %s4831_s3, %s1988_s3   ;;  %v4072_v52 = vphi %v4829_v52, %v5543_v52   ;;  %v4068_v51 = vphi %v4827_v51, %v5542_v51  }
 0xa96   : > { %v5520_v30 = vld [vmem:[#allocation22_spill] sm:$0xff]  ;;  %v5521_v29 = vld [vmem:[#allocation21_spill] sm:$0xff]  ;;  %v5522_v28 = vld [vmem:[#allocation20_spill] sm:$0xff]  ;;  %v4859_v12 = vcombine.low %v4754_v57, %v4758_v59  ;;  %v4868_v23 = vcombine.low %v4760_v60, %v4764_v63  ;;  %v5409_v22 = vmov 0   ;;  %v4906_v40 = vcombine.high %v5518_v32, %v5517_v37  ;;  %s5039_s23 = sshra.s32 %s3405_s22, 3  ;;  %p1985_p11 = scmp.ge.s32.totalorder %s1988_s3, 2  }
 0xa97   : > { %v5523_v27 = vld [vmem:[#allocation19_spill] sm:$0xff]  ;;  %v5524_v26 = vld [vmem:[#allocation18_spill] sm:$0xff]  ;;  %v5525_v24 = vld [vmem:[#allocation32_spill] sm:$0xff]  ;;  %2167 = vmatprep.subr.bf16.mxu0 %v4842_v53  ;;  %2208 = vmatprep.subr.bf16.mxu1 %v4854_v10  ;;  %v4884_v19 = vcombine.high %v5522_v28, %v5520_v30  ;;  %v4901_v42 = vcombine.low %v5522_v28, %v5520_v30  ;;  %v4921_v44 = vcombine.low %v5518_v32, %v5517_v37  ;;  %s3466_s24 = sshll.u32 %s5039_s23, 5  ;;  %s3464_s26 = sshll.u32 %s5039_s23, 2 }
 0xa98   : > { %v5526_v21 = vld [vmem:[#allocation33_spill] sm:$0xff]  ;;  %v5527_v20 = vld [vmem:[#allocation27_spill] sm:$0xff]  ;;  %v5532_v14 = vld [vmem:[#allocation38_spill] sm:$0xff]  ;;  %v4863_v25 = vcombine.high %v4762_v61, %v5524_v26  ;;  %2168 = vmatpush1.bf16.msra.mxu0 %v4846_v54  ;;  %v4874_v33 = vcombine.high %v5523_v27, %v5521_v29  ;;  %2209 = vmatpush1.bf16.msra.mxu1 %v4859_v12  ;;  %v4879_v38 = vcombine.low %v4762_v61, %v5524_v26  ;;  %s5042_s25 = scalar_lea.vmem [#allocation2], %s3466_s24  ;;  %s3199_s27 = scalar_lea.vmem [#allocation10], %s3464_s26 }
 0xa99   : > { %v5528_v18 = vld [vmem:[#allocation41_spill] sm:$0xff]  ;;  %v5530_v16 = vld [vmem:[#allocation31_spill] sm:$0xff]  ;;  %v5533_v13 = vld [vmem:[#allocation34_spill] sm:$0xff]  ;;  %2169 = vmatprep.subr.bf16.mxu0 %v4850_v56  ;;  %2199 = vmatprep.mubr.bf16.mxu0 %v5409_v22  ;;  %v4890_v34 = vcombine.low %v5523_v27, %v5521_v29  ;;  %v2001_v49 = vpack.c.bf16 %v4072_v52, %v4072_v52  ;;  %s4088_s28 = smov (%p1985_p11), [#allocation11]   ;;  %s4089_s30 = smov (%p1985_p11), [#allocation10]  }
 0xa9a   : > { %v5529_v17 = vld [vmem:[#allocation25_spill] sm:$0xff]  ;;  %v5531_v15 = vld [vmem:[#allocation39_spill] sm:$0xff]  ;;  %v5534_v11 = vld [vmem:[#allocation36_spill] sm:$0xff]  ;;  %2210 = vmatprep.subr.bf16.mxu1 %v4863_v25  ;;  %2240 = vmatprep.mubr.bf16.mxu1 %v5409_v22  ;;  %v4936_v45 = vcombine.high %v5530_v16, %v5526_v21  ;;  %v4946_v46 = vcombine.high %v5525_v24, %v5533_v13  ;;  %v4951_v47 = vcombine.low %v5530_v16, %v5526_v21  ;;  %s3221_s29 = sshll.u32 (%p1985_p11), %s4088_s28, 4  ;;  %s3208_s9 = sshll.u32 (%p1985_p11), %s4089_s30, 4  ;;  %s3222_s29 = int_to_ptr.vmem [resolvable:$true] %s3221_s29  ;;  %s5323_s9 = int_to_ptr.vmem [resolvable:$true] %s3208_s9 }
 0xa9b   : > { %v5535_v9 = vld [vmem:[#allocation40_spill] sm:$0xff]  ;;  %v5536_v8 = vld [vmem:[#allocation37_spill] sm:$0xff]  ;;  %v5537_v7 = vld [vmem:[#allocation35_spill] sm:$0xff]  ;;  %v4896_v35 = vcombine.high %v5519_v31, %v5529_v17  ;;  %v4911_v43 = vcombine.low %v5519_v31, %v5529_v17  ;;  %v4961_v3 = vcombine.low %v5525_v24, %v5533_v13  ;;  %v4966_v4 = vcombine.high %v5534_v11, %v5532_v14  ;;  %s3956_s10 = scalar_lea.vmem (%p1985_p11), %s3222_s29, 32  ;;  %p3961_p13 = scmp.lt.s32.totalorder (%p1985_p11), %s3222_s29, %s3222_s29 }
 0xa9c   : > { %v5538_v6 = vld [vmem:[#allocation30_spill] sm:$0xff]  ;;  %v5539_v5 = vld [vmem:[#allocation29_spill] sm:$0xff]  ;;  %v5540_v2 = vld [vmem:[#allocation28_spill] sm:$0xff]  ;;  %2170 = vmatpush1.bf16.msra.mxu0 %v4868_v23  ;;  %2211 = vmatpush1.bf16.msra.mxu1 %v4879_v38  ;;  %v4956_v48 = vcombine.high %v5537_v7, %v5536_v8  ;;  %v4971_v50 = vcombine.low %v5537_v7, %v5536_v8  ;;  %v4976_v36 = vcombine.high %v5531_v15, %v5535_v9  ;;  %p3957_p12 = scmp.ne.s32.totalorder (%p1985_p11), %s3222_s29, %s3956_s10  ;;  %p3962_p0 = scmp.lt.s32.totalorder (%p1985_p11), %s3956_s10, %s3956_s10 }
 0xa9d   : > { %2171 = vmatprep.subr.bf16.mxu0 %v4874_v33  ;;  %2212 = vmatprep.subr.bf16.mxu1 %v4884_v19  ;;  %v4916_v41 = vcombine.high %v5527_v20, %v5539_v5  ;;  %v4926_v39 = vcombine.high %v5540_v2, %v5538_v6  ;;  %v4931_v0 = vcombine.low %v5527_v20, %v5539_v5  ;;  %v5053_v24 = vld [vmem:[%s5042_s25 + $0x10] sm:$0xff]  ;;  %v5057_v28 = vld [vmem:[%s5042_s25 + $0x18] sm:$0xff] }
 0xa9e   : > { %v4941_v1 = vcombine.low %v5540_v2, %v5538_v6  ;;  %v4981_v22 = vcombine.low %v5534_v11, %v5532_v14  ;;  %v4986_v52 = vcombine.high %v4810_v62, %v5528_v18  ;;  %v2003_v2 = vshrl.u32 %v2001_v49, 16  ;;  %p3963_p1 = por (%p1985_p11), %p3962_p0, %p3961_p13 }
 0xa9f   : > { %v4991_v5 = vcombine.low %v5531_v15, %v5535_v9  ;;  %v4997_v6 = vcombine.low %v4810_v62, %v5528_v18  ;;  %v5541_v49 = vmov 0  }
 0xaa0   : > { %2172 = vmatpush1.bf16.msra.mxu0 %v4890_v34  ;;  %2213 = vmatpush1.bf16.msra.mxu1 %v4901_v42  ;;  %v2005_v7 = vrot.slane %v2003_v2, 3  ;;  %v5045_v2 = vld [vmem:[%s5042_s25] sm:$0xff]  ;;  %p3964_p2 = pnand (%p1985_p11), %p3963_p1, %p3957_p12 }
 0xaa1   : > { %2173 = vmatprep.subr.bf16.mxu0 %v4896_v35  ;;  %2214 = vmatprep.subr.bf16.mxu1 %v4906_v40 }
 0xaa4   : > { %2174 = vmatpush1.bf16.msra.mxu0 %v4911_v43  ;;  %2215 = vmatpush1.bf16.msra.mxu1 %v4921_v44 }
 0xaa5   : > { %2175 = vmatprep.subr.bf16.mxu0 %v4916_v41  ;;  %2216 = vmatprep.subr.bf16.mxu1 %v4926_v39 }
 0xaa8   : > { %2176 = vmatpush1.bf16.msra.mxu0 %v4931_v0  ;;  %2217 = vmatpush1.bf16.msra.mxu1 %v4941_v1 }
 0xaa9   : > { %2177 = vmatprep.subr.bf16.mxu0 %v4936_v45  ;;  %2218 = vmatprep.subr.bf16.mxu1 %v4946_v46 }
 0xaac   : > { %2178 = vmatpush1.bf16.msra.mxu0 %v4951_v47  ;;  %2219 = vmatpush1.bf16.msra.mxu1 %v4961_v3 }
 0xaad   : > { %2179 = vmatprep.subr.bf16.mxu0 %v4956_v48  ;;  %2220 = vmatprep.subr.bf16.mxu1 %v4966_v4 }
 0xab0   : > { %2180 = vmatpush1.bf16.msra.mxu0 %v4971_v50  ;;  %2221 = vmatpush1.bf16.msra.mxu1 %v4981_v22 }
 0xab1   : > { %2181 = vmatprep.subr.bf16.mxu0 %v4976_v36  ;;  %2222 = vmatprep.subr.bf16.mxu1 %v4986_v52 }
 0xab4   : > { %2182 = vmatpush1.bf16.msra.mxu0 %v4991_v5  ;;  %2223 = vmatpush1.bf16.msra.mxu1 %v4997_v6 }
 0xab5   : > { %2282 = vmatprep.subr.bf16.mxu0 %v4842_v53  ;;  %2323 = vmatprep.subr.bf16.mxu1 %v4854_v10 }
 0xab7   : > { %2200 = vmatmul.mubr.bf16.vlgmr.msra.gmra.mrb[0].mxu0 %v2005_v7  ;;  %2241 = vmatmul.mubr.bf16.vlgmr.msra.gmra.mrb[0].mxu1 %v2005_v7  ;;  %v5048_v7 = vld [vmem:[%s5042_s25 + $0x8] sm:$0xff] }
 0xab8   : > { %2283 = vmatpush1.bf16.msra.mxu0 %v4846_v54  ;;  %2324 = vmatpush1.bf16.msra.mxu1 %v4859_v12 }
 0xab9   : > { %2284 = vmatprep.subr.bf16.mxu0 %v4850_v56  ;;  %2325 = vmatprep.subr.bf16.mxu1 %v4863_v25 }
 0xaba   : > { %2314 = vmatprep.mubr.bf16.mxu0 %v5541_v49  ;;  %2355 = vmatprep.mubr.bf16.mxu1 %v5541_v49 }
 0xabc   : > { %2285 = vmatpush1.bf16.msra.mxu0 %v4868_v23  ;;  %2326 = vmatpush1.bf16.msra.mxu1 %v4879_v38 }
 0xabd   : > { %2286 = vmatprep.subr.bf16.mxu0 %v4874_v33  ;;  %2327 = vmatprep.subr.bf16.mxu1 %v4884_v19 }
 0xac0   : > { %2287 = vmatpush1.bf16.msra.mxu0 %v4890_v34  ;;  %2328 = vmatpush1.bf16.msra.mxu1 %v4901_v42 }
 0xac1   : > { %2288 = vmatprep.subr.bf16.mxu0 %v4896_v35  ;;  %2329 = vmatprep.subr.bf16.mxu1 %v4906_v40 }
 0xac4   : > { %2289 = vmatpush1.bf16.msra.mxu0 %v4911_v43  ;;  %2330 = vmatpush1.bf16.msra.mxu1 %v4921_v44 }
 0xac5   : > { %2290 = vmatprep.subr.bf16.mxu0 %v4916_v41  ;;  %2331 = vmatprep.subr.bf16.mxu1 %v4926_v39 }
 0xac8   : > { %2291 = vmatpush1.bf16.msra.mxu0 %v4931_v0  ;;  %2332 = vmatpush1.bf16.msra.mxu1 %v4941_v1 }
 0xac9   : > { %2292 = vmatprep.subr.bf16.mxu0 %v4936_v45  ;;  %2333 = vmatprep.subr.bf16.mxu1 %v4946_v46 }
 0xacc   : > { %2293 = vmatpush1.bf16.msra.mxu0 %v4951_v47  ;;  %2334 = vmatpush1.bf16.msra.mxu1 %v4961_v3 }
 0xacd   : > { %2294 = vmatprep.subr.bf16.mxu0 %v4956_v48  ;;  %2335 = vmatprep.subr.bf16.mxu1 %v4966_v4 }
 0xad0   : > { %2295 = vmatpush1.bf16.msra.mxu0 %v4971_v50  ;;  %2336 = vmatpush1.bf16.msra.mxu1 %v4981_v22 }
 0xad1   : > { %2296 = vmatprep.subr.bf16.mxu0 %v4976_v36  ;;  %2337 = vmatprep.subr.bf16.mxu1 %v4986_v52 }
 0xad4   : > { %2297 = vmatpush1.bf16.msra.mxu0 %v4991_v5  ;;  %2338 = vmatpush1.bf16.msra.mxu1 %v4997_v6 }
 0xad5   : > { %2413 = vmatprep.subr.bf16.mxu0 %v4842_v53  ;;  %2454 = vmatprep.subr.bf16.mxu1 %v4854_v10 }
 0xb8a   : > { %v2201_v8 = vpop.f32.mrb[0].mxu0  ;;  %v2242_v13 = vpop.f32.mrb[0].mxu1 }
 0xb8b   : > { %v2249_v9 = vadd.f32 %v2201_v8, %v5045_v2  ;;  %v2203_v11 = vpop.f32.mrb[1].mxu0  ;;  %v2244_v16 = vpop.f32.mrb[1].mxu1  ;;  %v2251_v27 = vadd.f32 %v2242_v13, %v5053_v24 }
 0xb8c   : > { %v2250_v14 = vadd.f32 %v2203_v11, %v5048_v7  ;;  %v2205_v15 = vpop.f32.mrb[2].mxu0  ;;  %v2246_v20 = vpop.f32.mrb[2].mxu1  ;;  %v2252_v29 = vadd.f32 %v2244_v16, %v5057_v28 }
 0xb8d   : > { %v3440_v17 = vmul.f32 -1.442695, %v2249_v9  ;;  %v2206_v18 = vpop.f32.mrb[3].mxu0  ;;  %v2247_v26 = vpop.f32.mrb[3].mxu1  ;;  %v3442_v8 = vmul.f32 -1.442695, %v2251_v27 }
 0xb8e   : > { %v3441_v21 = vmul.f32 -1.442695, %v2250_v14  ;;  %v2273_v26 = vrot.slane %v4068_v51, 7 }
 0xb8f   : > { %3758 = vpow2.f32 %v3440_v17 }
 0xb90   : > { %3760 = vpow2.f32 %v3441_v21 }
 0xb91   : > { %3762 = vpow2.f32 %v3442_v8 }
 0xb92   : > { %3764 = vtanh.f32 %v2252_v29 }
 0xb99   : > { %v3759_v30 = vpop.eup %3758 }
 0xb9a   : > { %v3761_v11 = vpop.eup %3760  ;;  %v2262_v15 = vadd.f32 1.0, %v3759_v30 }
 0xb9b   : > { %v2263_v9 = vadd.f32 1.0, %v3761_v11  ;;  %v3763_v20 = vpop.eup %3762 }
 0xb9c   : > { %3766 = vrcp.f32 %v2262_v15  ;;  %v3765_v14 = vpop.eup %3764  ;;  %v2264_v21 = vadd.f32 1.0, %v3763_v20 }
 0xb9d   : > { %3768 = vrcp.f32 %v2263_v9 }
 0xb9e   : > { %3770 = vrcp.f32 %v2264_v21 }
 0xba6   : > { %v3767_v17 = vpop.eup %3766 }
 0xba7   : > { %v3769_v13 = vpop.eup %3768  ;;  %v2276_v18 = vmul.f32 %v3767_v17, %v3765_v14 }
 0xba8   : > { %v2275_v31 = vmul.f32 %v3769_v13, %v2273_v26  ;;  %v3771_v16 = vpop.eup %3770 }
 0xbaa   : > { %v5061_v27 = vadd.f32 %v2276_v18, %v2275_v31 }
 0xbac   : > { %3772 = vtanh.f32 %v5061_v27 }
 0xbb6   : > { %v3773_v30 = vpop.eup %3772 }
 0xbb7   : > { %v2279_v29 = vmul.f32 %v3773_v30, %v3771_v16 }
 0xbb9   : > { %2280 = vst [vmem:[#allocation3] sm:$0x1] %v2279_v29  ;;  %v2281_v8 = vpack.c.bf16 %v2279_v29, %v2279_v29 }
 0xbbb   : > { %2315 = vmatmul.mubr.bf16.vlgmr.msra.gmra.mrb[4].mxu0 %v2281_v8  ;;  %2356 = vmatmul.mubr.bf16.vlgmr.msra.gmra.mrb[4].mxu1 %v2281_v8 }
 0xbbc   : > { %2414 = vmatpush1.bf16.msra.mxu0 %v4846_v54  ;;  %2455 = vmatpush1.bf16.msra.mxu1 %v4859_v12 }
 0xbbd   : > { %2415 = vmatprep.subr.bf16.mxu0 %v4850_v56  ;;  %2456 = vmatprep.subr.bf16.mxu1 %v4863_v25 }
 0xbbe   : > { %2445 = vmatprep.mubr.bf16.mxu0 %v5541_v49  ;;  %2486 = vmatprep.mubr.bf16.mxu1 %v5541_v49 }
 0xbc0   : > { %2416 = vmatpush1.bf16.msra.mxu0 %v4868_v23  ;;  %2457 = vmatpush1.bf16.msra.mxu1 %v4879_v38 }
 0xbc1   : > { %2417 = vmatprep.subr.bf16.mxu0 %v4874_v33  ;;  %2458 = vmatprep.subr.bf16.mxu1 %v4884_v19 }
 0xbc4   : > { %2418 = vmatpush1.bf16.msra.mxu0 %v4890_v34  ;;  %2459 = vmatpush1.bf16.msra.mxu1 %v4901_v42 }
 0xbc5   : > { %2419 = vmatprep.subr.bf16.mxu0 %v4896_v35  ;;  %2460 = vmatprep.subr.bf16.mxu1 %v4906_v40 }
 0xbc8   : > { %2420 = vmatpush1.bf16.msra.mxu0 %v4911_v43  ;;  %2461 = vmatpush1.bf16.msra.mxu1 %v4921_v44 }
 0xbc9   : > { %2421 = vmatprep.subr.bf16.mxu0 %v4916_v41  ;;  %2462 = vmatprep.subr.bf16.mxu1 %v4926_v39 }
 0xbcc   : > { %2422 = vmatpush1.bf16.msra.mxu0 %v4931_v0  ;;  %2463 = vmatpush1.bf16.msra.mxu1 %v4941_v1 }
 0xbcd   : > { %2423 = vmatprep.subr.bf16.mxu0 %v4936_v45  ;;  %2464 = vmatprep.subr.bf16.mxu1 %v4946_v46 }
 0xbd0   : > { %2424 = vmatpush1.bf16.msra.mxu0 %v4951_v47  ;;  %2465 = vmatpush1.bf16.msra.mxu1 %v4961_v3 }
 0xbd1   : > { %2425 = vmatprep.subr.bf16.mxu0 %v4956_v48  ;;  %2466 = vmatprep.subr.bf16.mxu1 %v4966_v4 }
 0xbd4   : > { %2426 = vmatpush1.bf16.msra.mxu0 %v4971_v50  ;;  %2467 = vmatpush1.bf16.msra.mxu1 %v4981_v22 }
 0xbd5   : > { %2427 = vmatprep.subr.bf16.mxu0 %v4976_v36  ;;  %2468 = vmatprep.subr.bf16.mxu1 %v4986_v52 }
 0xbd8   : > { %2428 = vmatpush1.bf16.msra.mxu0 %v4991_v5  ;;  %2469 = vmatpush1.bf16.msra.mxu1 %v4997_v6 }
 0xbd9   : > { %2543 = vmatprep.subr.bf16.mxu0 %v4842_v53  ;;  %2584 = vmatprep.subr.bf16.mxu1 %v4854_v10 }
 0xc8e   : > { %v2316_v31 = vpop.f32.mrb[4].mxu0  ;;  %v2357_v51 = vpop.f32.mrb[4].mxu1 }
 0xc8f   : > { %v2368_v11 = vrot.slane %v2316_v31, 7  ;;  %v2318_v15 = vpop.f32.mrb[5].mxu0  ;;  %v2359_v9 = vpop.f32.mrb[5].mxu1  ;;  %v2370_v29 = vrot.slane %v2357_v51, 7  ;;  %v2400_v51 = vrot.slane %v5061_v27, 7 }
 0xc90   : > { %v2369_v20 = vrot.slane %v2318_v15, 7  ;;  %v2320_v14 = vpop.f32.mrb[6].mxu0  ;;  %v2361_v26 = vpop.f32.mrb[6].mxu1  ;;  %v2371_v8 = vrot.slane %v2359_v9, 7 }
 0xc91   : > { %v2376_v17 = vadd.f32 %v2368_v11, %v5045_v2  ;;  %v2321_v21 = vpop.f32.mrb[7].mxu0  ;;  %v2362_v13 = vpop.f32.mrb[7].mxu1  ;;  %v2378_v32 = vadd.f32 %v2370_v29, %v5053_v24 }
 0xc92   : > { %v2377_v18 = vadd.f32 %v2369_v20, %v5048_v7  ;;  %v2379_v31 = vadd.f32 %v2371_v8, %v5057_v28 }
 0xc93   : > { %v3443_v16 = vmul.f32 -1.442695, %v2376_v17  ;;  %v3445_v37 = vmul.f32 -1.442695, %v2378_v32 }
 0xc94   : > { %v3444_v30 = vmul.f32 -1.442695, %v2377_v18 }
 0xc95   : > { %3774 = vpow2.f32 %v3443_v16 }
 0xc96   : > { %3776 = vpow2.f32 %v3444_v30 }
 0xc97   : > { %3778 = vtanh.f32 %v2379_v31 }
 0xc98   : > { %3780 = vpow2.f32 %v3445_v37 }
 0xc9f   : > { %v3775_v15 = vpop.eup %3774 }
 0xca0   : > { %v2389_v14 = vadd.f32 1.0, %v3775_v15  ;;  %v3777_v26 = vpop.eup %3776 }
 0xca1   : > { %v2390_v11 = vadd.f32 1.0, %v3777_v26  ;;  %v3779_v20 = vpop.eup %3778 }
 0xca2   : > { %3782 = vrcp.f32 %v2389_v14  ;;  %v3781_v17 = vpop.eup %3780 }
 0xca3   : > { %3784 = vrcp.f32 %v2390_v11  ;;  %v2391_v18 = vadd.f32 1.0, %v3781_v17 }
 0xca5   : > { %3786 = vrcp.f32 %v2391_v18 }
 0xcac   : > { %v3783_v21 = vpop.eup %3782 }
 0xcad   : > { %v2403_v13 = vmul.f32 %v3783_v21, %v3779_v20  ;;  %v3785_v9 = vpop.eup %3784 }
 0xcae   : > { %v2402_v16 = vmul.f32 %v3785_v9, %v2400_v51 }
 0xcaf   : > { %v3787_v32 = vpop.eup %3786 }
 0xcb0   : > { %v5103_v30 = vadd.f32 %v2403_v13, %v2402_v16 }
 0xcb2   : > { %3788 = vtanh.f32 %v5103_v30 }
 0xcbc   : > { %v3789_v29 = vpop.eup %3788 }
 0xcbd   : > { %v2406_v37 = vmul.f32 %v3789_v29, %v3787_v32 }
 0xcbf   : > { %2407 = vst [vmem:[#allocation3] sm:$0x2] %v2406_v37  ;;  %v2408_v8 = vpack.c.bf16 %v2406_v37, %v2406_v37 }
 0xcc1   : > { %v2410_v31 = vshrl.u32 %v2408_v8, 16 }
 0xcc3   : > { %2446 = vmatmul.mubr.bf16.vlgmr.msra.gmra.mrb[8].mxu0 %v2410_v31  ;;  %2487 = vmatmul.mubr.bf16.vlgmr.msra.gmra.mrb[8].mxu1 %v2410_v31 }
 0xcc4   : > { %2544 = vmatpush1.bf16.msra.mxu0 %v4846_v54  ;;  %2585 = vmatpush1.bf16.msra.mxu1 %v4859_v12 }
 0xcc5   : > { %2545 = vmatprep.subr.bf16.mxu0 %v4850_v56  ;;  %2586 = vmatprep.subr.bf16.mxu1 %v4863_v25 }
 0xcc6   : > { %2575 = vmatprep.mubr.bf16.mxu0 %v5541_v49  ;;  %2616 = vmatprep.mubr.bf16.mxu1 %v5541_v49 }
 0xcc8   : > { %2546 = vmatpush1.bf16.msra.mxu0 %v4868_v23  ;;  %2587 = vmatpush1.bf16.msra.mxu1 %v4879_v38 }
 0xcc9   : > { %2547 = vmatprep.subr.bf16.mxu0 %v4874_v33  ;;  %2588 = vmatprep.subr.bf16.mxu1 %v4884_v19 }
 0xccc   : > { %2548 = vmatpush1.bf16.msra.mxu0 %v4890_v34  ;;  %2589 = vmatpush1.bf16.msra.mxu1 %v4901_v42 }
 0xccd   : > { %2549 = vmatprep.subr.bf16.mxu0 %v4896_v35  ;;  %2590 = vmatprep.subr.bf16.mxu1 %v4906_v40 }
 0xcd0   : > { %2550 = vmatpush1.bf16.msra.mxu0 %v4911_v43  ;;  %2591 = vmatpush1.bf16.msra.mxu1 %v4921_v44 }
 0xcd1   : > { %2551 = vmatprep.subr.bf16.mxu0 %v4916_v41  ;;  %2592 = vmatprep.subr.bf16.mxu1 %v4926_v39 }
 0xcd4   : > { %2552 = vmatpush1.bf16.msra.mxu0 %v4931_v0  ;;  %2593 = vmatpush1.bf16.msra.mxu1 %v4941_v1 }
 0xcd5   : > { %2553 = vmatprep.subr.bf16.mxu0 %v4936_v45  ;;  %2594 = vmatprep.subr.bf16.mxu1 %v4946_v46 }
 0xcd8   : > { %2554 = vmatpush1.bf16.msra.mxu0 %v4951_v47  ;;  %2595 = vmatpush1.bf16.msra.mxu1 %v4961_v3 }
 0xcd9   : > { %2555 = vmatprep.subr.bf16.mxu0 %v4956_v48  ;;  %2596 = vmatprep.subr.bf16.mxu1 %v4966_v4 }
 0xcdc   : > { %2556 = vmatpush1.bf16.msra.mxu0 %v4971_v50  ;;  %2597 = vmatpush1.bf16.msra.mxu1 %v4981_v22 }
 0xcdd   : > { %2557 = vmatprep.subr.bf16.mxu0 %v4976_v36  ;;  %2598 = vmatprep.subr.bf16.mxu1 %v4986_v52 }
 0xce0   : > { %2558 = vmatpush1.bf16.msra.mxu0 %v4991_v5  ;;  %2599 = vmatpush1.bf16.msra.mxu1 %v4997_v6 }
 0xce1   : > { %2675 = vmatprep.subr.bf16.mxu0 %v4842_v53  ;;  %2716 = vmatprep.subr.bf16.mxu1 %v4854_v10 }
 0xd96   : > { %v2447_v27 = vpop.f32.mrb[8].mxu0  ;;  %v2488_v15 = vpop.f32.mrb[8].mxu1 }
 0xd97   : > { %v2499_v14 = vrot.slane %v2447_v27, 6  ;;  %v2449_v26 = vpop.f32.mrb[9].mxu0  ;;  %v2490_v11 = vpop.f32.mrb[9].mxu1  ;;  %v2501_v29 = vrot.slane %v2488_v15, 6  ;;  %v2531_v15 = vrot.slane %v5103_v30, 7 }
 0xd98   : > { %v2500_v20 = vrot.slane %v2449_v26, 6  ;;  %v2451_v17 = vpop.f32.mrb[10].mxu0  ;;  %v2492_v21 = vpop.f32.mrb[10].mxu1  ;;  %v2502_v37 = vrot.slane %v2490_v11, 6 }
 0xd99   : > { %v2507_v51 = vadd.f32 %v2499_v14, %v5045_v2  ;;  %v2452_v13 = vpop.f32.mrb[11].mxu0  ;;  %v2493_v9 = vpop.f32.mrb[11].mxu1  ;;  %v2509_v8 = vadd.f32 %v2501_v29, %v5053_v24 }
 0xd9a   : > { %v2508_v18 = vadd.f32 %v2500_v20, %v5048_v7  ;;  %v2510_v31 = vadd.f32 %v2502_v37, %v5057_v28 }
 0xd9b   : > { %v3446_v16 = vmul.f32 -1.442695, %v2507_v51  ;;  %v3448_v27 = vmul.f32 -1.442695, %v2509_v8 }
 0xd9c   : > { %v3447_v32 = vmul.f32 -1.442695, %v2508_v18 }
 0xd9d   : > { %3790 = vpow2.f32 %v3446_v16 }
 0xd9e   : > { %3792 = vpow2.f32 %v3447_v32 }
 0xd9f   : > { %3794 = vtanh.f32 %v2510_v31 }
 0xda0   : > { %3796 = vpow2.f32 %v3448_v27 }
 0xda7   : > { %v3791_v26 = vpop.eup %3790 }
 0xda8   : > { %v2520_v17 = vadd.f32 1.0, %v3791_v26  ;;  %v3793_v21 = vpop.eup %3792 }
 0xda9   : > { %v2521_v14 = vadd.f32 1.0, %v3793_v21  ;;  %v3795_v20 = vpop.eup %3794 }
 0xdaa   : > { %3798 = vrcp.f32 %v2520_v17  ;;  %v3797_v51 = vpop.eup %3796 }
 0xdab   : > { %3800 = vrcp.f32 %v2521_v14  ;;  %v2522_v18 = vadd.f32 1.0, %v3797_v51 }
 0xdad   : > { %3802 = vrcp.f32 %v2522_v18 }
 0xdb4   : > { %v3799_v13 = vpop.eup %3798 }
 0xdb5   : > { %v2534_v9 = vmul.f32 %v3799_v13, %v3795_v20  ;;  %v3801_v11 = vpop.eup %3800 }
 0xdb6   : > { %v2533_v16 = vmul.f32 %v3801_v11, %v2531_v15 }
 0xdb7   : > { %v3803_v29 = vpop.eup %3802 }
 0xdb8   : > { %v5145_v32 = vadd.f32 %v2534_v9, %v2533_v16 }
 0xdba   : > { %3804 = vtanh.f32 %v5145_v32 }
 0xdc4   : > { %v3805_v37 = vpop.eup %3804 }
 0xdc5   : > { %v2537_v8 = vmul.f32 %v3805_v37, %v3803_v29 }
 0xdc7   : > { %2538 = vst [vmem:[#allocation3] sm:$0x4] %v2537_v8  ;;  %v2539_v31 = vpack.c.bf16 %v2537_v8, %v2537_v8 }
 0xdc9   : > { %v2541_v27 = vrot.slane %v2539_v31, 1 }
 0xdcb   : > { %2576 = vmatmul.mubr.bf16.vlgmr.msra.gmra.mrb[12].mxu0 %v2541_v27  ;;  %2617 = vmatmul.mubr.bf16.vlgmr.msra.gmra.mrb[12].mxu1 %v2541_v27 }
 0xdcc   : > { %2676 = vmatpush1.bf16.msra.mxu0 %v4846_v54  ;;  %2717 = vmatpush1.bf16.msra.mxu1 %v4859_v12 }
 0xdcd   : > { %2677 = vmatprep.subr.bf16.mxu0 %v4850_v56  ;;  %2718 = vmatprep.subr.bf16.mxu1 %v4863_v25 }
 0xdce   : > { %2707 = vmatprep.mubr.bf16.mxu0 %v5541_v49  ;;  %2748 = vmatprep.mubr.bf16.mxu1 %v5541_v49 }
 0xdd0   : > { %2678 = vmatpush1.bf16.msra.mxu0 %v4868_v23  ;;  %2719 = vmatpush1.bf16.msra.mxu1 %v4879_v38 }
 0xdd1   : > { %2679 = vmatprep.subr.bf16.mxu0 %v4874_v33  ;;  %2720 = vmatprep.subr.bf16.mxu1 %v4884_v19 }
 0xdd4   : > { %2680 = vmatpush1.bf16.msra.mxu0 %v4890_v34  ;;  %2721 = vmatpush1.bf16.msra.mxu1 %v4901_v42 }
 0xdd5   : > { %2681 = vmatprep.subr.bf16.mxu0 %v4896_v35  ;;  %2722 = vmatprep.subr.bf16.mxu1 %v4906_v40 }
 0xdd8   : > { %2682 = vmatpush1.bf16.msra.mxu0 %v4911_v43  ;;  %2723 = vmatpush1.bf16.msra.mxu1 %v4921_v44 }
 0xdd9   : > { %2683 = vmatprep.subr.bf16.mxu0 %v4916_v41  ;;  %2724 = vmatprep.subr.bf16.mxu1 %v4926_v39 }
 0xddc   : > { %2684 = vmatpush1.bf16.msra.mxu0 %v4931_v0  ;;  %2725 = vmatpush1.bf16.msra.mxu1 %v4941_v1 }
 0xddd   : > { %2685 = vmatprep.subr.bf16.mxu0 %v4936_v45  ;;  %2726 = vmatprep.subr.bf16.mxu1 %v4946_v46 }
 0xde0   : > { %2686 = vmatpush1.bf16.msra.mxu0 %v4951_v47  ;;  %2727 = vmatpush1.bf16.msra.mxu1 %v4961_v3 }
 0xde1   : > { %2687 = vmatprep.subr.bf16.mxu0 %v4956_v48  ;;  %2728 = vmatprep.subr.bf16.mxu1 %v4966_v4 }
 0xde4   : > { %2688 = vmatpush1.bf16.msra.mxu0 %v4971_v50  ;;  %2729 = vmatpush1.bf16.msra.mxu1 %v4981_v22 }
 0xde5   : > { %2689 = vmatprep.subr.bf16.mxu0 %v4976_v36  ;;  %2730 = vmatprep.subr.bf16.mxu1 %v4986_v52 }
 0xde8   : > { %2690 = vmatpush1.bf16.msra.mxu0 %v4991_v5  ;;  %2731 = vmatpush1.bf16.msra.mxu1 %v4997_v6 }
 0xde9   : > { %2805 = vmatprep.subr.bf16.mxu0 %v4842_v53  ;;  %2846 = vmatprep.subr.bf16.mxu1 %v4854_v10 }
 0xe9e   : > { %v2577_v30 = vpop.f32.mrb[12].mxu0  ;;  %v2618_v26 = vpop.f32.mrb[12].mxu1 }
 0xe9f   : > { %v2629_v17 = vrot.slane %v2577_v30, 5  ;;  %v2579_v21 = vpop.f32.mrb[13].mxu0  ;;  %v2620_v14 = vpop.f32.mrb[13].mxu1  ;;  %v2631_v37 = vrot.slane %v2618_v26, 5  ;;  %v2661_v26 = vrot.slane %v5145_v32, 7 }
 0xea0   : > { %v2630_v20 = vrot.slane %v2579_v21, 5  ;;  %v2581_v51 = vpop.f32.mrb[14].mxu0  ;;  %v2622_v13 = vpop.f32.mrb[14].mxu1  ;;  %v2632_v8 = vrot.slane %v2620_v14, 5 }
 0xea1   : > { %v2637_v15 = vadd.f32 %v2629_v17, %v5045_v2  ;;  %v2582_v9 = vpop.f32.mrb[15].mxu0  ;;  %v2623_v11 = vpop.f32.mrb[15].mxu1  ;;  %v2639_v31 = vadd.f32 %v2631_v37, %v5053_v24 }
 0xea2   : > { %v2638_v18 = vadd.f32 %v2630_v20, %v5048_v7  ;;  %v2640_v27 = vadd.f32 %v2632_v8, %v5057_v28 }
 0xea3   : > { %v3449_v16 = vmul.f32 -1.442695, %v2637_v15  ;;  %v3451_v30 = vmul.f32 -1.442695, %v2639_v31 }
 0xea4   : > { %v3450_v29 = vmul.f32 -1.442695, %v2638_v18 }
 0xea5   : > { %3806 = vpow2.f32 %v3449_v16 }
 0xea6   : > { %3808 = vpow2.f32 %v3450_v29 }
 0xea7   : > { %3810 = vtanh.f32 %v2640_v27 }
 0xea8   : > { %3812 = vpow2.f32 %v3451_v30 }
 0xeaf   : > { %v3807_v21 = vpop.eup %3806 }
 0xeb0   : > { %v2650_v51 = vadd.f32 1.0, %v3807_v21  ;;  %v3809_v13 = vpop.eup %3808 }
 0xeb1   : > { %v2651_v17 = vadd.f32 1.0, %v3809_v13  ;;  %v3811_v20 = vpop.eup %3810 }
 0xeb2   : > { %3814 = vrcp.f32 %v2650_v51  ;;  %v3813_v15 = vpop.eup %3812 }
 0xeb3   : > { %3816 = vrcp.f32 %v2651_v17  ;;  %v2652_v18 = vadd.f32 1.0, %v3813_v15 }
 0xeb5   : > { %3818 = vrcp.f32 %v2652_v18 }
 0xebc   : > { %v3815_v9 = vpop.eup %3814 }
 0xebd   : > { %v2664_v11 = vmul.f32 %v3815_v9, %v3811_v20  ;;  %v3817_v14 = vpop.eup %3816 }
 0xebe   : > { %v2663_v16 = vmul.f32 %v3817_v14, %v2661_v26 }
 0xebf   : > { %v3819_v37 = vpop.eup %3818 }
 0xec0   : > { %v5187_v29 = vadd.f32 %v2664_v11, %v2663_v16 }
 0xec2   : > { %3820 = vtanh.f32 %v5187_v29 }
 0xecc   : > { %v3821_v8 = vpop.eup %3820 }
 0xecd   : > { %v2667_v31 = vmul.f32 %v3821_v8, %v3819_v37 }
 0xecf   : > { %2668 = vst [vmem:[#allocation3] sm:$0x8] %v2667_v31  ;;  %v2669_v27 = vpack.c.bf16 %v2667_v31, %v2667_v31 }
 0xed1   : > { %v2671_v30 = vshrl.u32 %v2669_v27, 16 }
 0xed3   : > { %v2673_v21 = vrot.slane %v2671_v30, 1 }
 0xed5   : > { %2708 = vmatmul.mubr.bf16.vlgmr.msra.gmra.mrb[16].mxu0 %v2673_v21  ;;  %2749 = vmatmul.mubr.bf16.vlgmr.msra.gmra.mrb[16].mxu1 %v2673_v21 }
 0xed6   : > { %2806 = vmatpush1.bf16.msra.mxu0 %v4846_v54  ;;  %2847 = vmatpush1.bf16.msra.mxu1 %v4859_v12 }
 0xed7   : > { %2807 = vmatprep.subr.bf16.mxu0 %v4850_v56  ;;  %2848 = vmatprep.subr.bf16.mxu1 %v4863_v25 }
 0xed8   : > { %2837 = vmatprep.mubr.bf16.mxu0 %v5541_v49  ;;  %2878 = vmatprep.mubr.bf16.mxu1 %v5541_v49 }
 0xeda   : > { %2808 = vmatpush1.bf16.msra.mxu0 %v4868_v23  ;;  %2849 = vmatpush1.bf16.msra.mxu1 %v4879_v38 }
 0xedb   : > { %2809 = vmatprep.subr.bf16.mxu0 %v4874_v33  ;;  %2850 = vmatprep.subr.bf16.mxu1 %v4884_v19 }
 0xede   : > { %2810 = vmatpush1.bf16.msra.mxu0 %v4890_v34  ;;  %2851 = vmatpush1.bf16.msra.mxu1 %v4901_v42 }
 0xedf   : > { %2811 = vmatprep.subr.bf16.mxu0 %v4896_v35  ;;  %2852 = vmatprep.subr.bf16.mxu1 %v4906_v40 }
 0xee2   : > { %2812 = vmatpush1.bf16.msra.mxu0 %v4911_v43  ;;  %2853 = vmatpush1.bf16.msra.mxu1 %v4921_v44 }
 0xee3   : > { %2813 = vmatprep.subr.bf16.mxu0 %v4916_v41  ;;  %2854 = vmatprep.subr.bf16.mxu1 %v4926_v39 }
 0xee6   : > { %2814 = vmatpush1.bf16.msra.mxu0 %v4931_v0  ;;  %2855 = vmatpush1.bf16.msra.mxu1 %v4941_v1 }
 0xee7   : > { %2815 = vmatprep.subr.bf16.mxu0 %v4936_v45  ;;  %2856 = vmatprep.subr.bf16.mxu1 %v4946_v46 }
 0xeea   : > { %2816 = vmatpush1.bf16.msra.mxu0 %v4951_v47  ;;  %2857 = vmatpush1.bf16.msra.mxu1 %v4961_v3 }
 0xeeb   : > { %2817 = vmatprep.subr.bf16.mxu0 %v4956_v48  ;;  %2858 = vmatprep.subr.bf16.mxu1 %v4966_v4 }
 0xeee   : > { %2818 = vmatpush1.bf16.msra.mxu0 %v4971_v50  ;;  %2859 = vmatpush1.bf16.msra.mxu1 %v4981_v22 }
 0xeef   : > { %2819 = vmatprep.subr.bf16.mxu0 %v4976_v36  ;;  %2860 = vmatprep.subr.bf16.mxu1 %v4986_v52 }
 0xef2   : > { %2820 = vmatpush1.bf16.msra.mxu0 %v4991_v5  ;;  %2861 = vmatpush1.bf16.msra.mxu1 %v4997_v6 }
 0xef3   : > { %2937 = vmatprep.subr.bf16.mxu0 %v4842_v53  ;;  %2978 = vmatprep.subr.bf16.mxu1 %v4854_v10 }
 0xfa8   : > { %v2709_v32 = vpop.f32.mrb[16].mxu0  ;;  %v2750_v51 = vpop.f32.mrb[16].mxu1 }
 0xfa9   : > { %v2761_v13 = vrot.slane %v2709_v32, 4  ;;  %v2711_v17 = vpop.f32.mrb[17].mxu0  ;;  %v2752_v20 = vpop.f32.mrb[17].mxu1  ;;  %v2763_v31 = vrot.slane %v2750_v51, 4  ;;  %v2793_v51 = vrot.slane %v5187_v29, 7 }
 0xfaa   : > { %v2762_v15 = vrot.slane %v2711_v17, 4  ;;  %v2713_v9 = vpop.f32.mrb[18].mxu0  ;;  %v2754_v26 = vpop.f32.mrb[18].mxu1  ;;  %v2764_v27 = vrot.slane %v2752_v20, 4 }
 0xfab   : > { %v2769_v11 = vadd.f32 %v2761_v13, %v5045_v2  ;;  %v2714_v14 = vpop.f32.mrb[19].mxu0  ;;  %v2755_v18 = vpop.f32.mrb[19].mxu1  ;;  %v2771_v30 = vadd.f32 %v2763_v31, %v5053_v24 }
 0xfac   : > { %v2770_v16 = vadd.f32 %v2762_v15, %v5048_v7  ;;  %v2772_v21 = vadd.f32 %v2764_v27, %v5057_v28 }
 0xfad   : > { %v3452_v37 = vmul.f32 -1.442695, %v2769_v11  ;;  %v3454_v32 = vmul.f32 -1.442695, %v2771_v30 }
 0xfae   : > { %v3453_v8 = vmul.f32 -1.442695, %v2770_v16 }
 0xfaf   : > { %3822 = vpow2.f32 %v3452_v37 }
 0xfb0   : > { %3824 = vpow2.f32 %v3453_v8 }
 0xfb1   : > { %3826 = vtanh.f32 %v2772_v21 }
 0xfb2   : > { %3828 = vpow2.f32 %v3454_v32 }
 0xfb9   : > { %v3823_v17 = vpop.eup %3822 }
 0xfba   : > { %v2782_v9 = vadd.f32 1.0, %v3823_v17  ;;  %v3825_v26 = vpop.eup %3824 }
 0xfbb   : > { %v2783_v13 = vadd.f32 1.0, %v3825_v26  ;;  %v3827_v15 = vpop.eup %3826 }
 0xfbc   : > { %3830 = vrcp.f32 %v2782_v9  ;;  %v3829_v11 = vpop.eup %3828 }
 0xfbd   : > { %3832 = vrcp.f32 %v2783_v13  ;;  %v2784_v16 = vadd.f32 1.0, %v3829_v11 }
 0xfbf   : > { %3834 = vrcp.f32 %v2784_v16 }
 0xfc6   : > { %v3831_v14 = vpop.eup %3830 }
 0xfc7   : > { %v2796_v18 = vmul.f32 %v3831_v14, %v3827_v15  ;;  %v3833_v20 = vpop.eup %3832 }
 0xfc8   : > { %v2795_v37 = vmul.f32 %v3833_v20, %v2793_v51 }
 0xfc9   : > { %v3835_v31 = vpop.eup %3834 }
 0xfca   : > { %v5229_v8 = vadd.f32 %v2796_v18, %v2795_v37 }
 0xfcc   : > { %3836 = vtanh.f32 %v5229_v8 }
 0xfd6   : > { %v3837_v27 = vpop.eup %3836 }
 0xfd7   : > { %v2799_v30 = vmul.f32 %v3837_v27, %v3835_v31 }
 0xfd9   : > { %2800 = vst [vmem:[#allocation3] sm:$0x10] %v2799_v30  ;;  %v2801_v21 = vpack.c.bf16 %v2799_v30, %v2799_v30 }
 0xfdb   : > { %v2803_v32 = vrot.slane %v2801_v21, 2 }
 0xfdd   : > { %2838 = vmatmul.mubr.bf16.vlgmr.msra.gmra.mrb[20].mxu0 %v2803_v32  ;;  %2879 = vmatmul.mubr.bf16.vlgmr.msra.gmra.mrb[20].mxu1 %v2803_v32 }
 0xfde   : > { %2938 = vmatpush1.bf16.msra.mxu0 %v4846_v54  ;;  %2979 = vmatpush1.bf16.msra.mxu1 %v4859_v12 }
 0xfdf   : > { %2939 = vmatprep.subr.bf16.mxu0 %v4850_v56  ;;  %2980 = vmatprep.subr.bf16.mxu1 %v4863_v25 }
 0xfe0   : > { %2969 = vmatprep.mubr.bf16.mxu0 %v5541_v49  ;;  %3010 = vmatprep.mubr.bf16.mxu1 %v5541_v49 }
 0xfe2   : > { %2940 = vmatpush1.bf16.msra.mxu0 %v4868_v23  ;;  %2981 = vmatpush1.bf16.msra.mxu1 %v4879_v38 }
 0xfe3   : > { %2941 = vmatprep.subr.bf16.mxu0 %v4874_v33  ;;  %2982 = vmatprep.subr.bf16.mxu1 %v4884_v19 }
 0xfe6   : > { %2942 = vmatpush1.bf16.msra.mxu0 %v4890_v34  ;;  %2983 = vmatpush1.bf16.msra.mxu1 %v4901_v42 }
 0xfe7   : > { %2943 = vmatprep.subr.bf16.mxu0 %v4896_v35  ;;  %2984 = vmatprep.subr.bf16.mxu1 %v4906_v40 }
 0xfea   : > { %2944 = vmatpush1.bf16.msra.mxu0 %v4911_v43  ;;  %2985 = vmatpush1.bf16.msra.mxu1 %v4921_v44 }
 0xfeb   : > { %2945 = vmatprep.subr.bf16.mxu0 %v4916_v41  ;;  %2986 = vmatprep.subr.bf16.mxu1 %v4926_v39 }
 0xfee   : > { %2946 = vmatpush1.bf16.msra.mxu0 %v4931_v0  ;;  %2987 = vmatpush1.bf16.msra.mxu1 %v4941_v1 }
 0xfef   : > { %2947 = vmatprep.subr.bf16.mxu0 %v4936_v45  ;;  %2988 = vmatprep.subr.bf16.mxu1 %v4946_v46 }
 0xff2   : > { %2948 = vmatpush1.bf16.msra.mxu0 %v4951_v47  ;;  %2989 = vmatpush1.bf16.msra.mxu1 %v4961_v3 }
 0xff3   : > { %2949 = vmatprep.subr.bf16.mxu0 %v4956_v48  ;;  %2990 = vmatprep.subr.bf16.mxu1 %v4966_v4 }
 0xff6   : > { %2950 = vmatpush1.bf16.msra.mxu0 %v4971_v50  ;;  %2991 = vmatpush1.bf16.msra.mxu1 %v4981_v22 }
 0xff7   : > { %2951 = vmatprep.subr.bf16.mxu0 %v4976_v36  ;;  %2992 = vmatprep.subr.bf16.mxu1 %v4986_v52 }
 0xffa   : > { %2952 = vmatpush1.bf16.msra.mxu0 %v4991_v5  ;;  %2993 = vmatpush1.bf16.msra.mxu1 %v4997_v6 }
 0xffb   : > { %3067 = vmatprep.subr.bf16.mxu0 %v4842_v53  ;;  %3108 = vmatprep.subr.bf16.mxu1 %v4854_v10 }
0x10b0   : > { %v2839_v29 = vpop.f32.mrb[20].mxu0  ;;  %v2880_v17 = vpop.f32.mrb[20].mxu1 }
0x10b1   : > { %v2891_v9 = vrot.slane %v2839_v29, 3  ;;  %v2841_v26 = vpop.f32.mrb[21].mxu0  ;;  %v2882_v13 = vpop.f32.mrb[21].mxu1  ;;  %v2893_v53 = vrot.slane %v2880_v17, 3  ;;  %v2923_v17 = vrot.slane %v5229_v8, 7 }
0x10b2   : > { %v2892_v15 = vrot.slane %v2841_v26, 3  ;;  %v2843_v11 = vpop.f32.mrb[22].mxu0  ;;  %v2884_v14 = vpop.f32.mrb[22].mxu1  ;;  %v2894_v10 = vrot.slane %v2882_v13, 3 }
0x10b3   : > { %v2899_v51 = vadd.f32 %v2891_v9, %v5045_v2  ;;  %v2844_v18 = vpop.f32.mrb[23].mxu0  ;;  %v2885_v20 = vpop.f32.mrb[23].mxu1  ;;  %v2901_v27 = vadd.f32 %v2893_v53, %v5053_v24 }
0x10b4   : > { %v2900_v16 = vadd.f32 %v2892_v15, %v5048_v7  ;;  %v2902_v30 = vadd.f32 %v2894_v10, %v5057_v28 }
0x10b5   : > { %v3455_v37 = vmul.f32 -1.442695, %v2899_v51  ;;  %v3457_v21 = vmul.f32 -1.442695, %v2901_v27 }
0x10b6   : > { %v3456_v31 = vmul.f32 -1.442695, %v2900_v16 }
0x10b7   : > { %3838 = vpow2.f32 %v3455_v37 }
0x10b8   : > { %3840 = vpow2.f32 %v3456_v31 }
0x10b9   : > { %3842 = vtanh.f32 %v2902_v30 }
0x10ba   : > { %3844 = vpow2.f32 %v3457_v21 }
0x10c1   : > { %v3839_v32 = vpop.eup %3838 }
0x10c2   : > { %v2912_v29 = vadd.f32 1.0, %v3839_v32  ;;  %v3841_v26 = vpop.eup %3840 }
0x10c3   : > { %v2913_v9 = vadd.f32 1.0, %v3841_v26  ;;  %v3843_v15 = vpop.eup %3842 }
0x10c4   : > { %3846 = vrcp.f32 %v2912_v29  ;;  %v3845_v11 = vpop.eup %3844 }
0x10c5   : > { %3848 = vrcp.f32 %v2913_v9  ;;  %v2914_v18 = vadd.f32 1.0, %v3845_v11 }
0x10c7   : > { %3850 = vrcp.f32 %v2914_v18 }
0x10ce   : > { %v3847_v14 = vpop.eup %3846 }
0x10cf   : > { %v2926_v51 = vmul.f32 %v3847_v14, %v3843_v15  ;;  %v3849_v13 = vpop.eup %3848 }
0x10d0   : > { %v2925_v20 = vmul.f32 %v3849_v13, %v2923_v17 }
0x10d1   : > { %v3851_v37 = vpop.eup %3850 }
0x10d2   : > { %v5271_v16 = vadd.f32 %v2926_v51, %v2925_v20  ;;  %v3886_v51 = vld [vmem:[%s5042_s25] sm:$0xff] }
0x10d4   : > { %3852 = vtanh.f32 %v5271_v16 }
0x10de   : > { %v3853_v31 = vpop.eup %3852 }
0x10df   : > { %v2929_v53 = vmul.f32 %v3853_v31, %v3851_v37 }
0x10e1   : > { %2930 = vst [vmem:[#allocation3] sm:$0x20] %v2929_v53  ;;  %v2931_v10 = vpack.c.bf16 %v2929_v53, %v2929_v53 }
0x10e3   : > { %v2933_v27 = vshrl.u32 %v2931_v10, 16 }
0x10e5   : > { %v2935_v30 = vrot.slane %v2933_v27, 2 }
0x10e7   : > { %2970 = vmatmul.mubr.bf16.vlgmr.msra.gmra.mrb[24].mxu0 %v2935_v30  ;;  %3011 = vmatmul.mubr.bf16.vlgmr.msra.gmra.mrb[24].mxu1 %v2935_v30  ;;  %v3888_v30 = vld [vmem:[%s5042_s25 + $0x10] sm:$0xff] }
0x10e8   : > { %3068 = vmatpush1.bf16.msra.mxu0 %v4846_v54  ;;  %3109 = vmatpush1.bf16.msra.mxu1 %v4859_v12 }
0x10e9   : > { %3069 = vmatprep.subr.bf16.mxu0 %v4850_v56  ;;  %3110 = vmatprep.subr.bf16.mxu1 %v4863_v25 }
0x10ea   : > { %3099 = vmatprep.mubr.bf16.mxu0 %v5541_v49  ;;  %3140 = vmatprep.mubr.bf16.mxu1 %v5541_v49 }
0x10ec   : > { %3070 = vmatpush1.bf16.msra.mxu0 %v4868_v23  ;;  %3111 = vmatpush1.bf16.msra.mxu1 %v4879_v38 }
0x10ed   : > { %3071 = vmatprep.subr.bf16.mxu0 %v4874_v33  ;;  %3112 = vmatprep.subr.bf16.mxu1 %v4884_v19 }
0x10f0   : > { %3072 = vmatpush1.bf16.msra.mxu0 %v4890_v34  ;;  %3113 = vmatpush1.bf16.msra.mxu1 %v4901_v42 }
0x10f1   : > { %3073 = vmatprep.subr.bf16.mxu0 %v4896_v35  ;;  %3114 = vmatprep.subr.bf16.mxu1 %v4906_v40 }
0x10f4   : > { %3074 = vmatpush1.bf16.msra.mxu0 %v4911_v43  ;;  %3115 = vmatpush1.bf16.msra.mxu1 %v4921_v44 }
0x10f5   : > { %3075 = vmatprep.subr.bf16.mxu0 %v4916_v41  ;;  %3116 = vmatprep.subr.bf16.mxu1 %v4926_v39 }
0x10f8   : > { %3076 = vmatpush1.bf16.msra.mxu0 %v4931_v0  ;;  %3117 = vmatpush1.bf16.msra.mxu1 %v4941_v1 }
0x10f9   : > { %3077 = vmatprep.subr.bf16.mxu0 %v4936_v45  ;;  %3118 = vmatprep.subr.bf16.mxu1 %v4946_v46 }
0x10fc   : > { %3078 = vmatpush1.bf16.msra.mxu0 %v4951_v47  ;;  %3119 = vmatpush1.bf16.msra.mxu1 %v4961_v3 }
0x10fd   : > { %3079 = vmatprep.subr.bf16.mxu0 %v4956_v48  ;;  %3120 = vmatprep.subr.bf16.mxu1 %v4966_v4  ;;  %v3055_v4 = vrot.slane %v5271_v16, 7  ;;  %v3887_v16 = vld [vmem:[%s5042_s25 + $0x8] sm:$0xff] }
0x1100   : > { %3080 = vmatpush1.bf16.msra.mxu0 %v4971_v50  ;;  %3121 = vmatpush1.bf16.msra.mxu1 %v4981_v22 }
0x1101   : > { %3081 = vmatprep.subr.bf16.mxu0 %v4976_v36  ;;  %3122 = vmatprep.subr.bf16.mxu1 %v4986_v52 }
0x1104   : > { %3082 = vmatpush1.bf16.msra.mxu0 %v4991_v5  ;;  %3123 = vmatpush1.bf16.msra.mxu1 %v4997_v6 }
0x11ba   : > { %v2971_v54 = vpop.f32.mrb[24].mxu0  ;;  %v3012_v56 = vpop.f32.mrb[24].mxu1 }
0x11bb   : > { %v3023_v12 = vrot.slane %v2971_v54, 2  ;;  %v2973_v25 = vpop.f32.mrb[25].mxu0  ;;  %v3014_v23 = vpop.f32.mrb[25].mxu1  ;;  %v3025_v5 = vrot.slane %v3012_v56, 2  ;;  %v3889_v56 = vld [vmem:[%s5042_s25 + $0x18] sm:$0xff] }
0x11bc   : > { %v3024_v33 = vrot.slane %v2973_v25, 2  ;;  %v2975_v38 = vpop.f32.mrb[26].mxu0  ;;  %v3016_v19 = vpop.f32.mrb[26].mxu1  ;;  %v3026_v6 = vrot.slane %v3014_v23, 2 }
0x11bd   : > { %v3031_v34 = vadd.f32 %v3023_v12, %v5045_v2  ;;  %v2976_v35 = vpop.f32.mrb[27].mxu0  ;;  %v3017_v22 = vpop.f32.mrb[27].mxu1  ;;  %v3033_v41 = vadd.f32 %v3025_v5, %v5053_v24 }
0x11be   : > { %v3032_v42 = vadd.f32 %v3024_v33, %v5048_v7  ;;  %v3034_v44 = vadd.f32 %v3026_v6, %v5057_v28 }
0x11bf   : > { %v3458_v40 = vmul.f32 -1.442695, %v3031_v34  ;;  %v3460_v39 = vmul.f32 -1.442695, %v3033_v41 }
0x11c0   : > { %v3459_v43 = vmul.f32 -1.442695, %v3032_v42 }
0x11c1   : > { %3854 = vpow2.f32 %v3458_v40 }
0x11c2   : > { %3856 = vpow2.f32 %v3459_v43 }
0x11c3   : > { %3858 = vtanh.f32 %v3034_v44 }
0x11c4   : > { %3860 = vpow2.f32 %v3460_v39 }
0x11cb   : > { %v3855_v0 = vpop.eup %3854 }
0x11cc   : > { %v3044_v45 = vadd.f32 1.0, %v3855_v0  ;;  %v3857_v1 = vpop.eup %3856 }
0x11cd   : > { %v3045_v46 = vadd.f32 1.0, %v3857_v1  ;;  %v3859_v47 = vpop.eup %3858 }
0x11ce   : > { %3862 = vrcp.f32 %v3044_v45  ;;  %v3861_v48 = vpop.eup %3860 }
0x11cf   : > { %3864 = vrcp.f32 %v3045_v46  ;;  %v3046_v52 = vadd.f32 1.0, %v3861_v48 }
0x11d1   : > { %3866 = vrcp.f32 %v3046_v52 }
0x11d8   : > { %v3863_v3 = vpop.eup %3862 }
0x11d9   : > { %v3058_v50 = vmul.f32 %v3863_v3, %v3859_v47  ;;  %v3865_v36 = vpop.eup %3864 }
0x11da   : > { %v3057_v24 = vmul.f32 %v3865_v36, %v3055_v4 }
0x11db   : > { %v3867_v28 = vpop.eup %3866 }
0x11dc   : > { %v3059_v49 = vadd.f32 %v3058_v50, %v3057_v24 }
0x11de   : > { %3868 = vtanh.f32 %v3059_v49  ;;  %v3185_v42 = vrot.slane %v3059_v49, 7 }
0x11e8   : > { %v3869_v2 = vpop.eup %3868 }
0x11e9   : > { %v3061_v7 = vmul.f32 %v3869_v2, %v3867_v28 }
0x11eb   : > { %3062 = vst [vmem:[#allocation3] sm:$0x40] %v3061_v7  ;;  %v3063_v8 = vpack.c.bf16 %v3061_v7, %v3061_v7 }
0x11ed   : > { %v3065_v21 = vrot.slane %v3063_v8, 3 }
0x11ef   : > { %3100 = vmatmul.mubr.bf16.vlgmr.msra.gmra.mrb[28].mxu0 %v3065_v21  ;;  %3141 = vmatmul.mubr.bf16.vlgmr.msra.gmra.mrb[28].mxu1 %v3065_v21 }
0x12c2   : > { %v3101_v32 = vpop.f32.mrb[28].mxu0  ;;  %v3142_v29 = vpop.f32.mrb[28].mxu1 }
0x12c3   : > { %v3153_v26 = vrot.slane %v3101_v32, 1  ;;  %v3103_v9 = vpop.f32.mrb[29].mxu0  ;;  %v3144_v15 = vpop.f32.mrb[29].mxu1  ;;  %v3155_v10 = vrot.slane %v3142_v29, 1 }
0x12c4   : > { %v3154_v11 = vrot.slane %v3103_v9, 1  ;;  %v3105_v14 = vpop.f32.mrb[30].mxu0  ;;  %v3146_v17 = vpop.f32.mrb[30].mxu1  ;;  %v3156_v27 = vrot.slane %v3144_v15, 1 }
0x12c5   : > { %v3161_v13 = vadd.f32 %v3886_v51, %v3153_v26  ;;  %v3106_v18 = vpop.f32.mrb[31].mxu0  ;;  %v3147_v20 = vpop.f32.mrb[31].mxu1  ;;  %v3163_v54 = vadd.f32 %v3888_v30, %v3155_v10 }
0x12c6   : > { %v3162_v37 = vadd.f32 %v3887_v16, %v3154_v11  ;;  %v3164_v12 = vadd.f32 %v3889_v56, %v3156_v27 }
0x12c7   : > { %v3461_v31 = vmul.f32 -1.442695, %v3161_v13  ;;  %v3463_v25 = vmul.f32 -1.442695, %v3163_v54 }
0x12c8   : > { %v3462_v53 = vmul.f32 -1.442695, %v3162_v37 }
0x12c9   : > { %3870 = vpow2.f32 %v3461_v31 }
0x12ca   : > { %3872 = vpow2.f32 %v3462_v53 }
0x12cb   : > { %3874 = vtanh.f32 %v3164_v12 }
0x12cc   : > { %3876 = vpow2.f32 %v3463_v25 }
0x12d3   : > { %v3871_v23 = vpop.eup %3870 }
0x12d4   : > { %v3174_v33 = vadd.f32 1.0, %v3871_v23  ;;  %v3873_v38 = vpop.eup %3872 }
0x12d5   : > { %v3175_v19 = vadd.f32 1.0, %v3873_v38  ;;  %v3875_v34 = vpop.eup %3874 }
0x12d6   : > { %3878 = vrcp.f32 %v3174_v33  ;;  %v3877_v35 = vpop.eup %3876 }
0x12d7   : > { %3880 = vrcp.f32 %v3175_v19  ;;  %v3176_v5 = vadd.f32 1.0, %v3877_v35 }
0x12d9   : > { %3882 = vrcp.f32 %v3176_v5 }
0x12e0   : > { %v3879_v22 = vpop.eup %3878 }
0x12e1   : > { %v3188_v40 = vmul.f32 %v3879_v22, %v3875_v34  ;;  %v3881_v43 = vpop.eup %3880 }
0x12e2   : > { %v3187_v6 = vmul.f32 %v3881_v43, %v3185_v42 }
0x12e3   : > { %v3883_v44 = vpop.eup %3882 }
0x12e4   : > { %v3189_v41 = vadd.f32 %v3188_v40, %v3187_v6  }
0x12e6   : > { %3884 = vtanh.f32 %v3189_v41  ;;  %v5542_v51 = vmov %v3189_v41  ;;  %3202 = vst [vmem:[#allocation13 - $0x6] sm:$0x80] (%p1985_p11), %v3189_v41 }
0x12f0   : > { %v3885_v39 = vpop.eup %3884 }
0x12f1   : > { %v3191_v0 = vmul.f32 %v3885_v39, %v3883_v44  }
0x12f3   : > { %3192 = vst [vmem:[#allocation3] sm:$0x80] %v3191_v0  ;;  %v5543_v52 = vmov %v3191_v0  ;;  %3201 = vst [vmem:[#allocation11 - $0x6] sm:$0x80] (%p1985_p11), %v3191_v0 }
0x12f7   :  { %1987 = sbr.rel (!%p1985_p11) target bundleno = 2709 (0xa95), region = 96 }
0x12fa   : > { %v3194_v45 = vld [vmem:[#allocation3] sm:$0xff] }
0x12fb   : > { %v3195_v1 = vpack.c.bf16 %v3194_v45, %v3194_v45 }
0x12fd   : > { %3200 = vst [vmem:[%s3199_s27] sm:$0xf] %v3195_v1 }
0x12fe   :  { %3967 = shalt.err (!%p3964_p2)
}
0x12ff   :  { %s3968_s12 = scalar_lea.hbm %s5374_s5, 32 }
0x1300   :  { %p3969_p3 = scmp.ne.s32.totalorder %s5374_s5, %s3968_s12  ;;  %p3972_p4 = scmp.lt.u32.totalorder %s3968_s12, %s5374_s5 }
0x1302   :  { %p3974_p5 = pnand %p3972_p4, %p3969_p3 }
0x1304   :  { %3977 = shalt.err (!%p3974_p5)
}
0x1305   :  { %3224 = dma.vmem_to_hbm [thread:$0]  %s3222_s29, 32, %s5374_s5, [#allocation12]  }
0x1306   :  { %s3978_s16 = scalar_lea.vmem %s5323_s9, 128  ;;  %p3983_p7 = scmp.lt.s32.totalorder %s5323_s9, %s5323_s9 }
0x1307   :  { %p3979_p6 = scmp.ne.s32.totalorder %s5323_s9, %s3978_s16  ;;  %p3984_p8 = scmp.lt.s32.totalorder %s3978_s16, %s3978_s16 }
0x1309   :  { %p3985_p9 = por %p3984_p8, %p3983_p7 }
0x130b   :  { %p3986_p10 = pnand %p3985_p9, %p3979_p6 }
0x130d   :  { %3989 = shalt.err (!%p3986_p10)
}
0x130e   :  { %s3990_s19 = scalar_lea.hbm %s5373_s4, 128 }
0x130f   :  { %p3991_p11 = scmp.ne.s32.totalorder %s5373_s4, %s3990_s19  ;;  %p3994_p12 = scmp.lt.u32.totalorder %s3990_s19, %s5373_s4 }
0x1311   :  { %p3996_p13 = pnand %p3994_p12, %p3991_p11 }
0x1313   :  { %3999 = shalt.err (!%p3996_p13)
}
0x1314   :  { %3214 = dma.vmem_to_hbm [thread:$0]  %s5323_s9, 128, %s5373_s4, [#allocation6], %s4082_s1, %s4082_s1, %s4083_s21  }
0x1315   :  { %s4090_s25 = smov [#allocation13]  }
0x1316   :  { %s3231_s26 = sshll.u32 %s4090_s25, 4  ;;  %s3232_s26 = int_to_ptr.vmem [resolvable:$true] %s3231_s26 }
0x1317   :  { %s4000_s27 = scalar_lea.vmem %s3232_s26, 32  ;;  %p4005_p1 = scmp.lt.s32.totalorder %s3232_s26, %s3232_s26 }
0x1318   :  { %p4001_p0 = scmp.ne.s32.totalorder %s3232_s26, %s4000_s27  ;;  %p4006_p2 = scmp.lt.s32.totalorder %s4000_s27, %s4000_s27 }
0x131a   :  { %p4007_p3 = por %p4006_p2, %p4005_p1 }
0x131c   :  { %p4008_p4 = pnand %p4007_p3, %p4001_p0 }
0x131e   :  { %4011 = shalt.err (!%p4008_p4)
}
0x131f   :  { %s4012_s30 = scalar_lea.hbm %s5375_s6, 32 }
0x1320   :  { %p4013_p5 = scmp.ne.s32.totalorder %s5375_s6, %s4012_s30  ;;  %p4016_p6 = scmp.lt.u32.totalorder %s4012_s30, %s5375_s6 }
0x1322   :  { %p4018_p7 = pnand %p4016_p6, %p4013_p5 }
0x1324   :  { %4021 = shalt.err (!%p4018_p7)
}
0x1325   :  { %3234 = dma.vmem_to_hbm [thread:$0]  %s3232_s26, 32, %s5375_s6, [#allocation12]  }
0x1326   :  { %4050 = dma.done.wait [#allocation6], 128  }
0x1327   :  { %4051 = vsyncadd [#allocation6], 4294967168 }
0x1328   :  { %4052 = dma.done.wait [#allocation12], 64  }
0x1329   :  { %4053 = vsyncadd [#allocation12], 4294967232 }
0x132a   :  { %3244 = vsyncpa [#allocation5], 1 }
0x132b   :  { %3245 = vsyncpa [#allocation8], 1 }
0x132c   :  { %3246 = vsyncpa [#allocation6], 1 }
0x132d   :  { %3247 = vsyncpa [#allocation12], 1 }

</bundles_post_ra>
